<compile_context>
chip_gen: v5e
topology: v5e:2x2
jax: 0.10.0
libtpu: 0.0.40
codegen_flags: <defaults>
</compile_context>

<pallas_src>
import jax
import jax.numpy as jnp
from jax.experimental import pallas as pl
from jax.experimental.pallas import tpu as pltpu


def _round_up(x, m):
    return (x + m - 1) // m * m


# ----------------------------------------------------------------------------
# Kernel 1: fused Conv1 -> BN -> Pool -> ReLU -> Conv2 -> ... -> Conv3 stack,
# one batch element per grid step, all intermediates in VMEM.
# ----------------------------------------------------------------------------
def _conv_bn_pool_relu(hp_ref, wflat_ref, t_ref, slab_ref, y_ref):
    """One Conv1d + BatchNorm(eval) + MaxPool(2) + ReLU layer.

    hp_ref   : [L + K - 1, Cin]  zero-padded input rows (VMEM)
    wflat_ref: [K*Cin, Cout]     im2col-flattened taps, BN scale folded (bf16)
    t_ref    : [1, Cout]         folded conv-bias + BN shift (f32)
    slab_ref : [L, K*Cin]        f32 scratch for the in-kernel im2col slab
    y_ref    : [L, Cout]         f32 scratch for the full-length conv output
    returns  : [L//2, Cout]      pooled + ReLU activations (f32 value)
    """
    lp, cin = hp_ref.shape
    kcin, _ = wflat_ref.shape
    k_taps = kcin // cin
    l_out = lp - (k_taps - 1)
    half = l_out // 2

    # In-kernel im2col: tap-major column blocks from contiguous window reads.
    for k in range(k_taps):
        slab_ref[:, pl.ds(k * cin, cin)] = hp_ref[pl.ds(k, l_out), :]

    # One fat-contraction MXU matmul per layer (contraction = K*Cin),
    # bf16 operands with f32 accumulation.
    y_ref[...] = jnp.dot(slab_ref[...].astype(jnp.bfloat16), wflat_ref[...],
                         preferred_element_type=jnp.float32)

    # MaxPool(2) via stride-2 sublane reads; the per-channel shift t and the
    # ReLU commute with the max, so they are applied after pooling.
    even = y_ref[pl.ds(0, half, stride=2), :]
    odd = y_ref[pl.ds(1, half, stride=2), :]
    return jnp.maximum(jnp.maximum(even, odd) + t_ref[...], 0.0)


def _store_zero_padded(hp_ref, p):
    """Write pooled activations into the next layer's padded-input scratch."""
    rows, cin = p.shape
    pad = (hp_ref.shape[0] - rows) // 2
    hp_ref[pl.ds(0, pad), :] = jnp.zeros((pad, cin), jnp.float32)
    hp_ref[pl.ds(pad + rows, pad), :] = jnp.zeros((pad, cin), jnp.float32)
    hp_ref[pl.ds(pad, rows), :] = p


def fused_cnn_kernel(x_ref, w1_ref, t1_ref, w2_ref, t2_ref, w3_ref, t3_ref,
                     o_ref, slab1, y1, hp2, slab2, y2, hp3, slab3, y3):
    p1 = _conv_bn_pool_relu(x_ref, w1_ref, t1_ref, slab1, y1)
    _store_zero_padded(hp2, p1)
    p2 = _conv_bn_pool_relu(hp2, w2_ref, t2_ref, slab2, y2)
    _store_zero_padded(hp3, p2)
    p3 = _conv_bn_pool_relu(hp3, w3_ref, t3_ref, slab3, y3)
    o_ref[...] = p3.astype(o_ref.dtype)


def _prep_conv_layer(w, b, gamma, beta, mean, var, cin_pad, eps=1e-5):
    """Fold eval-mode BN into (scaled weights, shift); flatten taps for im2col."""
    cout, cin, k = w.shape
    s = gamma / jnp.sqrt(var + eps)
    t = (b - mean) * s + beta
    wt = jnp.transpose(w, (2, 1, 0)).astype(jnp.float32) * s[None, None, :]
    wt = jnp.pad(wt, ((0, 0), (0, cin_pad - cin), (0, 0)))     # zero channels
    return (wt.reshape(k * cin_pad, cout).astype(jnp.bfloat16),
            t.reshape(1, cout).astype(jnp.float32))


def fused_cnn_forward(x, conv_params):
    """x: [B, L, Cin] channels-last f32.  Returns [T, B, Cout3] bf16 time-major."""
    B, L, c0 = x.shape
    c1p, c2p, c3p = conv_params
    k1, k2, k3 = (c1p["w"].shape[2], c2p["w"].shape[2], c3p["w"].shape[2])
    c1, c2, c3 = (c1p["w"].shape[0], c2p["w"].shape[0], c3p["w"].shape[0])
    c0p = _round_up(c0, 32)              # lane-friendly slab column offsets

    l1, h1 = L, L // 2
    l2, h2 = h1, h1 // 2
    l3, t_steps = h2, h2 // 2

    w1, t1 = _prep_conv_layer(**c1p, cin_pad=c0p)
    w2, t2 = _prep_conv_layer(**c2p, cin_pad=c1)
    w3, t3 = _prep_conv_layer(**c3p, cin_pad=c2)

    pad1 = (k1 - 1) // 2
    lp0 = l1 + k1 - 1
    # Single small wrapper pad for layer 1 (length pad + channel pad to 32).
    xp = jnp.pad(x.astype(jnp.float32),
                 ((0, 0), (pad1, pad1), (0, c0p - c0)))

    out = pl.pallas_call(
        fused_cnn_kernel,
        out_shape=jax.ShapeDtypeStruct((t_steps, B * c3), jnp.bfloat16),
        grid=(B,),
        in_specs=[
            pl.BlockSpec((None, lp0, c0p), lambda b: (b, 0, 0)),
            pl.BlockSpec(w1.shape, lambda b: (0, 0)),
            pl.BlockSpec(t1.shape, lambda b: (0, 0)),
            pl.BlockSpec(w2.shape, lambda b: (0, 0)),
            pl.BlockSpec(t2.shape, lambda b: (0, 0)),
            pl.BlockSpec(w3.shape, lambda b: (0, 0)),
            pl.BlockSpec(t3.shape, lambda b: (0, 0)),
        ],
        # Time-major, lane-dense output: column block b = batch element b.
        out_specs=pl.BlockSpec((t_steps, c3), lambda b: (0, b)),
        scratch_shapes=[
            pltpu.VMEM((l1, k1 * c0p), jnp.float32),      # slab1
            pltpu.VMEM((l1, c1), jnp.float32),            # y1
            pltpu.VMEM((h1 + k2 - 1, c1), jnp.float32),   # hp2 (padded input)
            pltpu.VMEM((l2, k2 * c1), jnp.float32),       # slab2
            pltpu.VMEM((l2, c2), jnp.float32),            # y2
            pltpu.VMEM((h2 + k3 - 1, c2), jnp.float32),   # hp3
            pltpu.VMEM((l3, k3 * c2), jnp.float32),       # slab3
            pltpu.VMEM((l3, c3), jnp.float32),            # y3
        ],
        compiler_params=pltpu.CompilerParams(
            dimension_semantics=("parallel",),
            vmem_limit_bytes=48 * 1024 * 1024),
    )(xp, w1, t1, w2, t2, w3, t3)
    return out.reshape(t_steps, B, c3)


# ----------------------------------------------------------------------------
# Kernel 2: bidirectional LSTM (1 layer, batch_first) + Linear head,
# gridded over time chunks so gx is streamed through a small VMEM scratch.
# Gate order follows PyTorch: i, f, g, o.
# ----------------------------------------------------------------------------
def lstm_fc_kernel(x_ref, wi_f_ref, wh_f_ref, b_f_ref, wi_b_ref, b_b_ref,
                   wfc_ref, bfc_ref, o_ref, h_scr, c_scr, gx_scr):
    ci = pl.program_id(0)
    nch = pl.num_programs(0)
    bp, hdim = h_scr.shape
    tc = x_ref.shape[0] // bp

    @pl.when(ci == 0)
    def _():
        h_scr[...] = jnp.zeros_like(h_scr)
        c_scr[...] = jnp.zeros_like(c_scr)

    # Hoisted, time-invariant input projection for this chunk: one fat MXU
    # matmul over tc*Bp rows.  Gate biases (b_ih + b_hh) folded in here.
    gx_scr[...] = (jnp.dot(x_ref[...], wi_f_ref[...],
                           preferred_element_type=jnp.float32) + b_f_ref[...])

    wh = wh_f_ref[...]
    h = h_scr[...]
    c = c_scr[...]
    # Fully-unrolled short recurrence (tc is a small static chunk length):
    # only the [Bp,H] @ [H,4H] recurrent matmul + gate math is sequential.
    for t in range(tc):
        gates = gx_scr[pl.ds(t * bp, bp), :] + jnp.dot(
            h, wh, preferred_element_type=jnp.float32)
        i_g = jax.nn.sigmoid(gates[:, 0:hdim])
        f_g = jax.nn.sigmoid(gates[:, hdim:2 * hdim])
        g_g = jnp.tanh(gates[:, 2 * hdim:3 * hdim])
        o_g = jax.nn.sigmoid(gates[:, 3 * hdim:4 * hdim])
        c = f_g * c + i_g * g_g
        h = o_g * jnp.tanh(c)
    h_scr[...] = h
    c_scr[...] = c

    @pl.when(ci == nch - 1)
    def _():
        # Reverse direction contributes only its t = T-1 output, which is its
        # FIRST step from a zero initial state: one cell step, no W_hh matmul.
        x_last = x_ref[pl.ds((tc - 1) * bp, bp), :]
        gb = (jnp.dot(x_last, wi_b_ref[...],
                      preferred_element_type=jnp.float32) + b_b_ref[...])
        i_b = jax.nn.sigmoid(gb[:, 0:hdim])
        g_b = jnp.tanh(gb[:, 2 * hdim:3 * hdim])
        o_b = jax.nn.sigmoid(gb[:, 3 * hdim:4 * hdim])
        h_b = o_b * jnp.tanh(i_b * g_b)
        # fc(concat([h_fwd, h_bwd])) with num_classes padded to 128 lanes so
        # the final store is lane-dense; the wrapper slices the real classes.
        wfc = wfc_ref[...]
        o_ref[...] = (jnp.dot(h, wfc[0:hdim, :],
                              preferred_element_type=jnp.float32)
                      + jnp.dot(h_b, wfc[hdim:2 * hdim, :],
                                preferred_element_type=jnp.float32)
                      + bfc_ref[...])


def lstm_fc_head(x_tm, lstm_fwd, lstm_bwd, fc):
    """x_tm: [T, B, D] bf16 time-major.  Returns logits [B, num_classes] f32."""
    T, B, D = x_tm.shape
    H = lstm_fwd["w_hh"].shape[1]
    ncls = fc["w"].shape[0]
    bp = _round_up(B, 8)                 # sublane-dense h/c/gate tiles
    ncls_pad = _round_up(ncls, 128)      # lane-dense FC output

    xp = jnp.pad(x_tm, ((0, 0), (0, bp - B), (0, 0)))
    x_tb = xp.reshape(T * bp, D)         # row t*bp + b

    tc = T                               # largest chunk length <= 16 dividing T
    for d in range(min(T, 16), 0, -1):
        if T % d == 0:
            tc = d
            break
    nch = T // tc

    wi_f = lstm_fwd["w_ih"].T.astype(jnp.bfloat16)
    wh_f = lstm_fwd["w_hh"].T.astype(jnp.float32)
    b_f = (lstm_fwd["b_ih"] + lstm_fwd["b_hh"]).reshape(1, 4 * H).astype(jnp.float32)
    wi_b = lstm_bwd["w_ih"].T.astype(jnp.bfloat16)
    b_b = (lstm_bwd["b_ih"] + lstm_bwd["b_hh"]).reshape(1, 4 * H).astype(jnp.float32)
    wfc = jnp.zeros((2 * H, ncls_pad), jnp.float32).at[:, :ncls].set(fc["w"].T)
    bfc = jnp.zeros((1, ncls_pad), jnp.float32).at[0, :ncls].set(fc["b"])

    # dropout_fc is identity in eval mode -> not applied.
    out = pl.pallas_call(
        lstm_fc_kernel,
        out_shape=jax.ShapeDtypeStruct((bp, ncls_pad), jnp.float32),
        grid=(nch,),
        in_specs=[
            pl.BlockSpec((tc * bp, D), lambda i: (i, 0)),
            pl.BlockSpec((D, 4 * H), lambda i: (0, 0)),
            pl.BlockSpec((H, 4 * H), lambda i: (0, 0)),
            pl.BlockSpec((1, 4 * H), lambda i: (0, 0)),
            pl.BlockSpec((D, 4 * H), lambda i: (0, 0)),
            pl.BlockSpec((1, 4 * H), lambda i: (0, 0)),
            pl.BlockSpec((2 * H, ncls_pad), lambda i: (0, 0)),
            pl.BlockSpec((1, ncls_pad), lambda i: (0, 0)),
        ],
        out_specs=pl.BlockSpec((bp, ncls_pad), lambda i: (0, 0)),
        scratch_shapes=[
            pltpu.VMEM((bp, H), jnp.float32),            # h carry
            pltpu.VMEM((bp, H), jnp.float32),            # c carry
            pltpu.VMEM((tc * bp, 4 * H), jnp.float32),   # per-chunk gx
        ],
        compiler_params=pltpu.CompilerParams(
            dimension_semantics=("arbitrary",),
            vmem_limit_bytes=48 * 1024 * 1024),
    )(x_tb, wi_f, wh_f, b_f, wi_b, b_b, wfc, bfc)
    return out[:B, :ncls]


# ----------------------------------------------------------------------------
# Parameter init (deterministic, synthetic) — shapes follow the torch module.
# ----------------------------------------------------------------------------
def init_params(key, input_channels=19, cnn_output_channels=128,
                lstm_hidden_dim=128, num_classes=1):
    keys = iter(jax.random.split(key, 32))

    def u(shape, scale=0.08):
        return jax.random.uniform(next(keys), shape, jnp.float32, -scale, scale)

    p = {"conv": []}
    for cin, cout, k in [(input_channels, 32, 7), (32, 64, 5),
                         (64, cnn_output_channels, 3)]:
        p["conv"].append(dict(
            w=u((cout, cin, k)), b=u((cout,)),
            gamma=jnp.ones((cout,), jnp.float32),
            beta=jnp.zeros((cout,), jnp.float32),
            mean=jnp.zeros((cout,), jnp.float32),
            var=jnp.ones((cout,), jnp.float32)))

    D, H = cnn_output_channels, lstm_hidden_dim
    for name in ("lstm_fwd", "lstm_bwd"):
        p[name] = dict(w_ih=u((4 * H, D)), w_hh=u((4 * H, H)),
                       b_ih=u((4 * H,)), b_hh=u((4 * H,)))
    p["fc"] = dict(w=u((num_classes, 2 * H)), b=u((num_classes,)))
    return p


# ----------------------------------------------------------------------------
# Full forward pass (mirrors CNN_LSTM.forward, inference/eval semantics).
# ----------------------------------------------------------------------------
def cnn_lstm_forward(x, params, input_channels=19):
    # same orientation handling as the torch module
    if x.shape[1] == input_channels and x.shape[2] != input_channels:
        pass
    elif x.shape[2] == input_channels and x.shape[1] != input_channels:
        x = jnp.transpose(x, (0, 2, 1))
    else:
        raise ValueError(f"ambiguous input shape {x.shape}")

    # [B, C, L] -> channels-last [B, L, C] for the fused conv kernel
    xc = jnp.transpose(x, (0, 2, 1)).astype(jnp.float32)
    x_tm = fused_cnn_forward(xc, params["conv"])      # [T, B, D] bf16 (time-major)
    return lstm_fc_head(x_tm, params["lstm_fwd"], params["lstm_bwd"],
                        params["fc"])


if __name__ == "__main__":
    key = jax.random.PRNGKey(0)
    k_param, k_x = jax.random.split(key)

    B, C_IN, L = 2, 19, 64          # small: 64 samples -> T = 64 / 8 = 8 LSTM steps
    params = init_params(k_param, input_channels=C_IN)

    x = jax.random.normal(k_x, (B, C_IN, L), jnp.float32)   # torch-style [B, C, L]
    fwd = jax.jit(lambda xx: cnn_lstm_forward(xx, params, input_channels=C_IN))
    logits = jax.block_until_ready(fwd(x))

    assert logits.shape == (B, 1), logits.shape
    assert bool(jnp.all(jnp.isfinite(logits)))
    print("KERNEL_OK")
</pallas_src>

<mosaic_0001>
module attributes {stable_mosaic.version = 11 : i64} {
  func.func @fused_cnn_kernel(%arg0: i32, %arg1: memref<1x70x32xf32, #tpu.memory_space<vmem>>, %arg2: memref<224x32xbf16, #tpu.memory_space<vmem>>, %arg3: memref<1x32xf32, #tpu.memory_space<vmem>>, %arg4: memref<160x64xbf16, #tpu.memory_space<vmem>>, %arg5: memref<1x64xf32, #tpu.memory_space<vmem>>, %arg6: memref<192x128xbf16, #tpu.memory_space<vmem>>, %arg7: memref<1x128xf32, #tpu.memory_space<vmem>>, %arg8: memref<8x128xbf16, #tpu.memory_space<vmem>>, %arg9: memref<64x224xf32, #tpu.memory_space<vmem>>, %arg10: memref<64x32xf32, #tpu.memory_space<vmem>>, %arg11: memref<36x32xf32, #tpu.memory_space<vmem>>, %arg12: memref<32x160xf32, #tpu.memory_space<vmem>>, %arg13: memref<32x64xf32, #tpu.memory_space<vmem>>, %arg14: memref<18x64xf32, #tpu.memory_space<vmem>>, %arg15: memref<16x192xf32, #tpu.memory_space<vmem>>, %arg16: memref<16x128xf32, #tpu.memory_space<vmem>>) attributes {dimension_semantics = [#tpu.dimension_semantics<parallel>], iteration_bounds = array<i64: 2>, scalar_prefetch = 0 : i64, scratch_operands = 8 : i64, tpu.core_type = #tpu.core_type<tc>, window_params = [{transform_indices = @transform_0, window_bounds = array<i64: 1, 70, 32>}, {pipeline_mode = #tpu.pipeline_mode<synchronous>, transform_indices = @transform_1, window_bounds = array<i64: 224, 32>}, {pipeline_mode = #tpu.pipeline_mode<synchronous>, transform_indices = @transform_2, window_bounds = array<i64: 1, 32>}, {pipeline_mode = #tpu.pipeline_mode<synchronous>, transform_indices = @transform_3, window_bounds = array<i64: 160, 64>}, {pipeline_mode = #tpu.pipeline_mode<synchronous>, transform_indices = @transform_4, window_bounds = array<i64: 1, 64>}, {pipeline_mode = #tpu.pipeline_mode<synchronous>, transform_indices = @transform_5, window_bounds = array<i64: 192, 128>}, {pipeline_mode = #tpu.pipeline_mode<synchronous>, transform_indices = @transform_6, window_bounds = array<i64: 1, 128>}, {transform_indices = @transform_7, window_bounds = array<i64: 8, 128>}]} {
    %c0 = arith.constant 0 : index
    %c0_0 = arith.constant 0 : index
    %c0_1 = arith.constant 0 : index
    %0 = vector.load %arg1[%c0, %c0_0, %c0_1] : memref<1x70x32xf32, #tpu.memory_space<vmem>>, vector<1x64x32xf32>
    %1 = vector.shape_cast %0 : vector<1x64x32xf32> to vector<64x32xf32>
    %c0_2 = arith.constant 0 : index
    %c0_3 = arith.constant 0 : index
    %2 = vector.load %arg9[%c0_2, %c0_3] : memref<64x224xf32, #tpu.memory_space<vmem>>, vector<64x32xf32>
    tpu.vector_store %arg9[%c0_2, %c0_3], %1 {strides = array<i32>} : memref<64x224xf32, #tpu.memory_space<vmem>>, vector<64x32xf32>,
    %c0_4 = arith.constant 0 : index
    %c1 = arith.constant 1 : index
    %c0_5 = arith.constant 0 : index
    %3 = vector.load %arg1[%c0_4, %c1, %c0_5] : memref<1x70x32xf32, #tpu.memory_space<vmem>>, vector<1x64x32xf32>
    %4 = vector.shape_cast %3 : vector<1x64x32xf32> to vector<64x32xf32>
    %c0_6 = arith.constant 0 : index
    %c32 = arith.constant 32 : index
    %5 = vector.load %arg9[%c0_6, %c32] : memref<64x224xf32, #tpu.memory_space<vmem>>, vector<64x32xf32>
    tpu.vector_store %arg9[%c0_6, %c32], %4 {strides = array<i32>} : memref<64x224xf32, #tpu.memory_space<vmem>>, vector<64x32xf32>,
    %c0_7 = arith.constant 0 : index
    %c2 = arith.constant 2 : index
    %c0_8 = arith.constant 0 : index
    %6 = vector.load %arg1[%c0_7, %c2, %c0_8] : memref<1x70x32xf32, #tpu.memory_space<vmem>>, vector<1x64x32xf32>
    %7 = vector.shape_cast %6 : vector<1x64x32xf32> to vector<64x32xf32>
    %c0_9 = arith.constant 0 : index
    %c64 = arith.constant 64 : index
    %8 = vector.load %arg9[%c0_9, %c64] : memref<64x224xf32, #tpu.memory_space<vmem>>, vector<64x32xf32>
    tpu.vector_store %arg9[%c0_9, %c64], %7 {strides = array<i32>} : memref<64x224xf32, #tpu.memory_space<vmem>>, vector<64x32xf32>,
    %c0_10 = arith.constant 0 : index
    %c3 = arith.constant 3 : index
    %c0_11 = arith.constant 0 : index
    %9 = vector.load %arg1[%c0_10, %c3, %c0_11] : memref<1x70x32xf32, #tpu.memory_space<vmem>>, vector<1x64x32xf32>
    %10 = vector.shape_cast %9 : vector<1x64x32xf32> to vector<64x32xf32>
    %c0_12 = arith.constant 0 : index
    %c96 = arith.constant 96 : index
    %11 = vector.load %arg9[%c0_12, %c96] : memref<64x224xf32, #tpu.memory_space<vmem>>, vector<64x32xf32>
    tpu.vector_store %arg9[%c0_12, %c96], %10 {strides = array<i32>} : memref<64x224xf32, #tpu.memory_space<vmem>>, vector<64x32xf32>,
    %c0_13 = arith.constant 0 : index
    %c4 = arith.constant 4 : index
    %c0_14 = arith.constant 0 : index
    %12 = vector.load %arg1[%c0_13, %c4, %c0_14] : memref<1x70x32xf32, #tpu.memory_space<vmem>>, vector<1x64x32xf32>
    %13 = vector.shape_cast %12 : vector<1x64x32xf32> to vector<64x32xf32>
    %c0_15 = arith.constant 0 : index
    %c128 = arith.constant 128 : index
    %14 = vector.load %arg9[%c0_15, %c128] : memref<64x224xf32, #tpu.memory_space<vmem>>, vector<64x32xf32>
    tpu.vector_store %arg9[%c0_15, %c128], %13 {strides = array<i32>} : memref<64x224xf32, #tpu.memory_space<vmem>>, vector<64x32xf32>,
    %c0_16 = arith.constant 0 : index
    %c5 = arith.constant 5 : index
    %c0_17 = arith.constant 0 : index
    %15 = vector.load %arg1[%c0_16, %c5, %c0_17] : memref<1x70x32xf32, #tpu.memory_space<vmem>>, vector<1x64x32xf32>
    %16 = vector.shape_cast %15 : vector<1x64x32xf32> to vector<64x32xf32>
    %c0_18 = arith.constant 0 : index
    %c160 = arith.constant 160 : index
    %17 = vector.load %arg9[%c0_18, %c160] : memref<64x224xf32, #tpu.memory_space<vmem>>, vector<64x32xf32>
    tpu.vector_store %arg9[%c0_18, %c160], %16 {strides = array<i32>} : memref<64x224xf32, #tpu.memory_space<vmem>>, vector<64x32xf32>,
    %c0_19 = arith.constant 0 : index
    %c6 = arith.constant 6 : index
    %c0_20 = arith.constant 0 : index
    %18 = vector.load %arg1[%c0_19, %c6, %c0_20] : memref<1x70x32xf32, #tpu.memory_space<vmem>>, vector<1x64x32xf32>
    %19 = vector.shape_cast %18 : vector<1x64x32xf32> to vector<64x32xf32>
    %c0_21 = arith.constant 0 : index
    %c192 = arith.constant 192 : index
    %20 = vector.load %arg9[%c0_21, %c192] : memref<64x224xf32, #tpu.memory_space<vmem>>, vector<64x32xf32>
    tpu.vector_store %arg9[%c0_21, %c192], %19 {strides = array<i32>} : memref<64x224xf32, #tpu.memory_space<vmem>>, vector<64x32xf32>,
    %c0_22 = arith.constant 0 : index
    %c0_23 = arith.constant 0 : index
    %21 = vector.load %arg9[%c0_22, %c0_23] : memref<64x224xf32, #tpu.memory_space<vmem>>, vector<64x224xf32>
    %22 = arith.truncf %21 : vector<64x224xf32> to vector<64x224xbf16>
    %c0_24 = arith.constant 0 : index
    %c0_25 = arith.constant 0 : index
    %23 = vector.load %arg2[%c0_24, %c0_25] : memref<224x32xbf16, #tpu.memory_space<vmem>>, vector<224x32xbf16>
    %cst = arith.constant dense<0.000000e+00> : vector<64x32xf32>
    %24 = tpu.matmul %22, %23, %cst {dimension_numbers = #tpu.dot_dimension_numbers<[1], [0], [0], [1], [0, 0, 1, 1], [], []>} : vector<64x224xbf16>, vector<224x32xbf16>, vector<64x32xf32> -> vector<64x32xf32>
    %c0_26 = arith.constant 0 : index
    %c0_27 = arith.constant 0 : index
    %25 = vector.load %arg10[%c0_26, %c0_27] : memref<64x32xf32, #tpu.memory_space<vmem>>, vector<64x32xf32>
    tpu.vector_store %arg10[%c0_26, %c0_27], %24 {strides = array<i32>} : memref<64x32xf32, #tpu.memory_space<vmem>>, vector<64x32xf32>,
    %c0_28 = arith.constant 0 : index
    %c0_29 = arith.constant 0 : index
    %26 = tpu.strided_load %arg10[%c0_28, %c0_29] {strides = array<i32: 2, 1>} : memref<64x32xf32, #tpu.memory_space<vmem>>, vector<32x32xf32>
    %c1_30 = arith.constant 1 : index
    %c0_31 = arith.constant 0 : index
    %27 = tpu.strided_load %arg10[%c1_30, %c0_31] {strides = array<i32: 2, 1>} : memref<64x32xf32, #tpu.memory_space<vmem>>, vector<32x32xf32>
    %28 = arith.maximumf %26, %27 : vector<32x32xf32>
    %c0_32 = arith.constant 0 : index
    %c0_33 = arith.constant 0 : index
    %29 = vector.load %arg3[%c0_32, %c0_33] : memref<1x32xf32, #tpu.memory_space<vmem>>, vector<1x32xf32>
    %30 = vector.broadcast %29 : vector<1x32xf32> to vector<32x32xf32>
    %31 = arith.addf %28, %30 : vector<32x32xf32>
    %cst_34 = arith.constant 0.000000e+00 : f32
    %32 = vector.broadcast %cst_34 : f32 to vector<32x32xf32>
    %33 = arith.maximumf %31, %32 : vector<32x32xf32>
    %cst_35 = arith.constant 0.000000e+00 : f32
    %34 = vector.broadcast %cst_35 : f32 to vector<2x32xf32>
    %c0_36 = arith.constant 0 : index
    %c0_37 = arith.constant 0 : index
    %35 = vector.load %arg11[%c0_36, %c0_37] : memref<36x32xf32, #tpu.memory_space<vmem>>, vector<2x32xf32>
    tpu.vector_store %arg11[%c0_36, %c0_37], %34 {strides = array<i32>} : memref<36x32xf32, #tpu.memory_space<vmem>>, vector<2x32xf32>,
    %cst_38 = arith.constant 0.000000e+00 : f32
    %36 = vector.broadcast %cst_38 : f32 to vector<2x32xf32>
    %c34 = arith.constant 34 : index
    %c0_39 = arith.constant 0 : index
    %37 = vector.load %arg11[%c34, %c0_39] : memref<36x32xf32, #tpu.memory_space<vmem>>, vector<2x32xf32>
    tpu.vector_store %arg11[%c34, %c0_39], %36 {strides = array<i32>} : memref<36x32xf32, #tpu.memory_space<vmem>>, vector<2x32xf32>,
    %c2_40 = arith.constant 2 : index
    %c0_41 = arith.constant 0 : index
    %38 = vector.load %arg11[%c2_40, %c0_41] : memref<36x32xf32, #tpu.memory_space<vmem>>, vector<32x32xf32>
    tpu.vector_store %arg11[%c2_40, %c0_41], %33 {strides = array<i32>} : memref<36x32xf32, #tpu.memory_space<vmem>>, vector<32x32xf32>,
    %c0_42 = arith.constant 0 : index
    %c0_43 = arith.constant 0 : index
    %39 = vector.load %arg11[%c0_42, %c0_43] : memref<36x32xf32, #tpu.memory_space<vmem>>, vector<32x32xf32>
    %c0_44 = arith.constant 0 : index
    %c0_45 = arith.constant 0 : index
    %40 = vector.load %arg12[%c0_44, %c0_45] : memref<32x160xf32, #tpu.memory_space<vmem>>, vector<32x32xf32>
    tpu.vector_store %arg12[%c0_44, %c0_45], %39 {strides = array<i32>} : memref<32x160xf32, #tpu.memory_space<vmem>>, vector<32x32xf32>,
    %c1_46 = arith.constant 1 : index
    %c0_47 = arith.constant 0 : index
    %41 = vector.load %arg11[%c1_46, %c0_47] : memref<36x32xf32, #tpu.memory_space<vmem>>, vector<32x32xf32>
    %c0_48 = arith.constant 0 : index
    %c32_49 = arith.constant 32 : index
    %42 = vector.load %arg12[%c0_48, %c32_49] : memref<32x160xf32, #tpu.memory_space<vmem>>, vector<32x32xf32>
    tpu.vector_store %arg12[%c0_48, %c32_49], %41 {strides = array<i32>} : memref<32x160xf32, #tpu.memory_space<vmem>>, vector<32x32xf32>,
    %c2_50 = arith.constant 2 : index
    %c0_51 = arith.constant 0 : index
    %43 = vector.load %arg11[%c2_50, %c0_51] : memref<36x32xf32, #tpu.memory_space<vmem>>, vector<32x32xf32>
    %c0_52 = arith.constant 0 : index
    %c64_53 = arith.constant 64 : index
    %44 = vector.load %arg12[%c0_52, %c64_53] : memref<32x160xf32, #tpu.memory_space<vmem>>, vector<32x32xf32>
    tpu.vector_store %arg12[%c0_52, %c64_53], %43 {strides = array<i32>} : memref<32x160xf32, #tpu.memory_space<vmem>>, vector<32x32xf32>,
    %c3_54 = arith.constant 3 : index
    %c0_55 = arith.constant 0 : index
    %45 = vector.load %arg11[%c3_54, %c0_55] : memref<36x32xf32, #tpu.memory_space<vmem>>, vector<32x32xf32>
    %c0_56 = arith.constant 0 : index
    %c96_57 = arith.constant 96 : index
    %46 = vector.load %arg12[%c0_56, %c96_57] : memref<32x160xf32, #tpu.memory_space<vmem>>, vector<32x32xf32>
    tpu.vector_store %arg12[%c0_56, %c96_57], %45 {strides = array<i32>} : memref<32x160xf32, #tpu.memory_space<vmem>>, vector<32x32xf32>,
    %c4_58 = arith.constant 4 : index
    %c0_59 = arith.constant 0 : index
    %47 = vector.load %arg11[%c4_58, %c0_59] : memref<36x32xf32, #tpu.memory_space<vmem>>, vector<32x32xf32>
    %c0_60 = arith.constant 0 : index
    %c128_61 = arith.constant 128 : index
    %48 = vector.load %arg12[%c0_60, %c128_61] : memref<32x160xf32, #tpu.memory_space<vmem>>, vector<32x32xf32>
    tpu.vector_store %arg12[%c0_60, %c128_61], %47 {strides = array<i32>} : memref<32x160xf32, #tpu.memory_space<vmem>>, vector<32x32xf32>,
    %c0_62 = arith.constant 0 : index
    %c0_63 = arith.constant 0 : index
    %49 = vector.load %arg12[%c0_62, %c0_63] : memref<32x160xf32, #tpu.memory_space<vmem>>, vector<32x160xf32>
    %50 = arith.truncf %49 : vector<32x160xf32> to vector<32x160xbf16>
    %c0_64 = arith.constant 0 : index
    %c0_65 = arith.constant 0 : index
    %51 = vector.load %arg4[%c0_64, %c0_65] : memref<160x64xbf16, #tpu.memory_space<vmem>>, vector<160x64xbf16>
    %cst_66 = arith.constant dense<0.000000e+00> : vector<32x64xf32>
    %52 = tpu.matmul %50, %51, %cst_66 {dimension_numbers = #tpu.dot_dimension_numbers<[1], [0], [0], [1], [0, 0, 1, 1], [], []>} : vector<32x160xbf16>, vector<160x64xbf16>, vector<32x64xf32> -> vector<32x64xf32>
    %c0_67 = arith.constant 0 : index
    %c0_68 = arith.constant 0 : index
    %53 = vector.load %arg13[%c0_67, %c0_68] : memref<32x64xf32, #tpu.memory_space<vmem>>, vector<32x64xf32>
    tpu.vector_store %arg13[%c0_67, %c0_68], %52 {strides = array<i32>} : memref<32x64xf32, #tpu.memory_space<vmem>>, vector<32x64xf32>,
    %c0_69 = arith.constant 0 : index
    %c0_70 = arith.constant 0 : index
    %54 = tpu.strided_load %arg13[%c0_69, %c0_70] {strides = array<i32: 2, 1>} : memref<32x64xf32, #tpu.memory_space<vmem>>, vector<16x64xf32>
    %c1_71 = arith.constant 1 : index
    %c0_72 = arith.constant 0 : index
    %55 = tpu.strided_load %arg13[%c1_71, %c0_72] {strides = array<i32: 2, 1>} : memref<32x64xf32, #tpu.memory_space<vmem>>, vector<16x64xf32>
    %56 = arith.maximumf %54, %55 : vector<16x64xf32>
    %c0_73 = arith.constant 0 : index
    %c0_74 = arith.constant 0 : index
    %57 = vector.load %arg5[%c0_73, %c0_74] : memref<1x64xf32, #tpu.memory_space<vmem>>, vector<1x64xf32>
    %58 = vector.broadcast %57 : vector<1x64xf32> to vector<16x64xf32>
    %59 = arith.addf %56, %58 : vector<16x64xf32>
    %cst_75 = arith.constant 0.000000e+00 : f32
    %60 = vector.broadcast %cst_75 : f32 to vector<16x64xf32>
    %61 = arith.maximumf %59, %60 : vector<16x64xf32>
    %cst_76 = arith.constant 0.000000e+00 : f32
    %62 = vector.broadcast %cst_76 : f32 to vector<1x64xf32>
    %c0_77 = arith.constant 0 : index
    %c0_78 = arith.constant 0 : index
    %63 = vector.load %arg14[%c0_77, %c0_78] : memref<18x64xf32, #tpu.memory_space<vmem>>, vector<1x64xf32>
    tpu.vector_store %arg14[%c0_77, %c0_78], %62 {strides = array<i32>} : memref<18x64xf32, #tpu.memory_space<vmem>>, vector<1x64xf32>,
    %cst_79 = arith.constant 0.000000e+00 : f32
    %64 = vector.broadcast %cst_79 : f32 to vector<1x64xf32>
    %c17 = arith.constant 17 : index
    %c0_80 = arith.constant 0 : index
    %65 = vector.load %arg14[%c17, %c0_80] : memref<18x64xf32, #tpu.memory_space<vmem>>, vector<1x64xf32>
    tpu.vector_store %arg14[%c17, %c0_80], %64 {strides = array<i32>} : memref<18x64xf32, #tpu.memory_space<vmem>>, vector<1x64xf32>,
    %c1_81 = arith.constant 1 : index
    %c0_82 = arith.constant 0 : index
    %66 = vector.load %arg14[%c1_81, %c0_82] : memref<18x64xf32, #tpu.memory_space<vmem>>, vector<16x64xf32>
    tpu.vector_store %arg14[%c1_81, %c0_82], %61 {strides = array<i32>} : memref<18x64xf32, #tpu.memory_space<vmem>>, vector<16x64xf32>,
    %c0_83 = arith.constant 0 : index
    %c0_84 = arith.constant 0 : index
    %67 = vector.load %arg14[%c0_83, %c0_84] : memref<18x64xf32, #tpu.memory_space<vmem>>, vector<16x64xf32>
    %c0_85 = arith.constant 0 : index
    %c0_86 = arith.constant 0 : index
    %68 = vector.load %arg15[%c0_85, %c0_86] : memref<16x192xf32, #tpu.memory_space<vmem>>, vector<16x64xf32>
    tpu.vector_store %arg15[%c0_85, %c0_86], %67 {strides = array<i32>} : memref<16x192xf32, #tpu.memory_space<vmem>>, vector<16x64xf32>,
    %c1_87 = arith.constant 1 : index
    %c0_88 = arith.constant 0 : index
    %69 = vector.load %arg14[%c1_87, %c0_88] : memref<18x64xf32, #tpu.memory_space<vmem>>, vector<16x64xf32>
    %c0_89 = arith.constant 0 : index
    %c64_90 = arith.constant 64 : index
    %70 = vector.load %arg15[%c0_89, %c64_90] : memref<16x192xf32, #tpu.memory_space<vmem>>, vector<16x64xf32>
    tpu.vector_store %arg15[%c0_89, %c64_90], %69 {strides = array<i32>} : memref<16x192xf32, #tpu.memory_space<vmem>>, vector<16x64xf32>,
    %c2_91 = arith.constant 2 : index
    %c0_92 = arith.constant 0 : index
    %71 = vector.load %arg14[%c2_91, %c0_92] : memref<18x64xf32, #tpu.memory_space<vmem>>, vector<16x64xf32>
    %c0_93 = arith.constant 0 : index
    %c128_94 = arith.constant 128 : index
    %72 = vector.load %arg15[%c0_93, %c128_94] : memref<16x192xf32, #tpu.memory_space<vmem>>, vector<16x64xf32>
    tpu.vector_store %arg15[%c0_93, %c128_94], %71 {strides = array<i32>} : memref<16x192xf32, #tpu.memory_space<vmem>>, vector<16x64xf32>,
    %c0_95 = arith.constant 0 : index
    %c0_96 = arith.constant 0 : index
    %73 = vector.load %arg15[%c0_95, %c0_96] : memref<16x192xf32, #tpu.memory_space<vmem>>, vector<16x192xf32>
    %74 = arith.truncf %73 : vector<16x192xf32> to vector<16x192xbf16>
    %c0_97 = arith.constant 0 : index
    %c0_98 = arith.constant 0 : index
    %75 = vector.load %arg6[%c0_97, %c0_98] : memref<192x128xbf16, #tpu.memory_space<vmem>>, vector<192x128xbf16>
    %cst_99 = arith.constant dense<0.000000e+00> : vector<16x128xf32>
    %76 = tpu.matmul %74, %75, %cst_99 {dimension_numbers = #tpu.dot_dimension_numbers<[1], [0], [0], [1], [0, 0, 1, 1], [], []>} : vector<16x192xbf16>, vector<192x128xbf16>, vector<16x128xf32> -> vector<16x128xf32>
    %c0_100 = arith.constant 0 : index
    %c0_101 = arith.constant 0 : index
    %77 = vector.load %arg16[%c0_100, %c0_101] : memref<16x128xf32, #tpu.memory_space<vmem>>, vector<16x128xf32>
    tpu.vector_store %arg16[%c0_100, %c0_101], %76 {strides = array<i32>} : memref<16x128xf32, #tpu.memory_space<vmem>>, vector<16x128xf32>,
    %c0_102 = arith.constant 0 : index
    %c0_103 = arith.constant 0 : index
    %78 = tpu.strided_load %arg16[%c0_102, %c0_103] {strides = array<i32: 2, 1>} : memref<16x128xf32, #tpu.memory_space<vmem>>, vector<8x128xf32>
    %c1_104 = arith.constant 1 : index
    %c0_105 = arith.constant 0 : index
    %79 = tpu.strided_load %arg16[%c1_104, %c0_105] {strides = array<i32: 2, 1>} : memref<16x128xf32, #tpu.memory_space<vmem>>, vector<8x128xf32>
    %80 = arith.maximumf %78, %79 : vector<8x128xf32>
    %c0_106 = arith.constant 0 : index
    %c0_107 = arith.constant 0 : index
    %81 = vector.load %arg7[%c0_106, %c0_107] : memref<1x128xf32, #tpu.memory_space<vmem>>, vector<1x128xf32>
    %82 = vector.broadcast %81 : vector<1x128xf32> to vector<8x128xf32>
    %83 = arith.addf %80, %82 : vector<8x128xf32>
    %cst_108 = arith.constant 0.000000e+00 : f32
    %84 = vector.broadcast %cst_108 : f32 to vector<8x128xf32>
    %85 = arith.maximumf %83, %84 : vector<8x128xf32>
    %86 = arith.truncf %85 : vector<8x128xf32> to vector<8x128xbf16>
    %c0_109 = arith.constant 0 : index
    %c0_110 = arith.constant 0 : index
    %87 = vector.load %arg8[%c0_109, %c0_110] : memref<8x128xbf16, #tpu.memory_space<vmem>>, vector<8x128xbf16>
    tpu.vector_store %arg8[%c0_109, %c0_110], %86 {strides = array<i32>} : memref<8x128xbf16, #tpu.memory_space<vmem>>, vector<8x128xbf16>,
    return
  }
  func.func @transform_0(%arg0: i32) -> (i32, i32, i32) {
    %c0_i32 = arith.constant 0 : i32
    %c0_i32_0 = arith.constant 0 : i32
    %c0_i32_1 = arith.constant 0 : i32
    return %arg0, %c0_i32, %c0_i32_0 : i32, i32, i32
  }
  func.func @transform_1(%arg0: i32) -> (i32, i32) {
    %c0_i32 = arith.constant 0 : i32
    %c0_i32_0 = arith.constant 0 : i32
    %c0_i32_1 = arith.constant 0 : i32
    return %c0_i32, %c0_i32_0 : i32, i32
  }
  func.func @transform_2(%arg0: i32) -> (i32, i32) {
    %c0_i32 = arith.constant 0 : i32
    %c0_i32_0 = arith.constant 0 : i32
    %c0_i32_1 = arith.constant 0 : i32
    return %c0_i32, %c0_i32_0 : i32, i32
  }
  func.func @transform_3(%arg0: i32) -> (i32, i32) {
    %c0_i32 = arith.constant 0 : i32
    %c0_i32_0 = arith.constant 0 : i32
    %c0_i32_1 = arith.constant 0 : i32
    return %c0_i32, %c0_i32_0 : i32, i32
  }
  func.func @transform_4(%arg0: i32) -> (i32, i32) {
    %c0_i32 = arith.constant 0 : i32
    %c0_i32_0 = arith.constant 0 : i32
    %c0_i32_1 = arith.constant 0 : i32
    return %c0_i32, %c0_i32_0 : i32, i32
  }
  func.func @transform_5(%arg0: i32) -> (i32, i32) {
    %c0_i32 = arith.constant 0 : i32
    %c0_i32_0 = arith.constant 0 : i32
    %c0_i32_1 = arith.constant 0 : i32
    return %c0_i32, %c0_i32_0 : i32, i32
  }
  func.func @transform_6(%arg0: i32) -> (i32, i32) {
    %c0_i32 = arith.constant 0 : i32
    %c0_i32_0 = arith.constant 0 : i32
    %c0_i32_1 = arith.constant 0 : i32
    return %c0_i32, %c0_i32_0 : i32, i32
  }
  func.func @transform_7(%arg0: i32) -> (i32, i32) {
    %c0_i32 = arith.constant 0 : i32
    %c0_i32_0 = arith.constant 0 : i32
    return %c0_i32, %arg0 : i32, i32
  }
}

module attributes {stable_mosaic.version = 11 : i64} {
  func.func @lstm_fc_kernel(%arg0: i32, %arg1: memref<64x128xbf16, #tpu.memory_space<vmem>>, %arg2: memref<128x512xbf16, #tpu.memory_space<vmem>>, %arg3: memref<128x512xf32, #tpu.memory_space<vmem>>, %arg4: memref<1x512xf32, #tpu.memory_space<vmem>>, %arg5: memref<128x512xbf16, #tpu.memory_space<vmem>>, %arg6: memref<1x512xf32, #tpu.memory_space<vmem>>, %arg7: memref<256x128xf32, #tpu.memory_space<vmem>>, %arg8: memref<1x128xf32, #tpu.memory_space<vmem>>, %arg9: memref<8x128xf32, #tpu.memory_space<vmem>>, %arg10: memref<8x128xf32, #tpu.memory_space<vmem>>, %arg11: memref<8x128xf32, #tpu.memory_space<vmem>>, %arg12: memref<64x512xf32, #tpu.memory_space<vmem>>) attributes {dimension_semantics = [#tpu.dimension_semantics<arbitrary>], iteration_bounds = array<i64: 1>, scalar_prefetch = 0 : i64, scratch_operands = 3 : i64, tpu.core_type = #tpu.core_type<tc>, window_params = [{transform_indices = @transform_0, window_bounds = array<i64: 64, 128>}, {pipeline_mode = #tpu.pipeline_mode<synchronous>, transform_indices = @transform_1, window_bounds = array<i64: 128, 512>}, {pipeline_mode = #tpu.pipeline_mode<synchronous>, transform_indices = @transform_2, window_bounds = array<i64: 128, 512>}, {pipeline_mode = #tpu.pipeline_mode<synchronous>, transform_indices = @transform_3, window_bounds = array<i64: 1, 512>}, {pipeline_mode = #tpu.pipeline_mode<synchronous>, transform_indices = @transform_4, window_bounds = array<i64: 128, 512>}, {pipeline_mode = #tpu.pipeline_mode<synchronous>, transform_indices = @transform_5, window_bounds = array<i64: 1, 512>}, {pipeline_mode = #tpu.pipeline_mode<synchronous>, transform_indices = @transform_6, window_bounds = array<i64: 256, 128>}, {pipeline_mode = #tpu.pipeline_mode<synchronous>, transform_indices = @transform_7, window_bounds = array<i64: 1, 128>}, {pipeline_mode = #tpu.pipeline_mode<synchronous>, transform_indices = @transform_8, window_bounds = array<i64: 8, 128>}]} {
    %c0_i32 = arith.constant 0 : i32
    %0 = arith.cmpi eq, %arg0, %c0_i32 : i32
    %1 = arith.extui %0 : i1 to i32
    %c0_i32_0 = arith.constant 0 : i32
    %2 = arith.cmpi ne, %1, %c0_i32_0 : i32
    scf.if %2 {
      %cst_61 = arith.constant 0.000000e+00 : f32
      %242 = vector.broadcast %cst_61 : f32 to vector<8x128xf32>
      %c0_62 = arith.constant 0 : index
      %c0_63 = arith.constant 0 : index
      %243 = vector.load %arg10[%c0_62, %c0_63] : memref<8x128xf32, #tpu.memory_space<vmem>>, vector<8x128xf32>
      tpu.vector_store %arg10[%c0_62, %c0_63], %242 {strides = array<i32>} : memref<8x128xf32, #tpu.memory_space<vmem>>, vector<8x128xf32>,
      %cst_64 = arith.constant 0.000000e+00 : f32
      %244 = vector.broadcast %cst_64 : f32 to vector<8x128xf32>
      %c0_65 = arith.constant 0 : index
      %c0_66 = arith.constant 0 : index
      %245 = vector.load %arg11[%c0_65, %c0_66] : memref<8x128xf32, #tpu.memory_space<vmem>>, vector<8x128xf32>
      tpu.vector_store %arg11[%c0_65, %c0_66], %244 {strides = array<i32>} : memref<8x128xf32, #tpu.memory_space<vmem>>, vector<8x128xf32>,
    } else {
    }
    %c0 = arith.constant 0 : index
    %c0_1 = arith.constant 0 : index
    %3 = vector.load %arg1[%c0, %c0_1] : memref<64x128xbf16, #tpu.memory_space<vmem>>, vector<64x128xbf16>
    %c0_2 = arith.constant 0 : index
    %c0_3 = arith.constant 0 : index
    %4 = vector.load %arg2[%c0_2, %c0_3] : memref<128x512xbf16, #tpu.memory_space<vmem>>, vector<128x512xbf16>
    %cst = arith.constant dense<0.000000e+00> : vector<64x512xf32>
    %5 = tpu.matmul %3, %4, %cst {dimension_numbers = #tpu.dot_dimension_numbers<[1], [0], [0], [1], [0, 0, 1, 1], [], []>} : vector<64x128xbf16>, vector<128x512xbf16>, vector<64x512xf32> -> vector<64x512xf32>
    %c0_4 = arith.constant 0 : index
    %c0_5 = arith.constant 0 : index
    %6 = vector.load %arg4[%c0_4, %c0_5] : memref<1x512xf32, #tpu.memory_space<vmem>>, vector<1x512xf32>
    %7 = vector.broadcast %6 : vector<1x512xf32> to vector<64x512xf32>
    %8 = arith.addf %5, %7 : vector<64x512xf32>
    %c0_6 = arith.constant 0 : index
    %c0_7 = arith.constant 0 : index
    %9 = vector.load %arg12[%c0_6, %c0_7] : memref<64x512xf32, #tpu.memory_space<vmem>>, vector<64x512xf32>
    tpu.vector_store %arg12[%c0_6, %c0_7], %8 {strides = array<i32>} : memref<64x512xf32, #tpu.memory_space<vmem>>, vector<64x512xf32>,
    %c0_8 = arith.constant 0 : index
    %c0_9 = arith.constant 0 : index
    %10 = vector.load %arg3[%c0_8, %c0_9] : memref<128x512xf32, #tpu.memory_space<vmem>>, vector<128x512xf32>
    %c0_10 = arith.constant 0 : index
    %c0_11 = arith.constant 0 : index
    %11 = vector.load %arg10[%c0_10, %c0_11] : memref<8x128xf32, #tpu.memory_space<vmem>>, vector<8x128xf32>
    %c0_12 = arith.constant 0 : index
    %c0_13 = arith.constant 0 : index
    %12 = vector.load %arg11[%c0_12, %c0_13] : memref<8x128xf32, #tpu.memory_space<vmem>>, vector<8x128xf32>
    %c0_14 = arith.constant 0 : index
    %c0_15 = arith.constant 0 : index
    %13 = vector.load %arg12[%c0_14, %c0_15] : memref<64x512xf32, #tpu.memory_space<vmem>>, vector<8x512xf32>
    %cst_16 = arith.constant dense<0.000000e+00> : vector<8x512xf32>
    %14 = tpu.matmul %11, %10, %cst_16 {dimension_numbers = #tpu.dot_dimension_numbers<[1], [0], [0], [1], [0, 0, 1, 1], [], []>} : vector<8x128xf32>, vector<128x512xf32>, vector<8x512xf32> -> vector<8x512xf32>
    %15 = arith.addf %13, %14 : vector<8x512xf32>
    %16 = vector.extract_strided_slice %15 {offsets = [0, 0], sizes = [8, 128], strides = [1, 1]} : vector<8x512xf32> to vector<8x128xf32>
    %17 = arith.negf %16 : vector<8x128xf32>
    %18 = math.exp %17 : vector<8x128xf32>
    %cst_17 = arith.constant 1.000000e+00 : f32
    %19 = vector.broadcast %cst_17 : f32 to vector<8x128xf32>
    %20 = arith.addf %19, %18 : vector<8x128xf32>
    %21 = arith.divf %19, %20 : vector<8x128xf32>
    %22 = vector.extract_strided_slice %15 {offsets = [0, 128], sizes = [8, 128], strides = [1, 1]} : vector<8x512xf32> to vector<8x128xf32>
    %23 = arith.negf %22 : vector<8x128xf32>
    %24 = math.exp %23 : vector<8x128xf32>
    %cst_18 = arith.constant 1.000000e+00 : f32
    %25 = vector.broadcast %cst_18 : f32 to vector<8x128xf32>
    %26 = arith.addf %25, %24 : vector<8x128xf32>
    %27 = arith.divf %25, %26 : vector<8x128xf32>
    %28 = vector.extract_strided_slice %15 {offsets = [0, 256], sizes = [8, 128], strides = [1, 1]} : vector<8x512xf32> to vector<8x128xf32>
    %29 = math.tanh %28 : vector<8x128xf32>
    %30 = vector.extract_strided_slice %15 {offsets = [0, 384], sizes = [8, 128], strides = [1, 1]} : vector<8x512xf32> to vector<8x128xf32>
    %31 = arith.negf %30 : vector<8x128xf32>
    %32 = math.exp %31 : vector<8x128xf32>
    %cst_19 = arith.constant 1.000000e+00 : f32
    %33 = vector.broadcast %cst_19 : f32 to vector<8x128xf32>
    %34 = arith.addf %33, %32 : vector<8x128xf32>
    %35 = arith.divf %33, %34 : vector<8x128xf32>
    %36 = arith.mulf %27, %12 : vector<8x128xf32>
    %37 = arith.mulf %21, %29 : vector<8x128xf32>
    %38 = arith.addf %36, %37 : vector<8x128xf32>
    %39 = math.tanh %38 : vector<8x128xf32>
    %40 = arith.mulf %35, %39 : vector<8x128xf32>
    %c8 = arith.constant 8 : index
    %c0_20 = arith.constant 0 : index
    %41 = vector.load %arg12[%c8, %c0_20] : memref<64x512xf32, #tpu.memory_space<vmem>>, vector<8x512xf32>
    %cst_21 = arith.constant dense<0.000000e+00> : vector<8x512xf32>
    %42 = tpu.matmul %40, %10, %cst_21 {dimension_numbers = #tpu.dot_dimension_numbers<[1], [0], [0], [1], [0, 0, 1, 1], [], []>} : vector<8x128xf32>, vector<128x512xf32>, vector<8x512xf32> -> vector<8x512xf32>
    %43 = arith.addf %41, %42 : vector<8x512xf32>
    %44 = vector.extract_strided_slice %43 {offsets = [0, 0], sizes = [8, 128], strides = [1, 1]} : vector<8x512xf32> to vector<8x128xf32>
    %45 = arith.negf %44 : vector<8x128xf32>
    %46 = math.exp %45 : vector<8x128xf32>
    %cst_22 = arith.constant 1.000000e+00 : f32
    %47 = vector.broadcast %cst_22 : f32 to vector<8x128xf32>
    %48 = arith.addf %47, %46 : vector<8x128xf32>
    %49 = arith.divf %47, %48 : vector<8x128xf32>
    %50 = vector.extract_strided_slice %43 {offsets = [0, 128], sizes = [8, 128], strides = [1, 1]} : vector<8x512xf32> to vector<8x128xf32>
    %51 = arith.negf %50 : vector<8x128xf32>
    %52 = math.exp %51 : vector<8x128xf32>
    %cst_23 = arith.constant 1.000000e+00 : f32
    %53 = vector.broadcast %cst_23 : f32 to vector<8x128xf32>
    %54 = arith.addf %53, %52 : vector<8x128xf32>
    %55 = arith.divf %53, %54 : vector<8x128xf32>
    %56 = vector.extract_strided_slice %43 {offsets = [0, 256], sizes = [8, 128], strides = [1, 1]} : vector<8x512xf32> to vector<8x128xf32>
    %57 = math.tanh %56 : vector<8x128xf32>
    %58 = vector.extract_strided_slice %43 {offsets = [0, 384], sizes = [8, 128], strides = [1, 1]} : vector<8x512xf32> to vector<8x128xf32>
    %59 = arith.negf %58 : vector<8x128xf32>
    %60 = math.exp %59 : vector<8x128xf32>
    %cst_24 = arith.constant 1.000000e+00 : f32
    %61 = vector.broadcast %cst_24 : f32 to vector<8x128xf32>
    %62 = arith.addf %61, %60 : vector<8x128xf32>
    %63 = arith.divf %61, %62 : vector<8x128xf32>
    %64 = arith.mulf %55, %38 : vector<8x128xf32>
    %65 = arith.mulf %49, %57 : vector<8x128xf32>
    %66 = arith.addf %64, %65 : vector<8x128xf32>
    %67 = math.tanh %66 : vector<8x128xf32>
    %68 = arith.mulf %63, %67 : vector<8x128xf32>
    %c16 = arith.constant 16 : index
    %c0_25 = arith.constant 0 : index
    %69 = vector.load %arg12[%c16, %c0_25] : memref<64x512xf32, #tpu.memory_space<vmem>>, vector<8x512xf32>
    %cst_26 = arith.constant dense<0.000000e+00> : vector<8x512xf32>
    %70 = tpu.matmul %68, %10, %cst_26 {dimension_numbers = #tpu.dot_dimension_numbers<[1], [0], [0], [1], [0, 0, 1, 1], [], []>} : vector<8x128xf32>, vector<128x512xf32>, vector<8x512xf32> -> vector<8x512xf32>
    %71 = arith.addf %69, %70 : vector<8x512xf32>
    %72 = vector.extract_strided_slice %71 {offsets = [0, 0], sizes = [8, 128], strides = [1, 1]} : vector<8x512xf32> to vector<8x128xf32>
    %73 = arith.negf %72 : vector<8x128xf32>
    %74 = math.exp %73 : vector<8x128xf32>
    %cst_27 = arith.constant 1.000000e+00 : f32
    %75 = vector.broadcast %cst_27 : f32 to vector<8x128xf32>
    %76 = arith.addf %75, %74 : vector<8x128xf32>
    %77 = arith.divf %75, %76 : vector<8x128xf32>
    %78 = vector.extract_strided_slice %71 {offsets = [0, 128], sizes = [8, 128], strides = [1, 1]} : vector<8x512xf32> to vector<8x128xf32>
    %79 = arith.negf %78 : vector<8x128xf32>
    %80 = math.exp %79 : vector<8x128xf32>
    %cst_28 = arith.constant 1.000000e+00 : f32
    %81 = vector.broadcast %cst_28 : f32 to vector<8x128xf32>
    %82 = arith.addf %81, %80 : vector<8x128xf32>
    %83 = arith.divf %81, %82 : vector<8x128xf32>
    %84 = vector.extract_strided_slice %71 {offsets = [0, 256], sizes = [8, 128], strides = [1, 1]} : vector<8x512xf32> to vector<8x128xf32>
    %85 = math.tanh %84 : vector<8x128xf32>
    %86 = vector.extract_strided_slice %71 {offsets = [0, 384], sizes = [8, 128], strides = [1, 1]} : vector<8x512xf32> to vector<8x128xf32>
    %87 = arith.negf %86 : vector<8x128xf32>
    %88 = math.exp %87 : vector<8x128xf32>
    %cst_29 = arith.constant 1.000000e+00 : f32
    %89 = vector.broadcast %cst_29 : f32 to vector<8x128xf32>
    %90 = arith.addf %89, %88 : vector<8x128xf32>
    %91 = arith.divf %89, %90 : vector<8x128xf32>
    %92 = arith.mulf %83, %66 : vector<8x128xf32>
    %93 = arith.mulf %77, %85 : vector<8x128xf32>
    %94 = arith.addf %92, %93 : vector<8x128xf32>
    %95 = math.tanh %94 : vector<8x128xf32>
    %96 = arith.mulf %91, %95 : vector<8x128xf32>
    %c24 = arith.constant 24 : index
    %c0_30 = arith.constant 0 : index
    %97 = vector.load %arg12[%c24, %c0_30] : memref<64x512xf32, #tpu.memory_space<vmem>>, vector<8x512xf32>
    %cst_31 = arith.constant dense<0.000000e+00> : vector<8x512xf32>
    %98 = tpu.matmul %96, %10, %cst_31 {dimension_numbers = #tpu.dot_dimension_numbers<[1], [0], [0], [1], [0, 0, 1, 1], [], []>} : vector<8x128xf32>, vector<128x512xf32>, vector<8x512xf32> -> vector<8x512xf32>
    %99 = arith.addf %97, %98 : vector<8x512xf32>
    %100 = vector.extract_strided_slice %99 {offsets = [0, 0], sizes = [8, 128], strides = [1, 1]} : vector<8x512xf32> to vector<8x128xf32>
    %101 = arith.negf %100 : vector<8x128xf32>
    %102 = math.exp %101 : vector<8x128xf32>
    %cst_32 = arith.constant 1.000000e+00 : f32
    %103 = vector.broadcast %cst_32 : f32 to vector<8x128xf32>
    %104 = arith.addf %103, %102 : vector<8x128xf32>
    %105 = arith.divf %103, %104 : vector<8x128xf32>
    %106 = vector.extract_strided_slice %99 {offsets = [0, 128], sizes = [8, 128], strides = [1, 1]} : vector<8x512xf32> to vector<8x128xf32>
    %107 = arith.negf %106 : vector<8x128xf32>
    %108 = math.exp %107 : vector<8x128xf32>
    %cst_33 = arith.constant 1.000000e+00 : f32
    %109 = vector.broadcast %cst_33 : f32 to vector<8x128xf32>
    %110 = arith.addf %109, %108 : vector<8x128xf32>
    %111 = arith.divf %109, %110 : vector<8x128xf32>
    %112 = vector.extract_strided_slice %99 {offsets = [0, 256], sizes = [8, 128], strides = [1, 1]} : vector<8x512xf32> to vector<8x128xf32>
    %113 = math.tanh %112 : vector<8x128xf32>
    %114 = vector.extract_strided_slice %99 {offsets = [0, 384], sizes = [8, 128], strides = [1, 1]} : vector<8x512xf32> to vector<8x128xf32>
    %115 = arith.negf %114 : vector<8x128xf32>
    %116 = math.exp %115 : vector<8x128xf32>
    %cst_34 = arith.constant 1.000000e+00 : f32
    %117 = vector.broadcast %cst_34 : f32 to vector<8x128xf32>
    %118 = arith.addf %117, %116 : vector<8x128xf32>
    %119 = arith.divf %117, %118 : vector<8x128xf32>
    %120 = arith.mulf %111, %94 : vector<8x128xf32>
    %121 = arith.mulf %105, %113 : vector<8x128xf32>
    %122 = arith.addf %120, %121 : vector<8x128xf32>
    %123 = math.tanh %122 : vector<8x128xf32>
    %124 = arith.mulf %119, %123 : vector<8x128xf32>
    %c32 = arith.constant 32 : index
    %c0_35 = arith.constant 0 : index
    %125 = vector.load %arg12[%c32, %c0_35] : memref<64x512xf32, #tpu.memory_space<vmem>>, vector<8x512xf32>
    %cst_36 = arith.constant dense<0.000000e+00> : vector<8x512xf32>
    %126 = tpu.matmul %124, %10, %cst_36 {dimension_numbers = #tpu.dot_dimension_numbers<[1], [0], [0], [1], [0, 0, 1, 1], [], []>} : vector<8x128xf32>, vector<128x512xf32>, vector<8x512xf32> -> vector<8x512xf32>
    %127 = arith.addf %125, %126 : vector<8x512xf32>
    %128 = vector.extract_strided_slice %127 {offsets = [0, 0], sizes = [8, 128], strides = [1, 1]} : vector<8x512xf32> to vector<8x128xf32>
    %129 = arith.negf %128 : vector<8x128xf32>
    %130 = math.exp %129 : vector<8x128xf32>
    %cst_37 = arith.constant 1.000000e+00 : f32
    %131 = vector.broadcast %cst_37 : f32 to vector<8x128xf32>
    %132 = arith.addf %131, %130 : vector<8x128xf32>
    %133 = arith.divf %131, %132 : vector<8x128xf32>
    %134 = vector.extract_strided_slice %127 {offsets = [0, 128], sizes = [8, 128], strides = [1, 1]} : vector<8x512xf32> to vector<8x128xf32>
    %135 = arith.negf %134 : vector<8x128xf32>
    %136 = math.exp %135 : vector<8x128xf32>
    %cst_38 = arith.constant 1.000000e+00 : f32
    %137 = vector.broadcast %cst_38 : f32 to vector<8x128xf32>
    %138 = arith.addf %137, %136 : vector<8x128xf32>
    %139 = arith.divf %137, %138 : vector<8x128xf32>
    %140 = vector.extract_strided_slice %127 {offsets = [0, 256], sizes = [8, 128], strides = [1, 1]} : vector<8x512xf32> to vector<8x128xf32>
    %141 = math.tanh %140 : vector<8x128xf32>
    %142 = vector.extract_strided_slice %127 {offsets = [0, 384], sizes = [8, 128], strides = [1, 1]} : vector<8x512xf32> to vector<8x128xf32>
    %143 = arith.negf %142 : vector<8x128xf32>
    %144 = math.exp %143 : vector<8x128xf32>
    %cst_39 = arith.constant 1.000000e+00 : f32
    %145 = vector.broadcast %cst_39 : f32 to vector<8x128xf32>
    %146 = arith.addf %145, %144 : vector<8x128xf32>
    %147 = arith.divf %145, %146 : vector<8x128xf32>
    %148 = arith.mulf %139, %122 : vector<8x128xf32>
    %149 = arith.mulf %133, %141 : vector<8x128xf32>
    %150 = arith.addf %148, %149 : vector<8x128xf32>
    %151 = math.tanh %150 : vector<8x128xf32>
    %152 = arith.mulf %147, %151 : vector<8x128xf32>
    %c40 = arith.constant 40 : index
    %c0_40 = arith.constant 0 : index
    %153 = vector.load %arg12[%c40, %c0_40] : memref<64x512xf32, #tpu.memory_space<vmem>>, vector<8x512xf32>
    %cst_41 = arith.constant dense<0.000000e+00> : vector<8x512xf32>
    %154 = tpu.matmul %152, %10, %cst_41 {dimension_numbers = #tpu.dot_dimension_numbers<[1], [0], [0], [1], [0, 0, 1, 1], [], []>} : vector<8x128xf32>, vector<128x512xf32>, vector<8x512xf32> -> vector<8x512xf32>
    %155 = arith.addf %153, %154 : vector<8x512xf32>
    %156 = vector.extract_strided_slice %155 {offsets = [0, 0], sizes = [8, 128], strides = [1, 1]} : vector<8x512xf32> to vector<8x128xf32>
    %157 = arith.negf %156 : vector<8x128xf32>
    %158 = math.exp %157 : vector<8x128xf32>
    %cst_42 = arith.constant 1.000000e+00 : f32
    %159 = vector.broadcast %cst_42 : f32 to vector<8x128xf32>
    %160 = arith.addf %159, %158 : vector<8x128xf32>
    %161 = arith.divf %159, %160 : vector<8x128xf32>
    %162 = vector.extract_strided_slice %155 {offsets = [0, 128], sizes = [8, 128], strides = [1, 1]} : vector<8x512xf32> to vector<8x128xf32>
    %163 = arith.negf %162 : vector<8x128xf32>
    %164 = math.exp %163 : vector<8x128xf32>
    %cst_43 = arith.constant 1.000000e+00 : f32
    %165 = vector.broadcast %cst_43 : f32 to vector<8x128xf32>
    %166 = arith.addf %165, %164 : vector<8x128xf32>
    %167 = arith.divf %165, %166 : vector<8x128xf32>
    %168 = vector.extract_strided_slice %155 {offsets = [0, 256], sizes = [8, 128], strides = [1, 1]} : vector<8x512xf32> to vector<8x128xf32>
    %169 = math.tanh %168 : vector<8x128xf32>
    %170 = vector.extract_strided_slice %155 {offsets = [0, 384], sizes = [8, 128], strides = [1, 1]} : vector<8x512xf32> to vector<8x128xf32>
    %171 = arith.negf %170 : vector<8x128xf32>
    %172 = math.exp %171 : vector<8x128xf32>
    %cst_44 = arith.constant 1.000000e+00 : f32
    %173 = vector.broadcast %cst_44 : f32 to vector<8x128xf32>
    %174 = arith.addf %173, %172 : vector<8x128xf32>
    %175 = arith.divf %173, %174 : vector<8x128xf32>
    %176 = arith.mulf %167, %150 : vector<8x128xf32>
    %177 = arith.mulf %161, %169 : vector<8x128xf32>
    %178 = arith.addf %176, %177 : vector<8x128xf32>
    %179 = math.tanh %178 : vector<8x128xf32>
    %180 = arith.mulf %175, %179 : vector<8x128xf32>
    %c48 = arith.constant 48 : index
    %c0_45 = arith.constant 0 : index
    %181 = vector.load %arg12[%c48, %c0_45] : memref<64x512xf32, #tpu.memory_space<vmem>>, vector<8x512xf32>
    %cst_46 = arith.constant dense<0.000000e+00> : vector<8x512xf32>
    %182 = tpu.matmul %180, %10, %cst_46 {dimension_numbers = #tpu.dot_dimension_numbers<[1], [0], [0], [1], [0, 0, 1, 1], [], []>} : vector<8x128xf32>, vector<128x512xf32>, vector<8x512xf32> -> vector<8x512xf32>
    %183 = arith.addf %181, %182 : vector<8x512xf32>
    %184 = vector.extract_strided_slice %183 {offsets = [0, 0], sizes = [8, 128], strides = [1, 1]} : vector<8x512xf32> to vector<8x128xf32>
    %185 = arith.negf %184 : vector<8x128xf32>
    %186 = math.exp %185 : vector<8x128xf32>
    %cst_47 = arith.constant 1.000000e+00 : f32
    %187 = vector.broadcast %cst_47 : f32 to vector<8x128xf32>
    %188 = arith.addf %187, %186 : vector<8x128xf32>
    %189 = arith.divf %187, %188 : vector<8x128xf32>
    %190 = vector.extract_strided_slice %183 {offsets = [0, 128], sizes = [8, 128], strides = [1, 1]} : vector<8x512xf32> to vector<8x128xf32>
    %191 = arith.negf %190 : vector<8x128xf32>
    %192 = math.exp %191 : vector<8x128xf32>
    %cst_48 = arith.constant 1.000000e+00 : f32
    %193 = vector.broadcast %cst_48 : f32 to vector<8x128xf32>
    %194 = arith.addf %193, %192 : vector<8x128xf32>
    %195 = arith.divf %193, %194 : vector<8x128xf32>
    %196 = vector.extract_strided_slice %183 {offsets = [0, 256], sizes = [8, 128], strides = [1, 1]} : vector<8x512xf32> to vector<8x128xf32>
    %197 = math.tanh %196 : vector<8x128xf32>
    %198 = vector.extract_strided_slice %183 {offsets = [0, 384], sizes = [8, 128], strides = [1, 1]} : vector<8x512xf32> to vector<8x128xf32>
    %199 = arith.negf %198 : vector<8x128xf32>
    %200 = math.exp %199 : vector<8x128xf32>
    %cst_49 = arith.constant 1.000000e+00 : f32
    %201 = vector.broadcast %cst_49 : f32 to vector<8x128xf32>
    %202 = arith.addf %201, %200 : vector<8x128xf32>
    %203 = arith.divf %201, %202 : vector<8x128xf32>
    %204 = arith.mulf %195, %178 : vector<8x128xf32>
    %205 = arith.mulf %189, %197 : vector<8x128xf32>
    %206 = arith.addf %204, %205 : vector<8x128xf32>
    %207 = math.tanh %206 : vector<8x128xf32>
    %208 = arith.mulf %203, %207 : vector<8x128xf32>
    %c56 = arith.constant 56 : index
    %c0_50 = arith.constant 0 : index
    %209 = vector.load %arg12[%c56, %c0_50] : memref<64x512xf32, #tpu.memory_space<vmem>>, vector<8x512xf32>
    %cst_51 = arith.constant dense<0.000000e+00> : vector<8x512xf32>
    %210 = tpu.matmul %208, %10, %cst_51 {dimension_numbers = #tpu.dot_dimension_numbers<[1], [0], [0], [1], [0, 0, 1, 1], [], []>} : vector<8x128xf32>, vector<128x512xf32>, vector<8x512xf32> -> vector<8x512xf32>
    %211 = arith.addf %209, %210 : vector<8x512xf32>
    %212 = vector.extract_strided_slice %211 {offsets = [0, 0], sizes = [8, 128], strides = [1, 1]} : vector<8x512xf32> to vector<8x128xf32>
    %213 = arith.negf %212 : vector<8x128xf32>
    %214 = math.exp %213 : vector<8x128xf32>
    %cst_52 = arith.constant 1.000000e+00 : f32
    %215 = vector.broadcast %cst_52 : f32 to vector<8x128xf32>
    %216 = arith.addf %215, %214 : vector<8x128xf32>
    %217 = arith.divf %215, %216 : vector<8x128xf32>
    %218 = vector.extract_strided_slice %211 {offsets = [0, 128], sizes = [8, 128], strides = [1, 1]} : vector<8x512xf32> to vector<8x128xf32>
    %219 = arith.negf %218 : vector<8x128xf32>
    %220 = math.exp %219 : vector<8x128xf32>
    %cst_53 = arith.constant 1.000000e+00 : f32
    %221 = vector.broadcast %cst_53 : f32 to vector<8x128xf32>
    %222 = arith.addf %221, %220 : vector<8x128xf32>
    %223 = arith.divf %221, %222 : vector<8x128xf32>
    %224 = vector.extract_strided_slice %211 {offsets = [0, 256], sizes = [8, 128], strides = [1, 1]} : vector<8x512xf32> to vector<8x128xf32>
    %225 = math.tanh %224 : vector<8x128xf32>
    %226 = vector.extract_strided_slice %211 {offsets = [0, 384], sizes = [8, 128], strides = [1, 1]} : vector<8x512xf32> to vector<8x128xf32>
    %227 = arith.negf %226 : vector<8x128xf32>
    %228 = math.exp %227 : vector<8x128xf32>
    %cst_54 = arith.constant 1.000000e+00 : f32
    %229 = vector.broadcast %cst_54 : f32 to vector<8x128xf32>
    %230 = arith.addf %229, %228 : vector<8x128xf32>
    %231 = arith.divf %229, %230 : vector<8x128xf32>
    %232 = arith.mulf %223, %206 : vector<8x128xf32>
    %233 = arith.mulf %217, %225 : vector<8x128xf32>
    %234 = arith.addf %232, %233 : vector<8x128xf32>
    %235 = math.tanh %234 : vector<8x128xf32>
    %236 = arith.mulf %231, %235 : vector<8x128xf32>
    %c0_55 = arith.constant 0 : index
    %c0_56 = arith.constant 0 : index
    %237 = vector.load %arg10[%c0_55, %c0_56] : memref<8x128xf32, #tpu.memory_space<vmem>>, vector<8x128xf32>
    tpu.vector_store %arg10[%c0_55, %c0_56], %236 {strides = array<i32>} : memref<8x128xf32, #tpu.memory_space<vmem>>, vector<8x128xf32>,
    %c0_57 = arith.constant 0 : index
    %c0_58 = arith.constant 0 : index
    %238 = vector.load %arg11[%c0_57, %c0_58] : memref<8x128xf32, #tpu.memory_space<vmem>>, vector<8x128xf32>
    tpu.vector_store %arg11[%c0_57, %c0_58], %234 {strides = array<i32>} : memref<8x128xf32, #tpu.memory_space<vmem>>, vector<8x128xf32>,
    %c0_i32_59 = arith.constant 0 : i32
    %239 = arith.cmpi eq, %arg0, %c0_i32_59 : i32
    %240 = arith.extui %239 : i1 to i32
    %c0_i32_60 = arith.constant 0 : i32
    %241 = arith.cmpi ne, %240, %c0_i32_60 : i32
    scf.if %241 {
      %c56_61 = arith.constant 56 : index
      %c0_62 = arith.constant 0 : index
      %242 = vector.load %arg1[%c56_61, %c0_62] : memref<64x128xbf16, #tpu.memory_space<vmem>>, vector<8x128xbf16>
      %c0_63 = arith.constant 0 : index
      %c0_64 = arith.constant 0 : index
      %243 = vector.load %arg5[%c0_63, %c0_64] : memref<128x512xbf16, #tpu.memory_space<vmem>>, vector<128x512xbf16>
      %cst_65 = arith.constant dense<0.000000e+00> : vector<8x512xf32>
      %244 = tpu.matmul %242, %243, %cst_65 {dimension_numbers = #tpu.dot_dimension_numbers<[1], [0], [0], [1], [0, 0, 1, 1], [], []>} : vector<8x128xbf16>, vector<128x512xbf16>, vector<8x512xf32> -> vector<8x512xf32>
      %c0_66 = arith.constant 0 : index
      %c0_67 = arith.constant 0 : index
      %245 = vector.load %arg6[%c0_66, %c0_67] : memref<1x512xf32, #tpu.memory_space<vmem>>, vector<1x512xf32>
      %246 = vector.broadcast %245 : vector<1x512xf32> to vector<8x512xf32>
      %247 = arith.addf %244, %246 : vector<8x512xf32>
      %248 = vector.extract_strided_slice %247 {offsets = [0, 0], sizes = [8, 128], strides = [1, 1]} : vector<8x512xf32> to vector<8x128xf32>
      %249 = arith.negf %248 : vector<8x128xf32>
      %250 = math.exp %249 : vector<8x128xf32>
      %cst_68 = arith.constant 1.000000e+00 : f32
      %251 = vector.broadcast %cst_68 : f32 to vector<8x128xf32>
      %252 = arith.addf %251, %250 : vector<8x128xf32>
      %253 = arith.divf %251, %252 : vector<8x128xf32>
      %254 = vector.extract_strided_slice %247 {offsets = [0, 256], sizes = [8, 128], strides = [1, 1]} : vector<8x512xf32> to vector<8x128xf32>
      %255 = math.tanh %254 : vector<8x128xf32>
      %256 = vector.extract_strided_slice %247 {offsets = [0, 384], sizes = [8, 128], strides = [1, 1]} : vector<8x512xf32> to vector<8x128xf32>
      %257 = arith.negf %256 : vector<8x128xf32>
      %258 = math.exp %257 : vector<8x128xf32>
      %cst_69 = arith.constant 1.000000e+00 : f32
      %259 = vector.broadcast %cst_69 : f32 to vector<8x128xf32>
      %260 = arith.addf %259, %258 : vector<8x128xf32>
      %261 = arith.divf %259, %260 : vector<8x128xf32>
      %262 = arith.mulf %253, %255 : vector<8x128xf32>
      %263 = math.tanh %262 : vector<8x128xf32>
      %264 = arith.mulf %261, %263 : vector<8x128xf32>
      %c0_70 = arith.constant 0 : index
      %c0_71 = arith.constant 0 : index
      %265 = vector.load %arg7[%c0_70, %c0_71] : memref<256x128xf32, #tpu.memory_space<vmem>>, vector<256x128xf32>
      %266 = vector.extract_strided_slice %265 {offsets = [0, 0], sizes = [128, 128], strides = [1, 1]} : vector<256x128xf32> to vector<128x128xf32>
      %cst_72 = arith.constant dense<0.000000e+00> : vector<8x128xf32>
      %267 = tpu.matmul %236, %266, %cst_72 {dimension_numbers = #tpu.dot_dimension_numbers<[1], [0], [0], [1], [0, 0, 1, 1], [], []>} : vector<8x128xf32>, vector<128x128xf32>, vector<8x128xf32> -> vector<8x128xf32>
      %268 = vector.extract_strided_slice %265 {offsets = [128, 0], sizes = [128, 128], strides = [1, 1]} : vector<256x128xf32> to vector<128x128xf32>
      %cst_73 = arith.constant dense<0.000000e+00> : vector<8x128xf32>
      %269 = tpu.matmul %264, %268, %cst_73 {dimension_numbers = #tpu.dot_dimension_numbers<[1], [0], [0], [1], [0, 0, 1, 1], [], []>} : vector<8x128xf32>, vector<128x128xf32>, vector<8x128xf32> -> vector<8x128xf32>
      %270 = arith.addf %267, %269 : vector<8x128xf32>
      %c0_74 = arith.constant 0 : index
      %c0_75 = arith.constant 0 : index
      %271 = vector.load %arg8[%c0_74, %c0_75] : memref<1x128xf32, #tpu.memory_space<vmem>>, vector<1x128xf32>
      %272 = vector.broadcast %271 : vector<1x128xf32> to vector<8x128xf32>
      %273 = arith.addf %270, %272 : vector<8x128xf32>
      %c0_76 = arith.constant 0 : index
      %c0_77 = arith.constant 0 : index
      %274 = vector.load %arg9[%c0_76, %c0_77] : memref<8x128xf32, #tpu.memory_space<vmem>>, vector<8x128xf32>
      tpu.vector_store %arg9[%c0_76, %c0_77], %273 {strides = array<i32>} : memref<8x128xf32, #tpu.memory_space<vmem>>, vector<8x128xf32>,
    } else {
    }
    return
  }
  func.func @transform_0(%arg0: i32) -> (i32, i32) {
    %c0_i32 = arith.constant 0 : i32
    %c0_i32_0 = arith.constant 0 : i32
    return %arg0, %c0_i32 : i32, i32
  }
  func.func @transform_1(%arg0: i32) -> (i32, i32) {
    %c0_i32 = arith.constant 0 : i32
    %c0_i32_0 = arith.constant 0 : i32
    %c0_i32_1 = arith.constant 0 : i32
    return %c0_i32, %c0_i32_0 : i32, i32
  }
  func.func @transform_2(%arg0: i32) -> (i32, i32) {
    %c0_i32 = arith.constant 0 : i32
    %c0_i32_0 = arith.constant 0 : i32
    %c0_i32_1 = arith.constant 0 : i32
    return %c0_i32, %c0_i32_0 : i32, i32
  }
  func.func @transform_3(%arg0: i32) -> (i32, i32) {
    %c0_i32 = arith.constant 0 : i32
    %c0_i32_0 = arith.constant 0 : i32
    %c0_i32_1 = arith.constant 0 : i32
    return %c0_i32, %c0_i32_0 : i32, i32
  }
  func.func @transform_4(%arg0: i32) -> (i32, i32) {
    %c0_i32 = arith.constant 0 : i32
    %c0_i32_0 = arith.constant 0 : i32
    %c0_i32_1 = arith.constant 0 : i32
    return %c0_i32, %c0_i32_0 : i32, i32
  }
  func.func @transform_5(%arg0: i32) -> (i32, i32) {
    %c0_i32 = arith.constant 0 : i32
    %c0_i32_0 = arith.constant 0 : i32
    %c0_i32_1 = arith.constant 0 : i32
    return %c0_i32, %c0_i32_0 : i32, i32
  }
  func.func @transform_6(%arg0: i32) -> (i32, i32) {
    %c0_i32 = arith.constant 0 : i32
    %c0_i32_0 = arith.constant 0 : i32
    %c0_i32_1 = arith.constant 0 : i32
    return %c0_i32, %c0_i32_0 : i32, i32
  }
  func.func @transform_7(%arg0: i32) -> (i32, i32) {
    %c0_i32 = arith.constant 0 : i32
    %c0_i32_0 = arith.constant 0 : i32
    %c0_i32_1 = arith.constant 0 : i32
    return %c0_i32, %c0_i32_0 : i32, i32
  }
  func.func @transform_8(%arg0: i32) -> (i32, i32) {
    %c0_i32 = arith.constant 0 : i32
    %c0_i32_0 = arith.constant 0 : i32
    %c0_i32_1 = arith.constant 0 : i32
    return %c0_i32, %c0_i32_0 : i32, i32
  }
}

</mosaic_0001>

<bundles_post_ra>
// kernel: _lambda_.2
= control target key start
LH: loop header
LB: loop body
LE: loop exit
PB: predicated region body
PF: predicated region fallthrough
CT: control target
= control target key end

     0   :  { %s1543_s24 = smov 0   ;;  %s1908_s0 = inlined_call_operand.vmem [shape: f32[2,70,32], index: 0, kind: input, shape index: {}]   ;;  %s1909_s1 = inlined_call_operand.vmem [shape: bf16[224,32], index: 1, kind: input, shape index: {}]   ;;  %s1910_s2 = inlined_call_operand.vmem [shape: f32[1,32], index: 2, kind: input, shape index: {}]   ;;  %s1911_s3 = inlined_call_operand.vmem [shape: bf16[160,64], index: 3, kind: input, shape index: {}]   ;;  %s1912_s4 = inlined_call_operand.vmem [shape: f32[1,64], index: 4, kind: input, shape index: {}]   ;;  %s1913_s5 = inlined_call_operand.vmem [shape: bf16[192,128], index: 5, kind: input, shape index: {}]   ;;  %s1914_s6 = inlined_call_operand.vmem [shape: f32[1,128], index: 6, kind: input, shape index: {}]   ;;  %s1915_s7 = inlined_call_operand.vmem [shape: bf16[8,256], index: 7, kind: output, shape index: {}]  }
   0x1 LB: > { %s1279_s25 = sadd.s32 4294967295, %s1497_s24   ;;  %p1283_p0 = scmp.ge.s32.totalorder %s1497_s24, 1  ;;  %s1497_s24 = sphi %s1543_s24, %s17_s24  }
   0x2   : > { %p237_p1 = scmp.lt.s32.totalorder %s1497_s24, 3 }
   0x4   : > { %p238_p2 = pnand %p1283_p0, %p237_p1 }
   0x5   : > { %p268_p3 = scmp.lt.s32.totalorder (!%p238_p2), %s1279_s25, 1  ;;  %s1499_s30 = smov (!%p238_p2), 64  }
   0x6   : > { %241 = sbr.rel (%p238_p2) target bundleno = 971 (0x3cb), region = 48  ;;  %s1500_s8 = smov (!%p238_p2), 32  }
   0x7   : > { %s1501_s9 = smov (!%p238_p2), 96  }
   0xb   : > { %s1917_s25 = smov (!%p268_p3, %s1279_s25), 1  ;;  %v1446_v30 = vld [vmem:[%s1909_s1 + $0x38] sm:$0xff]  ;;  %vm286_vm0 = vcmask 261120   ;;  %v1445_v32 = vld [vmem:[%s1909_s1 + $0x30] sm:$0xff]  ;;  %v1444_v37 = vld [vmem:[%s1909_s1 + $0x28] sm:$0xff]  ;;  %vm335_vm1 = vcmask 523520  }
   0xc   : > { %s1475_s26 = smul.u32 72, %s1917_s25  ;;  %703 = vmatpush.bf16.msra.mxu0 %v1446_v30  ;;  %v1443_v41 = vld [vmem:[%s1909_s1 + $0x20] sm:$0xff]  ;;  %v1442_v44 = vld [vmem:[%s1909_s1 + $0x18] sm:$0xff]  ;;  %v1452_v45 = vld [vmem:[%s1909_s1 + $0x68] sm:$0xff]  ;;  %vm384_vm2 = vcmask 785920   ;;  %vm433_vm3 = vcmask 1048320  }
   0xd   : > { %734 = vmatpush.bf16.msra.mxu1 %v1452_v45  ;;  %v1441_v49 = vld [vmem:[%s1909_s1 + $0x10] sm:$0xff]  ;;  %v1451_v50 = vld [vmem:[%s1909_s1 + $0x60] sm:$0xff]  ;;  %v1440_v53 = vld [vmem:[%s1909_s1 + $0x8] sm:$0xff]  ;;  %vm690_vm4 = vcmask 785408   ;;  %vm800_vm5 = vcmask 254976   ;;  %vm1053_vm6 = vcmask 516096  }
   0xe   : > { %s1557_s29 = scalar_lea.vmem %s1908_s0, %s1475_s26  ;;  %v1450_v54 = vld [vmem:[%s1909_s1 + $0x58] sm:$0xff]  ;;  %v1439_v57 = vld [vmem:[%s1909_s1] sm:$0xff]  ;;  %v1449_v58 = vld [vmem:[%s1909_s1 + $0x50] sm:$0xff]  ;;  %vm1031_vm7 = vcmask 523264   ;;  %vm1072_vm8 = vcmask 1048064   ;;  %s1285_s11 = sshll.u32 %s1917_s25, 2 }
   0xf   : > { %v344_v0 = vld [vmem:[%s1557_s29 + $0x2] sm:$0xff]  ;;  %v345_v3 = vld [vmem:[%s1557_s29 + $0xa] sm:$0xff]  ;;  %v298_v11 = vld [vmem:[%s1557_s29 + $0x19] sm:$0xff] }
  0x10   : > { %v295_v1 = vld [vmem:[%s1557_s29 + $0x1] sm:$0xff]  ;;  %360 = vrot.lane.b32.xlu1 %v344_v0, %s1499_s30  ;;  %v296_v4 = vld [vmem:[%s1557_s29 + $0x9] sm:$0xff]  ;;  %v297_v9 = vld [vmem:[%s1557_s29 + $0x11] sm:$0xff]  ;;  %704 = vmatpush.bf16.msra.mxu0 %v1445_v32 }
  0x11   : > { %311 = vrot.lane.b32.xlu0 %v295_v1, %s1500_s8  ;;  %v458_v2 = vld [vmem:[%s1557_s29 + $0x5] sm:$0xff]  ;;  %v459_v5 = vld [vmem:[%s1557_s29 + $0xd] sm:$0xff]  ;;  %v347_v12 = vld [vmem:[%s1557_s29 + $0x1a] sm:$0xff]  ;;  %735 = vmatpush.bf16.msra.mxu1 %v1451_v50 }
  0x12   : > { %474 = vrot.lane.b32.xlu2 %v458_v2, %s1500_s8  ;;  %v394_v6 = vld [vmem:[%s1557_s29 + $0xb] sm:$0xff]  ;;  %v393_v7 = vld [vmem:[%s1557_s29 + $0x3] sm:$0xff]  ;;  %v460_v14 = vld [vmem:[%s1557_s29 + $0x15] sm:$0xff] }
  0x13   : > { %v506_v8 = vld [vmem:[%s1557_s29 + $0x6] sm:$0xff]  ;;  %v507_v10 = vld [vmem:[%s1557_s29 + $0xe] sm:$0xff]  ;;  %v461_v16 = vld [vmem:[%s1557_s29 + $0x1d] sm:$0xff] }
  0x14   : > { %v346_v13 = vld [vmem:[%s1557_s29 + $0x12] sm:$0xff]  ;;  %v396_v17 = vld [vmem:[%s1557_s29 + $0x1b] sm:$0xff]  ;;  %v300_v22 = vld [vmem:[%s1557_s29 + $0x29] sm:$0xff]  ;;  %705 = vmatpush.bf16.msra.mxu0 %v1444_v37 }
  0x15   : > { %v395_v15 = vld [vmem:[%s1557_s29 + $0x13] sm:$0xff]  ;;  %v509_v18 = vld [vmem:[%s1557_s29 + $0x1e] sm:$0xff]  ;;  %v349_v23 = vld [vmem:[%s1557_s29 + $0x2a] sm:$0xff]  ;;  %736 = vmatpush.bf16.msra.mxu1 %v1450_v54 }
  0x16   : > { %v508_v19 = vld [vmem:[%s1557_s29 + $0x16] sm:$0xff]  ;;  %v299_v20 = vld [vmem:[%s1557_s29 + $0x21] sm:$0xff]  ;;  %v463_v24 = vld [vmem:[%s1557_s29 + $0x2d] sm:$0xff] }
  0x17   : > { %v348_v21 = vld [vmem:[%s1557_s29 + $0x22] sm:$0xff]  ;;  %v398_v28 = vld [vmem:[%s1557_s29 + $0x2b] sm:$0xff]  ;;  %v302_v33 = vld [vmem:[%s1557_s29 + $0x39] sm:$0xff] }
  0x18   : > { %362 = vrot.lane.b32.xlu1 %v345_v3, %s1499_s30  ;;  %v462_v25 = vld [vmem:[%s1557_s29 + $0x25] sm:$0xff]  ;;  %v511_v29 = vld [vmem:[%s1557_s29 + $0x2e] sm:$0xff]  ;;  %v351_v40 = vld [vmem:[%s1557_s29 + $0x3a] sm:$0xff]  ;;  %706 = vmatpush.bf16.msra.mxu0 %v1443_v41 }
  0x19   : > { %313 = vrot.lane.b32.xlu0 %v296_v4, %s1500_s8  ;;  %v397_v26 = vld [vmem:[%s1557_s29 + $0x23] sm:$0xff]  ;;  %v301_v34 = vld [vmem:[%s1557_s29 + $0x31] sm:$0xff]  ;;  %v400_v46 = vld [vmem:[%s1557_s29 + $0x3b] sm:$0xff]  ;;  %737 = vmatpush.bf16.msra.mxu1 %v1449_v58 }
  0x1a   : > { %476 = vrot.lane.b32.xlu2 %v459_v5, %s1500_s8  ;;  %v510_v27 = vld [vmem:[%s1557_s29 + $0x26] sm:$0xff]  ;;  %v350_v35 = vld [vmem:[%s1557_s29 + $0x32] sm:$0xff]  ;;  %v465_v42 = vld [vmem:[%s1557_s29 + $0x3d] sm:$0xff] }
  0x1b   : > { %v442_v31 = vld [vmem:[%s1557_s29 + $0x4] sm:$0xff]  ;;  %v443_v38 = vld [vmem:[%s1557_s29 + $0xc] sm:$0xff]  ;;  %v464_v39 = vld [vmem:[%s1557_s29 + $0x35] sm:$0xff] }
  0x1c   : > { %450 = vst.msk [vmem:[#allocation2 + $0x8] sm:$0xff] %vm286_vm0, %v442_v31  ;;  %v278_v36 = vld [vmem:[%s1557_s29] sm:$0xff]  ;;  %v279_v43 = vld [vmem:[%s1557_s29 + $0x8] sm:$0xff]  ;;  %v399_v48 = vld [vmem:[%s1557_s29 + $0x33] sm:$0xff]  ;;  %707 = vmatpush.bf16.msra.mxu0 %v1442_v44 }
  0x1d   : > { %287 = vst.msk [vmem:[#allocation2] sm:$0xff] %vm286_vm0, %v278_v36  ;;  %v512_v51 = vld [vmem:[%s1557_s29 + $0x36] sm:$0xff]  ;;  %v513_v55 = vld [vmem:[%s1557_s29 + $0x3e] sm:$0xff]  ;;  %v1448_v61 = vld [vmem:[%s1909_s1 + $0x48] sm:$0xff] }
  0x1e   : > { %451 = vst.msk [vmem:[#allocation2 + $0x18] sm:$0xff] %vm286_vm0, %v443_v38  ;;  %v281_v56 = vld [vmem:[%s1557_s29 + $0x18] sm:$0xff]  ;;  %v280_v59 = vld [vmem:[%s1557_s29 + $0x10] sm:$0xff]  ;;  %738 = vmatpush.bf16.msra.mxu1 %v1448_v61  ;;  %v1447_v63 = vld [vmem:[%s1909_s1 + $0x40] sm:$0xff] }
  0x1f   : > { %288 = vst.msk [vmem:[#allocation2 + $0x10] sm:$0xff] %vm286_vm0, %v279_v43  ;;  %v444_v62 = vld [vmem:[%s1557_s29 + $0x14] sm:$0xff]  ;;  %v445_v5 = vld [vmem:[%s1557_s29 + $0x1c] sm:$0xff] }
  0x20   : > { %411 = vrot.lane.b32.xlu1 %v394_v6, %s1501_s9  ;;  %708 = vmatpush.bf16.msra.mxu0 %v1441_v49  ;;  %290 = vst.msk [vmem:[#allocation2 + $0x30] sm:$0xff] %vm286_vm0, %v281_v56  ;;  %v448_v37 = vld [vmem:[%s1557_s29 + $0x34] sm:$0xff]  ;;  %v449_v44 = vld [vmem:[%s1557_s29 + $0x3c] sm:$0xff] }
  0x21   : > { %409 = vrot.lane.b32.xlu0 %v393_v7, %s1501_s9  ;;  %289 = vst.msk [vmem:[#allocation2 + $0x20] sm:$0xff] %vm286_vm0, %v280_v59  ;;  %v282_v7 = vld [vmem:[%s1557_s29 + $0x20] sm:$0xff] }
  0x22   : > { %522 = vrot.lane.b32.xlu2 %v506_v8, %s1499_s30  ;;  %452 = vst.msk [vmem:[#allocation2 + $0x28] sm:$0xff] %vm286_vm0, %v444_v62  ;;  %739 = vmatpush.bf16.msra.mxu1 %v1447_v63 }
  0x23   : > { %453 = vst.msk [vmem:[#allocation2 + $0x38] sm:$0xff] %vm286_vm0, %v445_v5 }
  0x24   : > { %709 = vmatpush.bf16.msra.mxu0 %v1440_v53  ;;  %291 = vst.msk [vmem:[#allocation2 + $0x40] sm:$0xff] %vm286_vm0, %v282_v7 }
  0x25   : > { %456 = vst.msk [vmem:[#allocation2 + $0x68] sm:$0xff] %vm286_vm0, %v448_v37  ;;  %v1461_v37 = vld [vmem:[%s1911_s3 + $0x40] sm:$0xff] }
  0x26   : > { %457 = vst.msk [vmem:[#allocation2 + $0x78] sm:$0xff] %vm286_vm0, %v449_v44 }
  0x28   : > { %315 = vrot.lane.b32.xlu1 %v297_v9, %s1500_s8  ;;  %710 = vmatpush.bf16.msra.mxu0 %v1439_v57 }
  0x29   : > { %524 = vrot.lane.b32.xlu0 %v507_v10, %s1499_s30 }
  0x2a   : > { %317 = vrot.lane.b32.xlu2 %v298_v11, %s1500_s8 }
  0x30   : > { %366 = vrot.lane.b32.xlu1 %v347_v12, %s1499_s30 }
  0x31   : > { %364 = vrot.lane.b32.xlu0 %v346_v13, %s1499_s30 }
  0x32   : > { %478 = vrot.lane.b32.xlu2 %v460_v14, %s1500_s8 }
  0x38   : > { %413 = vrot.lane.b32.xlu1 %v395_v15, %s1501_s9  ;;  %v283_v15 = vld [vmem:[%s1557_s29 + $0x28] sm:$0xff] }
  0x39   : > { %480 = vrot.lane.b32.xlu0 %v461_v16, %s1500_s8  ;;  %292 = vst.msk [vmem:[#allocation2 + $0x50] sm:$0xff] %vm286_vm0, %v283_v15 }
  0x3a   : > { %415 = vrot.lane.b32.xlu2 %v396_v17, %s1501_s9 }
  0x40   : > { %528 = vrot.lane.b32.xlu1 %v509_v18, %s1499_s30  ;;  %v447_v18 = vld [vmem:[%s1557_s29 + $0x2c] sm:$0xff] }
  0x41   : > { %526 = vrot.lane.b32.xlu0 %v508_v19, %s1499_s30  ;;  %455 = vst.msk [vmem:[#allocation2 + $0x58] sm:$0xff] %vm286_vm0, %v447_v18 }
  0x42   : > { %319 = vrot.lane.b32.xlu2 %v299_v20, %s1500_s8 }
  0x48   : > { %368 = vrot.lane.b32.xlu1 %v348_v21, %s1499_s30 }
  0x49   : > { %321 = vrot.lane.b32.xlu0 %v300_v22, %s1500_s8 }
  0x4a   : > { %370 = vrot.lane.b32.xlu2 %v349_v23, %s1499_s30  ;;  %v446_v23 = vld [vmem:[%s1557_s29 + $0x24] sm:$0xff] }
  0x4b   : > { %454 = vst.msk [vmem:[#allocation2 + $0x48] sm:$0xff] %vm286_vm0, %v446_v23 }
  0x50   : > { %484 = vrot.lane.b32.xlu1 %v463_v24, %s1500_s8 }
  0x51   : > { %482 = vrot.lane.b32.xlu0 %v462_v25, %s1500_s8 }
  0x52   : > { %417 = vrot.lane.b32.xlu2 %v397_v26, %s1501_s9 }
  0x58   : > { %530 = vrot.lane.b32.xlu1 %v510_v27, %s1499_s30 }
  0x59   : > { %419 = vrot.lane.b32.xlu0 %v398_v28, %s1501_s9 }
  0x5a   : > { %532 = vrot.lane.b32.xlu2 %v511_v29, %s1499_s30 }
  0x60   : > { %325 = vrot.lane.b32.xlu1 %v302_v33, %s1500_s8  ;;  %v285_v33 = vld [vmem:[%s1557_s29 + $0x38] sm:$0xff] }
  0x61   : > { %323 = vrot.lane.b32.xlu0 %v301_v34, %s1500_s8  ;;  %294 = vst.msk [vmem:[#allocation2 + $0x70] sm:$0xff] %vm286_vm0, %v285_v33 }
  0x62   : > { %372 = vrot.lane.b32.xlu2 %v350_v35, %s1499_s30  ;;  %v284_v35 = vld [vmem:[%s1557_s29 + $0x30] sm:$0xff] }
  0x63   : > { %293 = vst.msk [vmem:[#allocation2 + $0x60] sm:$0xff] %vm286_vm0, %v284_v35 }
  0x68   : > { %486 = vrot.lane.b32.xlu1 %v464_v39, %s1500_s8 }
  0x69   : > { %374 = vrot.lane.b32.xlu0 %v351_v40, %s1499_s30 }
  0x6a   : > { %488 = vrot.lane.b32.xlu2 %v465_v42, %s1500_s8 }
  0x6c   : > { %v475_v47 = vpop.permute.xlu2 %474 }
  0x6d   : > { %498 = vst.msk [vmem:[#allocation2 + $0x8] sm:$0xff] %vm335_vm1, %v475_v47 }
  0x70   : > { %423 = vrot.lane.b32.xlu1 %v400_v46, %s1501_s9 }
  0x71   : > { %421 = vrot.lane.b32.xlu0 %v399_v48, %s1501_s9 }
  0x72   : > { %534 = vrot.lane.b32.xlu2 %v512_v51, %s1499_s30 }
  0x74   : > { %v477_v52 = vpop.permute.xlu2 %476 }
  0x75   : > { %499 = vst.msk [vmem:[#allocation2 + $0x18] sm:$0xff] %vm335_vm1, %v477_v52 }
  0x79   : > { %536 = vrot.lane.b32.xlu0 %v513_v55, %s1499_s30 }
  0x7c   : > { %v523_v60 = vpop.permute.xlu2 %522 }
  0x7d   : > { %546 = vst.msk [vmem:[#allocation2 + $0x8] sm:$0xff] %vm384_vm2, %v523_v60 }
  0x82   : > { %v361_v0 = vpop.permute.xlu1 %360 }
  0x83   : > { %v312_v1 = vpop.permute.xlu0 %311 }
  0x84   : > { %336 = vst.msk [vmem:[#allocation2] sm:$0xff] %vm335_vm1, %v312_v1  ;;  %v318_v2 = vpop.permute.xlu2 %317  ;;  %v555_v19 = vld [vmem:[#allocation2 + $0x8] sm:$0xff] }
  0x85   : > { %385 = vst.msk [vmem:[#allocation2] sm:$0xff] %vm384_vm2, %v361_v0 }
  0x86   : > { %339 = vst.msk [vmem:[#allocation2 + $0x30] sm:$0xff] %vm335_vm1, %v318_v2 }
  0x8a   : > { %v363_v3 = vpop.permute.xlu1 %362 }
  0x8b   : > { %v314_v4 = vpop.permute.xlu0 %313 }
  0x8c   : > { %337 = vst.msk [vmem:[#allocation2 + $0x10] sm:$0xff] %vm335_vm1, %v314_v4  ;;  %v479_v6 = vpop.permute.xlu2 %478 }
  0x8d   : > { %386 = vst.msk [vmem:[#allocation2 + $0x10] sm:$0xff] %vm384_vm2, %v363_v3 }
  0x8e   : > { %500 = vst.msk [vmem:[#allocation2 + $0x28] sm:$0xff] %vm335_vm1, %v479_v6  ;;  %v1502_v6 = vmov 0.0  }
  0x8f   : > { %801 = vst.msk [vmem:[#allocation4] sm:$0x3] %vm800_vm5, %v1502_v6 }
  0x90   : > { %802 = vst.msk [vmem:[#allocation4 + $0x22] sm:$0x3] %vm800_vm5, %v1502_v6 }
  0x91   : > { %1054 = vst.msk [vmem:[#allocation7] sm:$0x1] %vm1053_vm6, %v1502_v6 }
  0x92   : > { %v412_v8 = vpop.permute.xlu1 %411  ;;  %1055 = vst.msk [vmem:[#allocation7 + $0x11] sm:$0x1] %vm1053_vm6, %v1502_v6 }
  0x93   : > { %v410_v9 = vpop.permute.xlu0 %409  ;;  %435 = vst.msk [vmem:[#allocation2 + $0x10] sm:$0xff] %vm433_vm3, %v412_v8 }
  0x94   : > { %434 = vst.msk [vmem:[#allocation2] sm:$0xff] %vm433_vm3, %v410_v9  ;;  %v416_v10 = vpop.permute.xlu2 %415 }
  0x9a   : > { %v316_v11 = vpop.permute.xlu1 %315  ;;  %v556_v13 = vld [vmem:[#allocation2 + $0x10] sm:$0xff] }
  0x9b   : > { %v525_v12 = vpop.permute.xlu0 %524  ;;  %338 = vst.msk [vmem:[#allocation2 + $0x20] sm:$0xff] %vm335_vm1, %v316_v11  ;;  %v554_v14 = vld [vmem:[#allocation2] sm:$0xff] }
  0x9c   : > { %547 = vst.msk [vmem:[#allocation2 + $0x18] sm:$0xff] %vm384_vm2, %v525_v12  ;;  %v570_v16 = vpack.c.bf16 %v556_v13, %v554_v14  ;;  %v320_v17 = vpop.permute.xlu2 %319  ;;  %v1764_v13 = vld [vmem:[%s1910_s2] ss:$0 sm:$0xff] }
  0x9d   : > { %340 = vst.msk [vmem:[#allocation2 + $0x40] sm:$0xff] %vm335_vm1, %v320_v17 }
  0x9e   : > { %711 = vmatmul.bf16.vlgmr.msra.gmra.mxu0 %v570_v16 }
  0xa2   : > { %v367_v20 = vpop.permute.xlu1 %366 }
  0xa3   : > { %v365_v21 = vpop.permute.xlu0 %364  ;;  %388 = vst.msk [vmem:[#allocation2 + $0x30] sm:$0xff] %vm384_vm2, %v367_v20  ;;  %v557_v22 = vld [vmem:[#allocation2 + $0x18] sm:$0xff] }
  0xa4   : > { %387 = vst.msk [vmem:[#allocation2 + $0x20] sm:$0xff] %vm384_vm2, %v365_v21  ;;  %v571_v24 = vpack.c.bf16 %v557_v22, %v555_v19  ;;  %v371_v25 = vpop.permute.xlu2 %370 }
  0xa5   : > { %437 = vst.msk [vmem:[#allocation2 + $0x30] sm:$0xff] %vm433_vm3, %v416_v10 }
  0xa6   : > { %1342 = vmatmul.msk.bf16.vlgmr.msra.gmra.mxu1 %vm690_vm4, %v571_v24 }
  0xaa   : > { %v414_v26 = vpop.permute.xlu1 %413 }
  0xab   : > { %v481_v27 = vpop.permute.xlu0 %480  ;;  %436 = vst.msk [vmem:[#allocation2 + $0x20] sm:$0xff] %vm433_vm3, %v414_v26 }
  0xac   : > { %501 = vst.msk [vmem:[#allocation2 + $0x38] sm:$0xff] %vm335_vm1, %v481_v27  ;;  %v418_v28 = vpop.permute.xlu2 %417  ;;  %v560_v29 = vld [vmem:[#allocation2 + $0x30] sm:$0xff] }
  0xb2   : > { %v529_v30 = vpop.permute.xlu1 %528  ;;  %v558_v32 = vld [vmem:[#allocation2 + $0x20] sm:$0xff] }
  0xb3   : > { %v527_v31 = vpop.permute.xlu0 %526  ;;  %549 = vst.msk [vmem:[#allocation2 + $0x38] sm:$0xff] %vm384_vm2, %v529_v30  ;;  %v572_v34 = vpack.c.bf16 %v560_v29, %v558_v32 }
  0xb4   : > { %548 = vst.msk [vmem:[#allocation2 + $0x28] sm:$0xff] %vm384_vm2, %v527_v31  ;;  %v533_v36 = vpop.permute.xlu2 %532 }
  0xb5   : > { %716 = vmatmul.bf16.gmra.mxu0 %v572_v34 }
  0xba   : > { %v369_v38 = vpop.permute.xlu1 %368  ;;  %v561_v40 = vld [vmem:[#allocation2 + $0x38] sm:$0xff] }
  0xbb   : > { %v322_v39 = vpop.permute.xlu0 %321  ;;  %389 = vst.msk [vmem:[#allocation2 + $0x40] sm:$0xff] %vm384_vm2, %v369_v38  ;;  %v559_v41 = vld [vmem:[#allocation2 + $0x28] sm:$0xff] }
  0xbc   : > { %341 = vst.msk [vmem:[#allocation2 + $0x50] sm:$0xff] %vm335_vm1, %v322_v39  ;;  %v573_v42 = vpack.c.bf16 %v561_v40, %v559_v41  ;;  %v373_v43 = vpop.permute.xlu2 %372 }
  0xbd   : > { %390 = vst.msk [vmem:[#allocation2 + $0x50] sm:$0xff] %vm384_vm2, %v371_v25 }
  0xbe   : > { %1343 = vmatmul.msk.bf16.gmra.mxu1 %vm690_vm4, %v573_v42  ;;  %438 = vst.msk [vmem:[#allocation2 + $0x40] sm:$0xff] %vm433_vm3, %v418_v28 }
  0xc2   : > { %v485_v45 = vpop.permute.xlu1 %484 }
  0xc3   : > { %v483_v46 = vpop.permute.xlu0 %482  ;;  %503 = vst.msk [vmem:[#allocation2 + $0x58] sm:$0xff] %vm335_vm1, %v485_v45 }
  0xc4   : > { %502 = vst.msk [vmem:[#allocation2 + $0x48] sm:$0xff] %vm335_vm1, %v483_v46  ;;  %v489_v47 = vpop.permute.xlu2 %488 }
  0xc5   : > { %551 = vst.msk [vmem:[#allocation2 + $0x58] sm:$0xff] %vm384_vm2, %v533_v36  ;;  %v562_v51 = vld [vmem:[#allocation2 + $0x40] sm:$0xff]  ;;  %v1462_v36 = vld [vmem:[%s1911_s3 + $0x48] sm:$0xff] }
  0xc6   : > { %505 = vst.msk [vmem:[#allocation2 + $0x78] sm:$0xff] %vm335_vm1, %v489_v47  ;;  %1018 = vmatpush.bf16.msra.mxu3 %v1462_v36 }
  0xca   : > { %v531_v48 = vpop.permute.xlu1 %530  ;;  %1019 = vmatpush.bf16.msra.mxu3 %v1461_v37 }
  0xcb   : > { %v420_v49 = vpop.permute.xlu0 %419  ;;  %550 = vst.msk [vmem:[#allocation2 + $0x48] sm:$0xff] %vm384_vm2, %v531_v48 }
  0xcc   : > { %439 = vst.msk [vmem:[#allocation2 + $0x50] sm:$0xff] %vm433_vm3, %v420_v49  ;;  %v565_v50 = vld [vmem:[#allocation2 + $0x58] sm:$0xff]  ;;  %v535_v58 = vpop.permute.xlu2 %534 }
  0xd2   : > { %v326_v52 = vpop.permute.xlu1 %325  ;;  %v563_v54 = vld [vmem:[#allocation2 + $0x48] sm:$0xff] }
  0xd3   : > { %v324_v53 = vpop.permute.xlu0 %323  ;;  %343 = vst.msk [vmem:[#allocation2 + $0x70] sm:$0xff] %vm335_vm1, %v326_v52  ;;  %v564_v55 = vld [vmem:[#allocation2 + $0x50] sm:$0xff]  ;;  %v575_v56 = vpack.c.bf16 %v565_v50, %v563_v54 }
  0xd4   : > { %342 = vst.msk [vmem:[#allocation2 + $0x60] sm:$0xff] %vm335_vm1, %v324_v53  ;;  %v574_v57 = vpack.c.bf16 %v564_v55, %v562_v51 }
  0xd5   : > { %1344 = vmatmul.msk.bf16.gmra.mxu1 %vm690_vm4, %v575_v56  ;;  %391 = vst.msk [vmem:[#allocation2 + $0x60] sm:$0xff] %vm384_vm2, %v373_v43 }
  0xd6   : > { %721 = vmatmul.bf16.gmra.mxu0 %v574_v57 }
  0xda   : > { %v487_v59 = vpop.permute.xlu1 %486 }
  0xdb   : > { %v375_v60 = vpop.permute.xlu0 %374  ;;  %504 = vst.msk [vmem:[#allocation2 + $0x68] sm:$0xff] %vm335_vm1, %v487_v59 }
  0xdc   : > { %392 = vst.msk [vmem:[#allocation2 + $0x70] sm:$0xff] %vm384_vm2, %v375_v60 }
  0xdd   : > { %552 = vst.msk [vmem:[#allocation2 + $0x68] sm:$0xff] %vm384_vm2, %v535_v58 }
  0xe2   : > { %v424_v61 = vpop.permute.xlu1 %423 }
  0xe3   : > { %v422_v62 = vpop.permute.xlu0 %421  ;;  %441 = vst.msk [vmem:[#allocation2 + $0x70] sm:$0xff] %vm433_vm3, %v424_v61 }
  0xe4   : > { %440 = vst.msk [vmem:[#allocation2 + $0x60] sm:$0xff] %vm433_vm3, %v422_v62  ;;  %v567_v3 = vld [vmem:[#allocation2 + $0x68] sm:$0xff] }
  0xea   : > { %v568_v0 = vld [vmem:[#allocation2 + $0x70] sm:$0xff] }
  0xeb   : > { %v537_v63 = vpop.permute.xlu0 %536  ;;  %v566_v1 = vld [vmem:[#allocation2 + $0x60] sm:$0xff] }
  0xec   : > { %553 = vst.msk [vmem:[#allocation2 + $0x78] sm:$0xff] %vm384_vm2, %v537_v63  ;;  %v576_v2 = vpack.c.bf16 %v568_v0, %v566_v1 }
  0xee   : > { %726 = vmatmul.bf16.gmra.mxu0 %v576_v2 }
  0xf3   : > { %v569_v4 = vld [vmem:[#allocation2 + $0x78] sm:$0xff] }
  0xf4   : > { %v577_v5 = vpack.c.bf16 %v569_v4, %v567_v3 }
  0xf6   : > { %1345 = vmatmul.msk.bf16.gmra.mxu1 %vm690_vm4, %v577_v5 }
 0x11b   : > { %v712_v7 = vpop.f32.mrf.mxu0 }
 0x123   : > { %v741_v8 = vpop.f32.mrf.mxu1  ;;  %v714_v10 = vpop.f32.mrf.mxu0 }
 0x124   : > { %v742_v9 = vadd.f32 %v741_v8, %v712_v7 }
 0x126   : > { %761 = vst.msk [vmem:[#allocation3] sm:$0xff] %vm286_vm0, %v742_v9 }
 0x12b   : > { %v743_v11 = vpop.f32.mrf.mxu1 }
 0x12c   : > { %v744_v12 = vadd.f32 %v743_v11, %v714_v10 }
 0x12e   : > { %762 = vst.msk [vmem:[#allocation3 + $0x8] sm:$0xff] %vm286_vm0, %v744_v12 }
 0x132   : > { %v717_v18 = vpop.f32.mrf.mxu0 }
 0x135   : > { %v769_v14 = vld [vmem:[#allocation3] ss:$2 sm:$0xff]  ;;  %v777_v15 = vld [vmem:[#allocation3 + $0x1] ss:$2 sm:$0xff] }
 0x136   : > { %v784_v16 = vmax.f32 %v769_v14, %v777_v15 }
 0x138   : > { %v792_v17 = vadd.f32 %v1764_v13, %v784_v16 }
 0x13a   : > { %v796_v19 = vmax.f32 %v792_v17, 0.0  ;;  %v719_v22 = vpop.f32.mrf.mxu0  ;;  %v1460_v17 = vld [vmem:[%s1911_s3 + $0x38] sm:$0xff] }
 0x13b   : > { %v746_v20 = vpop.f32.mrf.mxu1  ;;  %993 = vmatpush.bf16.msra.mxu2 %v1460_v17  ;;  %v1473_v17 = vld [vmem:[%s1913_s5 + $0x50] sm:$0xff] }
 0x13c   : > { %v747_v21 = vadd.f32 %v746_v20, %v717_v18  ;;  %803 = vst.msk [vmem:[#allocation4 + $0x2] sm:$0xff] %vm286_vm0, %v796_v19  ;;  %v1459_v18 = vld [vmem:[%s1911_s3 + $0x30] sm:$0xff]  ;;  %v1458_v19 = vld [vmem:[%s1911_s3 + $0x28] sm:$0xff] }
 0x13e   : > { %763 = vst.msk [vmem:[#allocation3 + $0x10] sm:$0xff] %vm286_vm0, %v747_v21 }
 0x13f   : > { %994 = vmatpush.bf16.msra.mxu2 %v1459_v18  ;;  %v1472_v18 = vld [vmem:[%s1913_s5 + $0x48] sm:$0xff] }
 0x143   : > { %v748_v23 = vpop.f32.mrf.mxu1  ;;  %v839_v24 = vld [vmem:[#allocation4 + $0x2] sm:$0xff]  ;;  %995 = vmatpush.bf16.msra.mxu2 %v1458_v19 }
 0x144   : > { %v815_v25 = vld [vmem:[#allocation4 + $0x1] sm:$0xff]  ;;  %v749_v27 = vadd.f32 %v748_v23, %v719_v22  ;;  %847 = vrot.lane.b32.xlu0 %v839_v24, %s1499_s30  ;;  %v1456_v24 = vld [vmem:[%s1911_s3 + $0x18] sm:$0xff] }
 0x145   : > { %v807_v26 = vld [vmem:[#allocation4] sm:$0xff]  ;;  %823 = vrot.lane.b32.xlu1 %v815_v25, %s1500_s8 }
 0x146   : > { %811 = vst.msk [vmem:[#allocation5] sm:$0xff] %vm286_vm0, %v807_v26  ;;  %v1457_v23 = vld [vmem:[%s1911_s3 + $0x20] sm:$0xff]  ;;  %v1455_v26 = vld [vmem:[%s1911_s3 + $0x10] sm:$0xff] }
 0x147   : > { %764 = vst.msk [vmem:[#allocation3 + $0x18] sm:$0xff] %vm286_vm0, %v749_v27  ;;  %996 = vmatpush.bf16.msra.mxu2 %v1457_v23  ;;  %v1454_v27 = vld [vmem:[%s1911_s3 + $0x8] sm:$0xff]  ;;  %v1471_v19 = vld [vmem:[%s1913_s5 + $0x40] sm:$0xff] }
 0x14b   : > { %997 = vmatpush.bf16.msra.mxu2 %v1456_v24 }
 0x14e   : > { %v771_v28 = vld [vmem:[#allocation3 + $0x10] ss:$2 sm:$0xff]  ;;  %v779_v29 = vld [vmem:[#allocation3 + $0x11] ss:$2 sm:$0xff] }
 0x14f   : > { %v785_v30 = vmax.f32 %v771_v28, %v779_v29  ;;  %998 = vmatpush.bf16.msra.mxu2 %v1455_v26  ;;  %v1453_v28 = vld [vmem:[%s1911_s3] sm:$0xff] }
 0x151   : > { %v793_v31 = vadd.f32 %v1764_v13, %v785_v30 }
 0x152   : > { %v751_v32 = vpop.f32.mrf.mxu1 }
 0x153   : > { %v797_v33 = vmax.f32 %v793_v31, 0.0  ;;  %v722_v34 = vpop.f32.mrf.mxu0  ;;  %999 = vmatpush.bf16.msra.mxu2 %v1454_v27 }
 0x154   : > { %v752_v35 = vadd.f32 %v751_v32, %v722_v34 }
 0x155   : > { %804 = vst.msk [vmem:[#allocation4 + $0xa] sm:$0xff] %vm286_vm0, %v797_v33 }
 0x156   : > { %765 = vst.msk [vmem:[#allocation3 + $0x20] sm:$0xff] %vm286_vm0, %v752_v35 }
 0x157   : > { %1000 = vmatpush.bf16.msra.mxu2 %v1453_v28 }
 0x15a   : > { %v753_v38 = vpop.f32.mrf.mxu1 }
 0x15b   : > { %v724_v39 = vpop.f32.mrf.mxu0 }
 0x15c   : > { %v840_v40 = vld [vmem:[#allocation4 + $0xa] sm:$0xff]  ;;  %v754_v42 = vadd.f32 %v753_v38, %v724_v39 }
 0x15d   : > { %v816_v41 = vld [vmem:[#allocation4 + $0x9] sm:$0xff]  ;;  %849 = vrot.lane.b32.xlu1 %v840_v40, %s1499_s30 }
 0x15e   : > { %825 = vrot.lane.b32.xlu2 %v816_v41, %s1500_s8  ;;  %v887_v43 = vld [vmem:[#allocation4 + $0x4] sm:$0xff]  ;;  %766 = vst.msk [vmem:[#allocation3 + $0x28] sm:$0xff] %vm286_vm0, %v754_v42 }
 0x15f   : > { %v808_v44 = vld [vmem:[#allocation4 + $0x8] sm:$0xff]  ;;  %891 = vst.msk [vmem:[#allocation5 + $0x8] sm:$0xff] %vm286_vm0, %v887_v43 }
 0x160   : > { %812 = vst.msk [vmem:[#allocation5 + $0x10] sm:$0xff] %vm286_vm0, %v808_v44  ;;  %v863_v45 = vld [vmem:[#allocation4 + $0x3] sm:$0xff] }
 0x165   : > { %v773_v46 = vld [vmem:[#allocation3 + $0x20] ss:$2 sm:$0xff]  ;;  %v781_v47 = vld [vmem:[#allocation3 + $0x21] ss:$2 sm:$0xff] }
 0x166   : > { %871 = vrot.lane.b32.xlu2 %v863_v45, %s1501_s9  ;;  %v786_v48 = vmax.f32 %v773_v46, %v781_v47  ;;  %v896_v62 = vld [vmem:[#allocation5 + $0x8] sm:$0xff] }
 0x168   : > { %v794_v49 = vadd.f32 %v1764_v13, %v786_v48 }
 0x16a   : > { %v798_v50 = vmax.f32 %v794_v49, 0.0  ;;  %v1489_v49 = vld [vmem:[%s1912_s4] ss:$0 sm:$0xff] }
 0x16b   : > { %v727_v51 = vpop.f32.mrf.mxu0 }
 0x16c   : > { %805 = vst.msk [vmem:[#allocation4 + $0x12] sm:$0xff] %vm286_vm0, %v798_v50 }
 0x173   : > { %v756_v52 = vpop.f32.mrf.mxu1  ;;  %v864_v54 = vld [vmem:[#allocation4 + $0xb] sm:$0xff]  ;;  %v729_v58 = vpop.f32.mrf.mxu0 }
 0x174   : > { %v757_v53 = vadd.f32 %v756_v52, %v727_v51  ;;  %v817_v55 = vld [vmem:[#allocation4 + $0x11] sm:$0xff]  ;;  %873 = vrot.lane.b32.xlu0 %v864_v54, %s1501_s9 }
 0x175   : > { %827 = vrot.lane.b32.xlu1 %v817_v55, %s1500_s8  ;;  %v888_v56 = vld [vmem:[#allocation4 + $0xc] sm:$0xff] }
 0x176   : > { %v809_v57 = vld [vmem:[#allocation4 + $0x10] sm:$0xff]  ;;  %767 = vst.msk [vmem:[#allocation3 + $0x30] sm:$0xff] %vm286_vm0, %v757_v53 }
 0x177   : > { %892 = vst.msk [vmem:[#allocation5 + $0x18] sm:$0xff] %vm286_vm0, %v888_v56  ;;  %v841_v61 = vld [vmem:[#allocation4 + $0x12] sm:$0xff] }
 0x178   : > { %813 = vst.msk [vmem:[#allocation5 + $0x20] sm:$0xff] %vm286_vm0, %v809_v57 }
 0x17b   : > { %v758_v59 = vpop.f32.mrf.mxu1 }
 0x17c   : > { %v759_v60 = vadd.f32 %v758_v59, %v729_v58  ;;  %851 = vrot.lane.b32.xlu0 %v841_v61, %s1499_s30  ;;  %v1470_v59 = vld [vmem:[%s1913_s5 + $0x38] sm:$0xff]  ;;  %v1468_v61 = vld [vmem:[%s1913_s5 + $0x28] sm:$0xff] }
 0x17d   : > { %1184 = vmatpush.bf16.msrb.mxu3 %v1470_v59 }
 0x17e   : > { %768 = vst.msk [vmem:[#allocation3 + $0x38] sm:$0xff] %vm286_vm0, %v759_v60  ;;  %v898_v63 = vld [vmem:[#allocation5 + $0x18] sm:$0xff]  ;;  %v1469_v60 = vld [vmem:[%s1913_s5 + $0x30] sm:$0xff] }
 0x17f   : > { %v904_v0 = vpack.c.bf16 %v898_v63, %v896_v62 }
 0x181   : > { %1386 = vmatmul.msk.bf16.vlgmr.msra.gmra.mxu3 %vm286_vm0, %v904_v0 }
 0x182   : > { %1185 = vmatpush.bf16.msrb.mxu3 %v1469_v60 }
 0x185   : > { %v775_v1 = vld [vmem:[#allocation3 + $0x30] ss:$2 sm:$0xff]  ;;  %v783_v2 = vld [vmem:[#allocation3 + $0x31] ss:$2 sm:$0xff] }
 0x186   : > { %v787_v3 = vmax.f32 %v775_v1, %v783_v2  ;;  %1186 = vmatpush.bf16.msrb.mxu3 %v1468_v61  ;;  %v1467_v1 = vld [vmem:[%s1913_s5 + $0x20] sm:$0xff] }
 0x188   : > { %v795_v4 = vadd.f32 %v1764_v13, %v787_v3 }
 0x18a   : > { %v799_v5 = vmax.f32 %v795_v4, 0.0  ;;  %1187 = vmatpush.bf16.msrb.mxu3 %v1467_v1 }
 0x18c   : > { %806 = vst.msk [vmem:[#allocation4 + $0x1a] sm:$0xff] %vm286_vm0, %v799_v5 }
 0x193   : > { %v866_v7 = vld [vmem:[#allocation4 + $0x1b] sm:$0xff]  ;;  %v865_v13 = vld [vmem:[#allocation4 + $0x13] sm:$0xff] }
 0x194   : > { %v842_v8 = vld [vmem:[#allocation4 + $0x1a] sm:$0xff]  ;;  %877 = vrot.lane.b32.xlu0 %v866_v7, %s1501_s9 }
 0x195   : > { %v818_v9 = vld [vmem:[#allocation4 + $0x19] sm:$0xff]  ;;  %853 = vrot.lane.b32.xlu1 %v842_v8, %s1499_s30 }
 0x196   : > { %v889_v10 = vld [vmem:[#allocation4 + $0x14] sm:$0xff]  ;;  %v890_v11 = vld [vmem:[#allocation4 + $0x1c] sm:$0xff]  ;;  %829 = vrot.lane.b32.xlu2 %v818_v9, %s1500_s8 }
 0x197   : > { %893 = vst.msk [vmem:[#allocation5 + $0x28] sm:$0xff] %vm286_vm0, %v889_v10  ;;  %v810_v12 = vld [vmem:[#allocation4 + $0x18] sm:$0xff] }
 0x198   : > { %894 = vst.msk [vmem:[#allocation5 + $0x38] sm:$0xff] %vm286_vm0, %v890_v11 }
 0x199   : > { %814 = vst.msk [vmem:[#allocation5 + $0x30] sm:$0xff] %vm286_vm0, %v810_v12  ;;  %v1466_v12 = vld [vmem:[%s1913_s5 + $0x18] sm:$0xff] }
 0x19a   : > { %1188 = vmatpush.bf16.msrb.mxu3 %v1466_v12 }
 0x19e   : > { %v900_v14 = vld [vmem:[#allocation5 + $0x28] sm:$0xff]  ;;  %875 = vrot.lane.b32.xlu2 %v865_v13, %s1501_s9  ;;  %s276_s9 = scalar_lea.vmem %s1915_s7, %s1285_s11 }
 0x19f   : > { %v902_v15 = vld [vmem:[#allocation5 + $0x38] sm:$0xff]  ;;  %v1465_v13 = vld [vmem:[%s1913_s5 + $0x10] sm:$0xff] }
 0x1a0   : > { %v906_v16 = vpack.c.bf16 %v902_v15, %v900_v14  ;;  %1189 = vmatpush.bf16.msrb.mxu3 %v1465_v13  ;;  %v1464_v14 = vld [vmem:[%s1913_s5 + $0x8] sm:$0xff]  ;;  %v1463_v15 = vld [vmem:[%s1913_s5] sm:$0xff] }
 0x1a2   : > { %1387 = vmatmul.msk.bf16.gmra.mxu3 %vm286_vm0, %v906_v16  ;;  %v1474_v16 = vld [vmem:[%s1913_s5 + $0x58] sm:$0xff] }
 0x1a4   : > { %1190 = vmatpush.bf16.msrb.mxu3 %v1464_v14 }
 0x1a8   : > { %1191 = vmatpush.bf16.msrb.mxu3 %v1463_v15 }
 0x1ac   : > { %1202 = vmatpush.bf16.msra.mxu3 %v1474_v16 }
 0x1b0   : > { %1203 = vmatpush.bf16.msra.mxu3 %v1473_v17 }
 0x1b4   : > { %1204 = vmatpush.bf16.msra.mxu3 %v1472_v18 }
 0x1b6   : > { %v848_v20 = vpop.permute.xlu0 %847 }
 0x1b7   : > { %v824_v21 = vpop.permute.xlu1 %823 }
 0x1b8   : > { %835 = vst.msk [vmem:[#allocation5] sm:$0xff] %vm335_vm1, %v824_v21  ;;  %v826_v22 = vpop.permute.xlu2 %825  ;;  %1205 = vmatpush.bf16.msra.mxu3 %v1471_v19 }
 0x1b9   : > { %859 = vst.msk [vmem:[#allocation5] sm:$0xff] %vm384_vm2, %v848_v20 }
 0x1ba   : > { %836 = vst.msk [vmem:[#allocation5 + $0x10] sm:$0xff] %vm335_vm1, %v826_v22 }
 0x1c0   : > { %v872_v25 = vpop.permute.xlu2 %871 }
 0x1c1   : > { %883 = vst.msk [vmem:[#allocation5] sm:$0xff] %vm433_vm3, %v872_v25 }
 0x1c8   : > { %v895_v34 = vld [vmem:[#allocation5] sm:$0xff] }
 0x1cf   : > { %v850_v29 = vpop.permute.xlu1 %849 }
 0x1d0   : > { %860 = vst.msk [vmem:[#allocation5 + $0x10] sm:$0xff] %vm384_vm2, %v850_v29 }
 0x1e6   : > { %v874_v30 = vpop.permute.xlu0 %873 }
 0x1e7   : > { %v828_v31 = vpop.permute.xlu1 %827  ;;  %884 = vst.msk [vmem:[#allocation5 + $0x10] sm:$0xff] %vm433_vm3, %v874_v30 }
 0x1e8   : > { %837 = vst.msk [vmem:[#allocation5 + $0x20] sm:$0xff] %vm335_vm1, %v828_v31 }
 0x1ee   : > { %v852_v32 = vpop.permute.xlu0 %851  ;;  %v897_v35 = vld [vmem:[#allocation5 + $0x10] sm:$0xff] }
 0x1ef   : > { %861 = vst.msk [vmem:[#allocation5 + $0x20] sm:$0xff] %vm384_vm2, %v852_v32  ;;  %v903_v36 = vpack.c.bf16 %v897_v35, %v895_v34  ;;  %v1490_v34 = vld [vmem:[%s1914_s6] ss:$0 sm:$0xff] }
 0x1f0   : > { %v830_v33 = vpop.permute.xlu2 %829 }
 0x1f1   : > { %838 = vst.msk [vmem:[#allocation5 + $0x30] sm:$0xff] %vm335_vm1, %v830_v33  ;;  %1001 = vmatmul.bf16.vlgmr.msra.gmra.mxu2 %v903_v36 }
 0x1f8   : > { %v876_v37 = vpop.permute.xlu2 %875 }
 0x1f9   : > { %885 = vst.msk [vmem:[#allocation5 + $0x20] sm:$0xff] %vm433_vm3, %v876_v37 }
 0x200   : > { %v899_v40 = vld [vmem:[#allocation5 + $0x20] sm:$0xff] }
 0x204   : > { %v1021_v43 = vpop.f32.mrf.mxu3 }
 0x206   : > { %v878_v38 = vpop.permute.xlu0 %877 }
 0x207   : > { %v854_v39 = vpop.permute.xlu1 %853 }
 0x208   : > { %862 = vst.msk [vmem:[#allocation5 + $0x30] sm:$0xff] %vm384_vm2, %v854_v39 }
 0x209   : > { %886 = vst.msk [vmem:[#allocation5 + $0x30] sm:$0xff] %vm433_vm3, %v878_v38 }
 0x20c   : > { %v1023_v46 = vpop.f32.mrf.mxu3 }
 0x210   : > { %v901_v41 = vld [vmem:[#allocation5 + $0x30] sm:$0xff] }
 0x211   : > { %v905_v42 = vpack.c.bf16 %v901_v41, %v899_v40 }
 0x213   : > { %1006 = vmatmul.bf16.gmra.mxu2 %v905_v42 }
 0x225   : > { %v1026_v54 = vpop.f32.mrf.mxu3 }
 0x22d   : > { %v1028_v62 = vpop.f32.mrf.mxu3 }
 0x274   : > { %v1002_v44 = vpop.f32.mrf.mxu2 }
 0x275   : > { %v1022_v45 = vadd.f32 %v1021_v43, %v1002_v44 }
 0x277   : > { %1032 = vst.msk [vmem:[#allocation6] sm:$0xff] %vm1031_vm7, %v1022_v45 }
 0x27c   : > { %v1004_v47 = vpop.f32.mrf.mxu2 }
 0x27d   : > { %v1024_v48 = vadd.f32 %v1023_v46, %v1004_v47 }
 0x27f   : > { %1033 = vst.msk [vmem:[#allocation6 + $0x8] sm:$0xff] %vm1031_vm7, %v1024_v48 }
 0x286   : > { %v1036_v50 = vld [vmem:[#allocation6] ss:$2 sm:$0xff]  ;;  %v1040_v51 = vld [vmem:[#allocation6 + $0x1] ss:$2 sm:$0xff] }
 0x287   : > { %v1043_v52 = vmax.f32 %v1036_v50, %v1040_v51 }
 0x289   : > { %v1049_v53 = vadd.f32 %v1489_v49, %v1043_v52 }
 0x28b   : > { %v1051_v6 = vmax.f32 %v1049_v53, 0.0 }
 0x28d   : > { %1056 = vst.msk [vmem:[#allocation7 + $0x1] sm:$0xff] %vm1031_vm7, %v1051_v6 }
 0x294   : > { %v1062_v55 = vld [vmem:[#allocation7 + $0x1] sm:$0xff] }
 0x295   : > { %v1058_v57 = vld [vmem:[#allocation7] sm:$0xff]  ;;  %1066 = vrot.lane.b32.xlu1 %v1062_v55, %s1499_s30 }
 0x296   : > { %v1007_v56 = vpop.f32.mrf.mxu2  ;;  %1060 = vst.msk [vmem:[#allocation8] sm:$0xff] %vm1031_vm7, %v1058_v57 }
 0x297   : > { %v1027_v58 = vadd.f32 %v1026_v54, %v1007_v56 }
 0x299   : > { %1034 = vst.msk [vmem:[#allocation6 + $0x10] sm:$0xff] %vm1031_vm7, %v1027_v58 }
 0x29e   : > { %v1009_v63 = vpop.f32.mrf.mxu2 }
 0x29f   : > { %v1029_v0 = vadd.f32 %v1028_v62, %v1009_v63 }
 0x2a1   : > { %1035 = vst.msk [vmem:[#allocation6 + $0x18] sm:$0xff] %vm1031_vm7, %v1029_v0 }
 0x2a8   : > { %v1038_v2 = vld [vmem:[#allocation6 + $0x10] ss:$2 sm:$0xff]  ;;  %v1042_v3 = vld [vmem:[#allocation6 + $0x11] ss:$2 sm:$0xff] }
 0x2a9   : > { %v1044_v4 = vmax.f32 %v1038_v2, %v1042_v3 }
 0x2ab   : > { %v1050_v5 = vadd.f32 %v1489_v49, %v1044_v4 }
 0x2ad   : > { %v1052_v7 = vmax.f32 %v1050_v5, 0.0 }
 0x2af   : > { %1057 = vst.msk [vmem:[#allocation7 + $0x9] sm:$0xff] %vm1031_vm7, %v1052_v7 }
 0x2b6   : > { %v1063_v8 = vld [vmem:[#allocation7 + $0x9] sm:$0xff] }
 0x2b7   : > { %v1059_v9 = vld [vmem:[#allocation7 + $0x8] sm:$0xff]  ;;  %1068 = vrot.lane.b32.xlu2 %v1063_v8, %s1499_s30 }
 0x2b8   : > { %v1075_v10 = vld [vmem:[#allocation7 + $0x2] sm:$0xff]  ;;  %1061 = vst.msk [vmem:[#allocation8 + $0x10] sm:$0xff] %vm1031_vm7, %v1059_v9  ;;  %v1076_v11 = vld [vmem:[#allocation7 + $0xa] sm:$0xff] }
 0x2b9   : > { %1077 = vst.msk [vmem:[#allocation8 + $0x8] sm:$0xff] %vm1031_vm7, %v1075_v10 }
 0x2ba   : > { %1078 = vst.msk [vmem:[#allocation8 + $0x18] sm:$0xff] %vm1031_vm7, %v1076_v11 }
 0x2c0   : > { %v1080_v25 = vld [vmem:[#allocation8 + $0x8] sm:$0xff] }
 0x2c1   : > { %v1082_v26 = vld [vmem:[#allocation8 + $0x18] sm:$0xff] }
 0x2c2   : > { %v1084_v27 = vpack.c.bf16 %v1082_v26, %v1080_v25 }
 0x307   : > { %v1067_v20 = vpop.permute.xlu1 %1066 }
 0x308   : > { %1073 = vst.msk [vmem:[#allocation8] sm:$0xff] %vm1072_vm8, %v1067_v20 }
 0x30f   : > { %v1079_v22 = vld [vmem:[#allocation8] sm:$0xff] }
 0x311   : > { %v1069_v21 = vpop.permute.xlu2 %1068 }
 0x312   : > { %1074 = vst.msk [vmem:[#allocation8 + $0x10] sm:$0xff] %vm1072_vm8, %v1069_v21 }
 0x319   : > { %v1081_v23 = vld [vmem:[#allocation8 + $0x10] sm:$0xff] }
 0x31a   : > { %v1083_v24 = vpack.c.bf16 %v1081_v23, %v1079_v22 }
 0x31c   : > { %1192 = vmatmul.bf16.vlgmr.msrb.gmra.mxu3 %v1083_v24 }
 0x32c   : > { %1436 = vmatmul.msk.bf16.vlgmr.msra.gmra.mxu3 %vm1031_vm7, %v1084_v27 }
 0x39f   : > { %v1193_v28 = vpop.f32.mrf.mxu3 }
 0x3a7   : > { %v1195_v29 = vpop.f32.mrf.mxu3 }
 0x3af   : > { %v1207_v30 = vpop.f32.mrf.mxu3 }
 0x3b0   : > { %v1208_v31 = vadd.f32 %v1207_v30, %v1193_v28 }
 0x3b2   : > { %1212 = vst [vmem:[#allocation9] sm:$0xff] %v1208_v31 }
 0x3b7   : > { %v1209_v32 = vpop.f32.mrf.mxu3 }
 0x3b8   : > { %v1210_v33 = vadd.f32 %v1209_v32, %v1195_v29 }
 0x3ba   : > { %1213 = vst [vmem:[#allocation9 + $0x8] sm:$0xff] %v1210_v33 }
 0x3c1   : > { %v1214_v35 = vld [vmem:[#allocation9] ss:$2 sm:$0xff]  ;;  %v1216_v36 = vld [vmem:[#allocation9 + $0x1] ss:$2 sm:$0xff] }
 0x3c2   : > { %v1217_v37 = vmax.f32 %v1214_v35, %v1216_v36 }
 0x3c4   : > { %v1222_v38 = vadd.f32 %v1490_v34, %v1217_v37 }
 0x3c6   : > { %v1223_v39 = vmax.f32 %v1222_v38, 0.0 }
 0x3c8   : > { %v1224_v40 = vpack.c.bf16 %v1223_v39, %v1223_v39 }
 0x3ca   : > { %1225 = vst [vmem:[%s276_s9] sm:$0xf] %v1224_v40 }
 0x3cb PF: > { %s17_s24 = sadd.s32 1, %s1497_s24  }
 0x3cc   : > { %p14_p4 = scmp.ge.s32.totalorder %s17_s24, 4  }
 0x3ce   :  { %16 = sbr.rel (!%p14_p4) target bundleno = 1 (0x1), region = 89 }

// kernel: _lambda_.3
= control target key start
LH: loop header
LB: loop body
LE: loop exit
PB: predicated region body
PF: predicated region fallthrough
CT: control target
= control target key end

     0   :  { %s4409_s1 = inlined_call_operand.vmem [shape: bf16[128,512], index: 1, kind: input, shape index: {}]   ;;  %s4410_s0 = inlined_call_operand.vmem [shape: bf16[64,128], index: 0, kind: input, shape index: {}]   ;;  %s4411_s2 = inlined_call_operand.vmem [shape: f32[128,512], index: 2, kind: input, shape index: {}]   ;;  %s4412_s3 = inlined_call_operand.vmem [shape: f32[1,512], index: 3, kind: input, shape index: {}]   ;;  %s4413_s4 = inlined_call_operand.vmem [shape: bf16[128,512], index: 4, kind: input, shape index: {}]   ;;  %s4414_s6 = inlined_call_operand.vmem [shape: f32[256,128], index: 6, kind: input, shape index: {}]   ;;  %s4415_s5 = inlined_call_operand.vmem [shape: f32[1,512], index: 5, kind: input, shape index: {}]   ;;  %s4416_s7 = inlined_call_operand.vmem [shape: f32[1,128], index: 7, kind: input, shape index: {}]   ;;  %s4417_s8 = inlined_call_operand.vmem [shape: f32[8,128], index: 8, kind: output, shape index: {}]  }
   0x1   :  { %v2158_v0 = vld [vmem:[%s4409_s1 + $0xe0] sm:$0xf]  ;;  %v2328_v1 = vld [vmem:[%s4409_s1 + $0xec] sm:$0xf0]  ;;  %v2326_v2 = vld [vmem:[%s4409_s1 + $0xe4] sm:$0xf] }
   0x2   :  { %v2159_v3 = vor.u32 %v2328_v1, %v2158_v0  ;;  %v2160_v4 = vld [vmem:[%s4409_s1 + $0xf0] sm:$0xf0]  ;;  %v2166_v5 = vld [vmem:[%s4409_s1 + $0xe8] sm:$0xf]  ;;  %v2329_v6 = vld [vmem:[%s4409_s1 + $0xf4] sm:$0xf0] }
   0x3   :  { %v2163_v7 = vor.u32 %v2326_v2, %v2160_v4  ;;  %v2167_v8 = vor.u32 %v2329_v6, %v2166_v5  ;;  %v2327_v9 = vld [vmem:[%s4409_s1 + $0xec] sm:$0xf]  ;;  %v2168_v10 = vld [vmem:[%s4409_s1 + $0xf8] sm:$0xf0]  ;;  %v2142_v11 = vld [vmem:[%s4409_s1 + $0xc0] sm:$0xf] }
   0x4   :  { %269 = vmatpush.bf16.msra.mxu0 %v2159_v3  ;;  %v2171_v12 = vor.u32 %v2327_v9, %v2168_v10  ;;  %v2324_v13 = vld [vmem:[%s4409_s1 + $0xcc] sm:$0xf0]  ;;  %v2322_v14 = vld [vmem:[%s4409_s1 + $0xc4] sm:$0xf]  ;;  %v2144_v15 = vld [vmem:[%s4409_s1 + $0xd0] sm:$0xf0] }
   0x5   :  { %298 = vmatpush.bf16.msra.mxu1 %v2163_v7  ;;  %327 = vmatpush.bf16.msra.mxu2 %v2167_v8  ;;  %v2143_v16 = vor.u32 %v2324_v13, %v2142_v11  ;;  %v2147_v17 = vor.u32 %v2322_v14, %v2144_v15  ;;  %v2150_v18 = vld [vmem:[%s4409_s1 + $0xc8] sm:$0xf]  ;;  %v2325_v19 = vld [vmem:[%s4409_s1 + $0xd4] sm:$0xf0]  ;;  %v2323_v20 = vld [vmem:[%s4409_s1 + $0xcc] sm:$0xf] }
   0x6   :  { %356 = vmatpush.bf16.msra.mxu3 %v2171_v12  ;;  %v2151_v21 = vor.u32 %v2325_v19, %v2150_v18  ;;  %v2152_v22 = vld [vmem:[%s4409_s1 + $0xd8] sm:$0xf0]  ;;  %v2126_v23 = vld [vmem:[%s4409_s1 + $0xa0] sm:$0xf]  ;;  %v2320_v24 = vld [vmem:[%s4409_s1 + $0xac] sm:$0xf0] }
   0x7   :  { %v2155_v25 = vor.u32 %v2323_v20, %v2152_v22  ;;  %v2318_v26 = vld [vmem:[%s4409_s1 + $0xa4] sm:$0xf]  ;;  %v2128_v27 = vld [vmem:[%s4409_s1 + $0xb0] sm:$0xf0]  ;;  %v2134_v28 = vld [vmem:[%s4409_s1 + $0xa8] sm:$0xf]  ;;  %v2127_v29 = vor.u32 %v2320_v24, %v2126_v23 }
   0x8   :  { %270 = vmatpush.bf16.msra.mxu0 %v2143_v16  ;;  %v2321_v30 = vld [vmem:[%s4409_s1 + $0xb4] sm:$0xf0]  ;;  %v2319_v31 = vld [vmem:[%s4409_s1 + $0xac] sm:$0xf]  ;;  %v2136_v32 = vld [vmem:[%s4409_s1 + $0xb8] sm:$0xf0]  ;;  %v2131_v33 = vor.u32 %v2318_v26, %v2128_v27 }
   0x9   :  { %299 = vmatpush.bf16.msra.mxu1 %v2147_v17  ;;  %328 = vmatpush.bf16.msra.mxu2 %v2151_v21  ;;  %v2135_v34 = vor.u32 %v2321_v30, %v2134_v28  ;;  %v2110_v35 = vld [vmem:[%s4409_s1 + $0x80] sm:$0xf]  ;;  %v2316_v36 = vld [vmem:[%s4409_s1 + $0x8c] sm:$0xf0]  ;;  %v2314_v37 = vld [vmem:[%s4409_s1 + $0x84] sm:$0xf]  ;;  %v2139_v38 = vor.u32 %v2319_v31, %v2136_v32 }
   0xa   :  { %357 = vmatpush.bf16.msra.mxu3 %v2155_v25  ;;  %v2112_v39 = vld [vmem:[%s4409_s1 + $0x90] sm:$0xf0]  ;;  %v2118_v40 = vld [vmem:[%s4409_s1 + $0x88] sm:$0xf]  ;;  %v2317_v41 = vld [vmem:[%s4409_s1 + $0x94] sm:$0xf0]  ;;  %v2111_v44 = vor.u32 %v2316_v36, %v2110_v35 }
   0xb   :  { %v2315_v42 = vld [vmem:[%s4409_s1 + $0x8c] sm:$0xf]  ;;  %v2120_v43 = vld [vmem:[%s4409_s1 + $0x98] sm:$0xf0]  ;;  %v2115_v45 = vor.u32 %v2314_v37, %v2112_v39  ;;  %v2119_v46 = vor.u32 %v2317_v41, %v2118_v40  ;;  %v2094_v47 = vld [vmem:[%s4409_s1 + $0x60] sm:$0xf] }
   0xc   :  { %271 = vmatpush.bf16.msra.mxu0 %v2127_v29  ;;  %v2312_v48 = vld [vmem:[%s4409_s1 + $0x6c] sm:$0xf0]  ;;  %v2310_v49 = vld [vmem:[%s4409_s1 + $0x64] sm:$0xf]  ;;  %v2123_v50 = vor.u32 %v2315_v42, %v2120_v43  ;;  %v2096_v51 = vld [vmem:[%s4409_s1 + $0x70] sm:$0xf0] }
   0xd   :  { %300 = vmatpush.bf16.msra.mxu1 %v2131_v33  ;;  %329 = vmatpush.bf16.msra.mxu2 %v2135_v34  ;;  %v2102_v52 = vld [vmem:[%s4409_s1 + $0x68] sm:$0xf]  ;;  %v2313_v53 = vld [vmem:[%s4409_s1 + $0x74] sm:$0xf0]  ;;  %v2311_v54 = vld [vmem:[%s4409_s1 + $0x6c] sm:$0xf]  ;;  %v2095_v56 = vor.u32 %v2312_v48, %v2094_v47  ;;  %v2099_v57 = vor.u32 %v2310_v49, %v2096_v51 }
   0xe   :  { %358 = vmatpush.bf16.msra.mxu3 %v2139_v38  ;;  %v2104_v55 = vld [vmem:[%s4409_s1 + $0x78] sm:$0xf0]  ;;  %v2103_v58 = vor.u32 %v2313_v53, %v2102_v52  ;;  %v2078_v59 = vld [vmem:[%s4409_s1 + $0x40] sm:$0xf]  ;;  %v2308_v60 = vld [vmem:[%s4409_s1 + $0x4c] sm:$0xf0] }
   0xf   :  { %v2306_v61 = vld [vmem:[%s4409_s1 + $0x44] sm:$0xf]  ;;  %v2107_v62 = vor.u32 %v2311_v54, %v2104_v55  ;;  %v2080_v63 = vld [vmem:[%s4409_s1 + $0x50] sm:$0xf0]  ;;  %v2086_v0 = vld [vmem:[%s4409_s1 + $0x48] sm:$0xf]  ;;  %v2079_v4 = vor.u32 %v2308_v60, %v2078_v59 }
  0x10   :  { %272 = vmatpush.bf16.msra.mxu0 %v2111_v44  ;;  %v2309_v1 = vld [vmem:[%s4409_s1 + $0x54] sm:$0xf0]  ;;  %v2307_v2 = vld [vmem:[%s4409_s1 + $0x4c] sm:$0xf]  ;;  %v2088_v3 = vld [vmem:[%s4409_s1 + $0x58] sm:$0xf0]  ;;  %v2083_v5 = vor.u32 %v2306_v61, %v2080_v63 }
  0x11   :  { %301 = vmatpush.bf16.msra.mxu1 %v2115_v45  ;;  %330 = vmatpush.bf16.msra.mxu2 %v2119_v46  ;;  %v2087_v6 = vor.u32 %v2309_v1, %v2086_v0  ;;  %v2062_v7 = vld [vmem:[%s4409_s1 + $0x20] sm:$0xf]  ;;  %v2304_v8 = vld [vmem:[%s4409_s1 + $0x2c] sm:$0xf0]  ;;  %v2302_v9 = vld [vmem:[%s4409_s1 + $0x24] sm:$0xf]  ;;  %v2091_v10 = vor.u32 %v2307_v2, %v2088_v3 }
  0x12   :  { %359 = vmatpush.bf16.msra.mxu3 %v2123_v50  ;;  %v2064_v11 = vld [vmem:[%s4409_s1 + $0x30] sm:$0xf0]  ;;  %v2070_v12 = vld [vmem:[%s4409_s1 + $0x28] sm:$0xf]  ;;  %v2305_v13 = vld [vmem:[%s4409_s1 + $0x34] sm:$0xf0]  ;;  %v2063_v16 = vor.u32 %v2304_v8, %v2062_v7 }
  0x13   :  { %v2303_v14 = vld [vmem:[%s4409_s1 + $0x2c] sm:$0xf]  ;;  %v2072_v15 = vld [vmem:[%s4409_s1 + $0x38] sm:$0xf0]  ;;  %v2067_v17 = vor.u32 %v2302_v9, %v2064_v11  ;;  %v2071_v18 = vor.u32 %v2305_v13, %v2070_v12  ;;  %v2046_v19 = vld [vmem:[%s4409_s1] sm:$0xf] }
  0x14   :  { %273 = vmatpush.bf16.msra.mxu0 %v2095_v56  ;;  %v2300_v20 = vld [vmem:[%s4409_s1 + $0xc] sm:$0xf0]  ;;  %v2298_v21 = vld [vmem:[%s4409_s1 + $0x4] sm:$0xf]  ;;  %v2075_v22 = vor.u32 %v2303_v14, %v2072_v15  ;;  %v2048_v23 = vld [vmem:[%s4409_s1 + $0x10] sm:$0xf0] }
  0x15   :  { %302 = vmatpush.bf16.msra.mxu1 %v2099_v57  ;;  %331 = vmatpush.bf16.msra.mxu2 %v2103_v58  ;;  %v2054_v24 = vld [vmem:[%s4409_s1 + $0x8] sm:$0xf]  ;;  %v2301_v25 = vld [vmem:[%s4409_s1 + $0x14] sm:$0xf0]  ;;  %v2299_v26 = vld [vmem:[%s4409_s1 + $0xc] sm:$0xf]  ;;  %v2047_v28 = vor.u32 %v2300_v20, %v2046_v19  ;;  %v2051_v29 = vor.u32 %v2298_v21, %v2048_v23 }
  0x16   :  { %360 = vmatpush.bf16.msra.mxu3 %v2107_v62  ;;  %v2056_v27 = vld [vmem:[%s4409_s1 + $0x18] sm:$0xf0]  ;;  %v2055_v30 = vor.u32 %v2301_v25, %v2054_v24  ;;  %v2294_v32 = vld [vmem:[%s4410_s0] sm:$0xff]  ;;  %v2809_v34 = vld [vmem:[%s4411_s2 + $0x1e8] sm:$0xff] }
  0x17   :  { %v2059_v31 = vor.u32 %v2299_v26, %v2056_v27  ;;  %v2804_v33 = vld [vmem:[%s4411_s2 + $0x1e0] sm:$0xff]  ;;  %v2821_v36 = vld [vmem:[%s4411_s2 + $0x1c8] sm:$0xff]  ;;  %v2826_v37 = vld [vmem:[%s4411_s2 + $0x1f8] sm:$0xff] }
  0x18   :  { %274 = vmatpush.bf16.msra.mxu0 %v2079_v4  ;;  %v2815_v35 = vld [vmem:[%s4411_s2 + $0x1c0] sm:$0xff]  ;;  %v2836_v39 = vld [vmem:[%s4411_s2 + $0x1f0] sm:$0xff]  ;;  %v2842_v40 = vld [vmem:[%s4411_s2 + $0x1a8] sm:$0xff] }
  0x19   :  { %303 = vmatpush.bf16.msra.mxu1 %v2083_v5  ;;  %332 = vmatpush.bf16.msra.mxu2 %v2087_v6  ;;  %v2831_v38 = vld [vmem:[%s4411_s2 + $0x1a0] sm:$0xff]  ;;  %v2847_v41 = vld [vmem:[%s4411_s2 + $0x1d8] sm:$0xff]  ;;  %v2859_v43 = vld [vmem:[%s4411_s2 + $0x1d0] sm:$0xff] }
  0x1a   :  { %361 = vmatpush.bf16.msra.mxu3 %v2091_v10  ;;  %v2854_v42 = vld [vmem:[%s4411_s2 + $0x180] sm:$0xff]  ;;  %v2865_v44 = vld [vmem:[%s4411_s2 + $0x188] sm:$0xff]  ;;  %v2870_v45 = vld [vmem:[%s4411_s2 + $0x1b8] sm:$0xff] }
  0x1b   :  { %v2878_v46 = vld [vmem:[%s4411_s2 + $0x160] sm:$0xff]  ;;  %v2883_v47 = vld [vmem:[%s4411_s2 + $0x1b0] sm:$0xff]  ;;  %v2889_v48 = vld [vmem:[%s4411_s2 + $0x168] sm:$0xff] }
  0x1c   :  { %275 = vmatpush.bf16.msra.mxu0 %v2063_v16  ;;  %v2894_v49 = vld [vmem:[%s4411_s2 + $0x198] sm:$0xff]  ;;  %v2902_v50 = vld [vmem:[%s4411_s2 + $0x140] sm:$0xff]  ;;  %v2907_v51 = vld [vmem:[%s4411_s2 + $0x190] sm:$0xff] }
  0x1d   :  { %304 = vmatpush.bf16.msra.mxu1 %v2067_v17  ;;  %333 = vmatpush.bf16.msra.mxu2 %v2071_v18  ;;  %v2913_v52 = vld [vmem:[%s4411_s2 + $0x148] sm:$0xff]  ;;  %v2918_v53 = vld [vmem:[%s4411_s2 + $0x178] sm:$0xff]  ;;  %v2926_v54 = vld [vmem:[%s4411_s2 + $0x120] sm:$0xff] }
  0x1e   :  { %362 = vmatpush.bf16.msra.mxu3 %v2075_v22  ;;  %v2931_v55 = vld [vmem:[%s4411_s2 + $0x170] sm:$0xff]  ;;  %v2937_v56 = vld [vmem:[%s4411_s2 + $0x128] sm:$0xff]  ;;  %v2942_v57 = vld [vmem:[%s4411_s2 + $0x158] sm:$0xff] }
  0x1f   :  { %v2950_v58 = vld [vmem:[%s4411_s2 + $0x100] sm:$0xff]  ;;  %v2955_v59 = vld [vmem:[%s4411_s2 + $0x150] sm:$0xff]  ;;  %v2295_v60 = vld [vmem:[%s4410_s0 + $0x8] sm:$0xff] }
  0x20   :  { %276 = vmatpush.bf16.msra.mxu0 %v2047_v28  ;;  %v2964_v61 = vld [vmem:[%s4411_s2 + $0x108] sm:$0xff]  ;;  %v2969_v62 = vld [vmem:[%s4411_s2 + $0x138] sm:$0xff]  ;;  %v2977_v63 = vld [vmem:[%s4411_s2 + $0x130] sm:$0xff] }
  0x21   :  { %305 = vmatpush.bf16.msra.mxu1 %v2051_v29  ;;  %334 = vmatpush.bf16.msra.mxu2 %v2055_v30  ;;  %v2986_v0 = vld [vmem:[%s4411_s2 + $0xe0] sm:$0xff]  ;;  %v2991_v1 = vld [vmem:[%s4411_s2 + $0xe8] sm:$0xff]  ;;  %v2996_v2 = vld [vmem:[%s4411_s2 + $0x118] sm:$0xff] }
  0x22   :  { %363 = vmatpush.bf16.msra.mxu3 %v2059_v31  ;;  %v3002_v3 = vld [vmem:[%s4411_s2 + $0xc0] sm:$0xff]  ;;  %v3007_v4 = vld [vmem:[%s4411_s2 + $0x110] sm:$0xff]  ;;  %v3013_v5 = vld [vmem:[%s4411_s2 + $0xc8] sm:$0xff] }
  0x23   :  { %277 = vmatmul.bf16.vlgmr.msra.gmra.mxu0 %v2294_v32  ;;  %v3018_v6 = vld [vmem:[%s4411_s2 + $0xf8] sm:$0xff]  ;;  %v3025_v7 = vld [vmem:[%s4411_s2 + $0xa0] sm:$0xff]  ;;  %v3030_v8 = vld [vmem:[%s4411_s2 + $0xf0] sm:$0xff] }
  0x24   :  { %487 = vmatpush.msrb.mxu0 %v2804_v33  ;;  %306 = vmatmul.bf16.vlgmr.msra.gmra.mxu1 %v2294_v32  ;;  %4510 = vst [vmem:[#allocation5_spill] sm:$0xff] %v3025_v7  ;;  %v3036_v9 = vld [vmem:[%s4411_s2 + $0xa8] sm:$0xff]  ;;  %v3041_v10 = vld [vmem:[%s4411_s2 + $0xd8] sm:$0xff]  ;;  %v3049_v11 = vld [vmem:[%s4411_s2 + $0x80] sm:$0xff] }
  0x25   :  { %507 = vmatpush.msrb.mxu1 %v2809_v34  ;;  %335 = vmatmul.bf16.vlgmr.msra.gmra.mxu2 %v2294_v32  ;;  %4511 = vst [vmem:[#allocation6_spill] sm:$0xff] %v3036_v9  ;;  %v3054_v12 = vld [vmem:[%s4411_s2 + $0xd0] sm:$0xff]  ;;  %v3060_v13 = vld [vmem:[%s4411_s2 + $0x88] sm:$0xff]  ;;  %v3065_v14 = vld [vmem:[%s4411_s2 + $0xb8] sm:$0xff] }
  0x26   :  { %364 = vmatmul.bf16.vlgmr.msra.gmra.mxu3 %v2294_v32  ;;  %488 = vmatpush.msrb.mxu0 %v2815_v35  ;;  %4512 = vst [vmem:[#allocation7_spill] sm:$0xff] %v3041_v10  ;;  %v3073_v15 = vld [vmem:[%s4411_s2 + $0x60] sm:$0xff]  ;;  %v3078_v16 = vld [vmem:[%s4411_s2 + $0xb0] sm:$0xff]  ;;  %v3084_v17 = vld [vmem:[%s4411_s2 + $0x68] sm:$0xff] }
  0x27   :  { %508 = vmatpush.msrb.mxu1 %v2821_v36  ;;  %547 = vmatpush.msrb.mxu3 %v2826_v37  ;;  %4513 = vst [vmem:[#allocation8_spill] sm:$0xff] %v3049_v11  ;;  %v3089_v18 = vld [vmem:[%s4411_s2 + $0x98] sm:$0xff]  ;;  %v3097_v19 = vld [vmem:[%s4411_s2 + $0x40] sm:$0xff]  ;;  %v3102_v20 = vld [vmem:[%s4411_s2 + $0x90] sm:$0xff] }
  0x28   :  { %489 = vmatpush.msrb.mxu0 %v2831_v38  ;;  %527 = vmatpush.msrb.mxu2 %v2836_v39  ;;  %4514 = vst [vmem:[#allocation9_spill] sm:$0xff] %v3060_v13  ;;  %v3108_v21 = vld [vmem:[%s4411_s2 + $0x48] sm:$0xff]  ;;  %v3114_v22 = vld [vmem:[%s4411_s2 + $0x78] sm:$0xff]  ;;  %v3121_v23 = vld [vmem:[%s4411_s2 + $0x20] sm:$0xff] }
  0x29   :  { %509 = vmatpush.msrb.mxu1 %v2842_v40  ;;  %548 = vmatpush.msrb.mxu3 %v2847_v41  ;;  %4515 = vst [vmem:[#allocation10_spill] sm:$0xff] %v3065_v14  ;;  %v3126_v24 = vld [vmem:[%s4411_s2 + $0x70] sm:$0xff]  ;;  %v3136_v26 = vld [vmem:[%s4411_s2 + $0x28] sm:$0xff]  ;;  %v3141_v27 = vld [vmem:[%s4411_s2 + $0x58] sm:$0xff] }
  0x2a   :  { %490 = vmatpush.msrb.mxu0 %v2854_v42  ;;  %528 = vmatpush.msrb.mxu2 %v2859_v43  ;;  %4516 = vst [vmem:[#allocation11_spill] sm:$0xff] %v3073_v15  ;;  %v2296_v25 = vld [vmem:[%s4410_s0 + $0x10] sm:$0xff]  ;;  %v3157_v29 = vld [vmem:[%s4411_s2] sm:$0xff]  ;;  %v3163_v30 = vld [vmem:[%s4411_s2 + $0x8] sm:$0xff] }
  0x2b   :  { %510 = vmatpush.msrb.mxu1 %v2865_v44  ;;  %549 = vmatpush.msrb.mxu3 %v2870_v45  ;;  %4517 = vst [vmem:[#allocation12_spill] sm:$0xff] %v3078_v16  ;;  %v3148_v28 = vld [vmem:[%s4411_s2 + $0x50] sm:$0xff]  ;;  %v3173_v32 = vld [vmem:[%s4411_s2 + $0x38] sm:$0xff] }
  0x2c   :  { %491 = vmatpush.msrb.mxu0 %v2878_v46  ;;  %529 = vmatpush.msrb.mxu2 %v2883_v47  ;;  %4518 = vst [vmem:[#allocation13_spill] sm:$0xff] %v3084_v17  ;;  %v3168_v31 = vld [vmem:[%s4411_s2 + $0x30] sm:$0xff] }
  0x2d   :  { %511 = vmatpush.msrb.mxu1 %v2889_v48  ;;  %550 = vmatpush.msrb.mxu3 %v2894_v49  ;;  %4519 = vst [vmem:[#allocation14_spill] sm:$0xff] %v3089_v18 }
  0x2e   :  { %492 = vmatpush.msrb.mxu0 %v2902_v50  ;;  %530 = vmatpush.msrb.mxu2 %v2907_v51  ;;  %4520 = vst [vmem:[#allocation15_spill] sm:$0xff] %v3097_v19 }
  0x2f   :  { %512 = vmatpush.msrb.mxu1 %v2913_v52  ;;  %551 = vmatpush.msrb.mxu3 %v2918_v53  ;;  %4521 = vst [vmem:[#allocation16_spill] sm:$0xff] %v3102_v20 }
  0x30   :  { %493 = vmatpush.msrb.mxu0 %v2926_v54  ;;  %531 = vmatpush.msrb.mxu2 %v2931_v55  ;;  %4522 = vst [vmem:[#allocation17_spill] sm:$0xff] %v3108_v21 }
  0x31   :  { %513 = vmatpush.msrb.mxu1 %v2937_v56  ;;  %552 = vmatpush.msrb.mxu3 %v2942_v57  ;;  %4523 = vst [vmem:[#allocation18_spill] sm:$0xff] %v3114_v22 }
  0x32   :  { %494 = vmatpush.msrb.mxu0 %v2950_v58  ;;  %532 = vmatpush.msrb.mxu2 %v2955_v59  ;;  %4524 = vst [vmem:[#allocation19_spill] sm:$0xff] %v3121_v23 }
  0x33   :  { %514 = vmatpush.msrb.mxu1 %v2964_v61  ;;  %553 = vmatpush.msrb.mxu3 %v2969_v62  ;;  %4525 = vst [vmem:[#allocation20_spill] sm:$0xff] %v3126_v24 }
  0x34   :  { %282 = vmatmul.bf16.gmra.mxu0 %v2295_v60  ;;  %533 = vmatpush.msrb.mxu2 %v2977_v63  ;;  %4526 = vst [vmem:[#allocation21_spill] sm:$0xff] %v3136_v26 }
  0x35   :  { %311 = vmatmul.bf16.gmra.mxu1 %v2295_v60  ;;  %340 = vmatmul.bf16.gmra.mxu2 %v2295_v60  ;;  %4527 = vst [vmem:[#allocation22_spill] sm:$0xff] %v3141_v27 }
  0x36   :  { %369 = vmatmul.bf16.gmra.mxu3 %v2295_v60  ;;  %495 = vmatpush.msrb.mxu0 %v2986_v0  ;;  %4528 = vst [vmem:[#allocation23_spill] sm:$0xff] %v3148_v28  ;;  %v3179_v60 = vld [vmem:[%s4411_s2 + $0x10] sm:$0xff] }
  0x37   :  { %515 = vmatpush.msrb.mxu1 %v2991_v1  ;;  %554 = vmatpush.msrb.mxu3 %v2996_v2  ;;  %4529 = vst [vmem:[#allocation24_spill] sm:$0xff] %v3157_v29 }
  0x38   :  { %496 = vmatpush.msrb.mxu0 %v3002_v3  ;;  %534 = vmatpush.msrb.mxu2 %v3007_v4  ;;  %4530 = vst [vmem:[#allocation25_spill] sm:$0xff] %v3163_v30 }
  0x39   :  { %516 = vmatpush.msrb.mxu1 %v3013_v5  ;;  %555 = vmatpush.msrb.mxu3 %v3018_v6  ;;  %4531 = vst [vmem:[#allocation26_spill] sm:$0xff] %v3168_v31 }
  0x3a   :  { %497 = vmatpush.msrb.mxu0 %v3025_v7  ;;  %535 = vmatpush.msrb.mxu2 %v3030_v8  ;;  %4532 = vst [vmem:[#allocation27_spill] sm:$0xff] %v3173_v32 }
  0x3b   :  { %517 = vmatpush.msrb.mxu1 %v3036_v9  ;;  %556 = vmatpush.msrb.mxu3 %v3041_v10  ;;  %4533 = vst [vmem:[#allocation28_spill] sm:$0xff] %v3179_v60 }
  0x3c   :  { %498 = vmatpush.msrb.mxu0 %v3049_v11  ;;  %536 = vmatpush.msrb.mxu2 %v3054_v12 }
  0x3d   :  { %518 = vmatpush.msrb.mxu1 %v3060_v13  ;;  %557 = vmatpush.msrb.mxu3 %v3065_v14 }
  0x3e   :  { %499 = vmatpush.msrb.mxu0 %v3073_v15  ;;  %537 = vmatpush.msrb.mxu2 %v3078_v16 }
  0x3f   :  { %519 = vmatpush.msrb.mxu1 %v3084_v17  ;;  %558 = vmatpush.msrb.mxu3 %v3089_v18 }
  0x40   :  { %500 = vmatpush.msrb.mxu0 %v3097_v19  ;;  %538 = vmatpush.msrb.mxu2 %v3102_v20 }
  0x41   :  { %520 = vmatpush.msrb.mxu1 %v3108_v21  ;;  %559 = vmatpush.msrb.mxu3 %v3114_v22 }
  0x42   :  { %501 = vmatpush.msrb.mxu0 %v3121_v23  ;;  %539 = vmatpush.msrb.mxu2 %v3126_v24 }
  0x43   :  { %521 = vmatpush.msrb.mxu1 %v3136_v26  ;;  %560 = vmatpush.msrb.mxu3 %v3141_v27  ;;  %v3186_v26 = vld [vmem:[%s4411_s2 + $0x18] sm:$0xff] }
  0x44   :  { %287 = vmatmul.bf16.gmra.mxu0 %v2296_v25  ;;  %540 = vmatpush.msrb.mxu2 %v3148_v28  ;;  %4534 = vst [vmem:[#allocation29_spill] sm:$0xff] %v3186_v26 }
  0x45   :  { %316 = vmatmul.bf16.gmra.mxu1 %v2296_v25  ;;  %345 = vmatmul.bf16.gmra.mxu2 %v2296_v25 }
  0x46   :  { %374 = vmatmul.bf16.gmra.mxu3 %v2296_v25  ;;  %502 = vmatpush.msrb.mxu0 %v3157_v29  ;;  %v2297_v25 = vld [vmem:[%s4410_s0 + $0x18] sm:$0xff] }
  0x47   :  { %522 = vmatpush.msrb.mxu1 %v3163_v30  ;;  %541 = vmatpush.msrb.mxu2 %v3168_v31 }
  0x48   :  { %561 = vmatpush.msrb.mxu3 %v3173_v32  ;;  %638 = vmatpush.msra.mxu0 %v2804_v33 }
  0x49   :  { %542 = vmatpush.msrb.mxu2 %v3179_v60  ;;  %658 = vmatpush.msra.mxu1 %v2809_v34 }
  0x4a   :  { %562 = vmatpush.msrb.mxu3 %v3186_v26  ;;  %639 = vmatpush.msra.mxu0 %v2815_v35 }
  0x4b   :  { %678 = vmatpush.msra.mxu2 %v2836_v39  ;;  %659 = vmatpush.msra.mxu1 %v2821_v36 }
  0x4c   :  { %698 = vmatpush.msra.mxu3 %v2826_v37  ;;  %640 = vmatpush.msra.mxu0 %v2831_v38 }
  0x4d   :  { %679 = vmatpush.msra.mxu2 %v2859_v43  ;;  %660 = vmatpush.msra.mxu1 %v2842_v40 }
  0x4e   :  { %699 = vmatpush.msra.mxu3 %v2847_v41  ;;  %641 = vmatpush.msra.mxu0 %v2854_v42 }
  0x4f   :  { %680 = vmatpush.msra.mxu2 %v2883_v47  ;;  %661 = vmatpush.msra.mxu1 %v2865_v44 }
  0x50   :  { %700 = vmatpush.msra.mxu3 %v2870_v45  ;;  %642 = vmatpush.msra.mxu0 %v2878_v46 }
  0x51   :  { %681 = vmatpush.msra.mxu2 %v2907_v51  ;;  %662 = vmatpush.msra.mxu1 %v2889_v48 }
  0x52   :  { %701 = vmatpush.msra.mxu3 %v2894_v49  ;;  %643 = vmatpush.msra.mxu0 %v2902_v50 }
  0x53   :  { %682 = vmatpush.msra.mxu2 %v2931_v55  ;;  %663 = vmatpush.msra.mxu1 %v2913_v52 }
  0x54   :  { %702 = vmatpush.msra.mxu3 %v2918_v53  ;;  %292 = vmatmul.bf16.gmra.mxu0 %v2297_v25 }
  0x55   :  { %321 = vmatmul.bf16.gmra.mxu1 %v2297_v25  ;;  %350 = vmatmul.bf16.gmra.mxu2 %v2297_v25 }
  0x56   :  { %379 = vmatmul.bf16.gmra.mxu3 %v2297_v25  ;;  %683 = vmatpush.msra.mxu2 %v2955_v59  ;;  %v2560_v25 = vmov 0.0  }
  0x57   :  { %703 = vmatpush.msra.mxu3 %v2942_v57  ;;  %644 = vmatpush.msra.mxu0 %v2926_v54 }
  0x58   :  { %664 = vmatpush.msra.mxu1 %v2937_v56  ;;  %684 = vmatpush.msra.mxu2 %v2977_v63 }
  0x59   :  { %704 = vmatpush.msra.mxu3 %v2969_v62  ;;  %645 = vmatpush.msra.mxu0 %v2950_v58 }
  0x5a   :  { %665 = vmatpush.msra.mxu1 %v2964_v61  ;;  %685 = vmatpush.msra.mxu2 %v3007_v4 }
  0x5b   :  { %705 = vmatpush.msra.mxu3 %v2996_v2  ;;  %646 = vmatpush.msra.mxu0 %v2986_v0 }
  0x5c   :  { %666 = vmatpush.msra.mxu1 %v2991_v1  ;;  %686 = vmatpush.msra.mxu2 %v3030_v8 }
  0x5d   :  { %706 = vmatpush.msra.mxu3 %v3018_v6  ;;  %647 = vmatpush.msra.mxu0 %v3002_v3 }
  0x5e   :  { %667 = vmatpush.msra.mxu1 %v3013_v5  ;;  %687 = vmatpush.msra.mxu2 %v3054_v12 }
  0x5f   :  { %707 = vmatpush.msra.mxu3 %v3041_v10  ;;  %648 = vmatpush.msra.mxu0 %v3025_v7 }
  0x60   :  { %668 = vmatpush.msra.mxu1 %v3036_v9  ;;  %688 = vmatpush.msra.mxu2 %v3078_v16 }
  0x61   :  { %708 = vmatpush.msra.mxu3 %v3065_v14  ;;  %649 = vmatpush.msra.mxu0 %v3049_v11 }
  0x62   :  { %669 = vmatpush.msra.mxu1 %v3060_v13  ;;  %689 = vmatpush.msra.mxu2 %v3102_v20 }
  0x63   :  { %709 = vmatpush.msra.mxu3 %v3089_v18  ;;  %650 = vmatpush.msra.mxu0 %v3073_v15  ;;  %v4535_v15 = vld [vmem:[#allocation21_spill] sm:$0xff] }
  0x64   :  { %503 = vmatmul.f32.vlgmr.msrb.gmra.mxu0 %v2560_v25  ;;  %670 = vmatpush.msra.mxu1 %v3084_v17 }
  0x65   :  { %523 = vmatmul.f32.vlgmr.msrb.gmra.mxu1 %v2560_v25  ;;  %543 = vmatmul.f32.vlgmr.msrb.gmra.mxu2 %v2560_v25 }
  0x66   :  { %563 = vmatmul.f32.vlgmr.msrb.gmra.mxu3 %v2560_v25  ;;  %690 = vmatpush.msra.mxu2 %v3126_v24  ;;  %v4536_v25 = vld [vmem:[#allocation11_spill] sm:$0xff] }
  0x67   :  { %710 = vmatpush.msra.mxu3 %v3114_v22  ;;  %651 = vmatpush.msra.mxu0 %v3097_v19 }
  0x68   :  { %671 = vmatpush.msra.mxu1 %v3108_v21  ;;  %691 = vmatpush.msra.mxu2 %v3148_v28 }
  0x69   :  { %711 = vmatpush.msra.mxu3 %v3141_v27  ;;  %652 = vmatpush.msra.mxu0 %v3121_v23 }
  0x6a   :  { %672 = vmatpush.msra.mxu1 %v4535_v15  ;;  %692 = vmatpush.msra.mxu2 %v3168_v31 }
  0x6b   :  { %712 = vmatpush.msra.mxu3 %v3173_v32  ;;  %653 = vmatpush.msra.mxu0 %v3157_v29 }
  0x6c   :  { %673 = vmatpush.msra.mxu1 %v3163_v30  ;;  %693 = vmatpush.msra.mxu2 %v3179_v60 }
  0x6d   :  { %713 = vmatpush.msra.mxu3 %v3186_v26  ;;  %789 = vmatpush.msrb.mxu0 %v2804_v33 }
  0x6e   :  { %809 = vmatpush.msrb.mxu1 %v2809_v34  ;;  %829 = vmatpush.msrb.mxu2 %v2836_v39 }
  0x6f   :  { %849 = vmatpush.msrb.mxu3 %v2826_v37  ;;  %790 = vmatpush.msrb.mxu0 %v2815_v35 }
  0x70   :  { %810 = vmatpush.msrb.mxu1 %v2821_v36  ;;  %830 = vmatpush.msrb.mxu2 %v2859_v43 }
  0x71   :  { %850 = vmatpush.msrb.mxu3 %v2847_v41  ;;  %791 = vmatpush.msrb.mxu0 %v2831_v38 }
  0x72   :  { %811 = vmatpush.msrb.mxu1 %v2842_v40  ;;  %831 = vmatpush.msrb.mxu2 %v2883_v47 }
  0x73   :  { %851 = vmatpush.msrb.mxu3 %v2870_v45  ;;  %792 = vmatpush.msrb.mxu0 %v2854_v42 }
  0x74   :  { %812 = vmatpush.msrb.mxu1 %v2865_v44  ;;  %832 = vmatpush.msrb.mxu2 %v2907_v51 }
  0x75   :  { %852 = vmatpush.msrb.mxu3 %v2894_v49  ;;  %793 = vmatpush.msrb.mxu0 %v2878_v46 }
  0x76   :  { %813 = vmatpush.msrb.mxu1 %v2889_v48  ;;  %833 = vmatpush.msrb.mxu2 %v2931_v55 }
  0x77   :  { %853 = vmatpush.msrb.mxu3 %v2918_v53  ;;  %794 = vmatpush.msrb.mxu0 %v2902_v50 }
  0x78   :  { %814 = vmatpush.msrb.mxu1 %v2913_v52  ;;  %834 = vmatpush.msrb.mxu2 %v2955_v59 }
  0x79   :  { %854 = vmatpush.msrb.mxu3 %v2942_v57  ;;  %795 = vmatpush.msrb.mxu0 %v2926_v54 }
  0x7a   :  { %815 = vmatpush.msrb.mxu1 %v2937_v56  ;;  %835 = vmatpush.msrb.mxu2 %v2977_v63 }
  0x7b   :  { %855 = vmatpush.msrb.mxu3 %v2969_v62  ;;  %796 = vmatpush.msrb.mxu0 %v2950_v58 }
  0x7c   :  { %816 = vmatpush.msrb.mxu1 %v2964_v61  ;;  %836 = vmatpush.msrb.mxu2 %v3007_v4 }
  0x7d   :  { %856 = vmatpush.msrb.mxu3 %v2996_v2  ;;  %797 = vmatpush.msrb.mxu0 %v2986_v0 }
  0x7e   :  { %817 = vmatpush.msrb.mxu1 %v2991_v1  ;;  %837 = vmatpush.msrb.mxu2 %v3030_v8 }
  0x7f   :  { %857 = vmatpush.msrb.mxu3 %v3018_v6  ;;  %798 = vmatpush.msrb.mxu0 %v3002_v3 }
  0x80   :  { %818 = vmatpush.msrb.mxu1 %v3013_v5  ;;  %838 = vmatpush.msrb.mxu2 %v3054_v12 }
  0x81   :  { %858 = vmatpush.msrb.mxu3 %v3041_v10  ;;  %799 = vmatpush.msrb.mxu0 %v3025_v7 }
  0x82   :  { %819 = vmatpush.msrb.mxu1 %v3036_v9  ;;  %839 = vmatpush.msrb.mxu2 %v3078_v16 }
  0x83   :  { %859 = vmatpush.msrb.mxu3 %v3065_v14  ;;  %800 = vmatpush.msrb.mxu0 %v3049_v11 }
  0x84   :  { %820 = vmatpush.msrb.mxu1 %v3060_v13  ;;  %840 = vmatpush.msrb.mxu2 %v3102_v20 }
  0x85   :  { %860 = vmatpush.msrb.mxu3 %v3089_v18  ;;  %801 = vmatpush.msrb.mxu0 %v4536_v25 }
  0x86   :  { %821 = vmatpush.msrb.mxu1 %v3084_v17  ;;  %841 = vmatpush.msrb.mxu2 %v3126_v24 }
  0x87   :  { %861 = vmatpush.msrb.mxu3 %v3114_v22  ;;  %802 = vmatpush.msrb.mxu0 %v3097_v19 }
  0x88   :  { %822 = vmatpush.msrb.mxu1 %v3108_v21  ;;  %842 = vmatpush.msrb.mxu2 %v3148_v28 }
  0x89   :  { %862 = vmatpush.msrb.mxu3 %v3141_v27  ;;  %803 = vmatpush.msrb.mxu0 %v3121_v23  ;;  %v75_v23 = vld [vmem:[%s4412_s3] sm:$0xf] }
  0x8a   :  { %823 = vmatpush.msrb.mxu1 %v4535_v15  ;;  %843 = vmatpush.msrb.mxu2 %v3168_v31  ;;  %v77_v27 = vperm.slane %v75_v23, 0  ;;  %v78_v31 = vperm.slane %v75_v23, 1 }
  0x8b   :  { %863 = vmatpush.msrb.mxu3 %v3173_v32  ;;  %804 = vmatpush.msrb.mxu0 %v3157_v29 }
  0x8c   :  { %824 = vmatpush.msrb.mxu1 %v3163_v30  ;;  %844 = vmatpush.msrb.mxu2 %v3179_v60  ;;  %v3333_v60 = vperm.slane %v75_v23, 2 }
  0x8d   :  { %864 = vmatpush.msrb.mxu3 %v3186_v26  ;;  %v3335_v26 = vperm.slane %v75_v23, 3 }
  0xa0   :  { %v278_v21 = vpop.f32.mrf.mxu0 }
  0xa1   :  { %v307_v28 = vpop.f32.mrf.mxu1 }
  0xa8   :  { %v3325_v15 = vpop.f32.mrf.mxu2  ;;  %v280_v32 = vpop.f32.mrf.mxu0 }
  0xa9   :  { %v3327_v19 = vpop.f32.mrf.mxu3  ;;  %v3329_v29 = vadd.f32 %v280_v32, %v77_v27  ;;  %v309_v30 = vpop.f32.mrf.mxu1 }
  0xaa   :  { %v3331_v22 = vadd.f32 %v309_v30, %v78_v31 }
  0xab   :  { %4537 = vst [vmem:[#allocation30_spill] sm:$0xff] %v3329_v29 }
  0xac   :  { %4538 = vst [vmem:[#allocation31_spill] sm:$0xff] %v3331_v22 }
  0xb0   :  { %v338_v24 = vpop.f32.mrf.mxu2 }
  0xb1   :  { %v3338_v17 = vadd.f32 %v338_v24, %v3333_v60  ;;  %v367_v25 = vpop.f32.mrf.mxu3  ;;  %v283_v18 = vpop.f32.mrf.mxu0 }
  0xb2   :  { %v3341_v20 = vadd.f32 %v367_v25, %v3335_v26  ;;  %v3343_v13 = vadd.f32 %v283_v18, %v77_v27  ;;  %v312_v32 = vpop.f32.mrf.mxu1 }
  0xb3   :  { %4539 = vst [vmem:[#allocation32_spill] sm:$0xff] %v3338_v17  ;;  %v3345_v29 = vadd.f32 %v312_v32, %v78_v31 }
  0xb4   :  { %4540 = vst [vmem:[#allocation33_spill] sm:$0xff] %v3341_v20 }
  0xb5   :  { %4541 = vst [vmem:[#allocation34_spill] sm:$0xff] %v3343_v13 }
  0xb6   :  { %4542 = vst [vmem:[#allocation35_spill] sm:$0xff] %v3345_v29 }
  0xb8   :  { %v341_v30 = vpop.f32.mrf.mxu2 }
  0xb9   :  { %v3348_v22 = vadd.f32 %v341_v30, %v3333_v60  ;;  %v370_v23 = vpop.f32.mrf.mxu3  ;;  %v285_v11 = vpop.f32.mrf.mxu0 }
  0xba   :  { %v3351_v14 = vadd.f32 %v370_v23, %v3335_v26  ;;  %v3353_v24 = vadd.f32 %v285_v11, %v77_v27  ;;  %v314_v17 = vpop.f32.mrf.mxu1 }
  0xbb   :  { %4543 = vst [vmem:[#allocation36_spill] sm:$0xff] %v3348_v22  ;;  %v3355_v16 = vadd.f32 %v314_v17, %v78_v31 }
  0xbc   :  { %4544 = vst [vmem:[#allocation37_spill] sm:$0xff] %v3351_v14 }
  0xbd   :  { %4545 = vst [vmem:[#allocation38_spill] sm:$0xff] %v3353_v24 }
  0xbe   :  { %4546 = vst [vmem:[#allocation39_spill] sm:$0xff] %v3355_v16 }
  0xc0   :  { %v343_v25 = vpop.f32.mrf.mxu2 }
  0xc1   :  { %v3358_v18 = vadd.f32 %v343_v25, %v3333_v60  ;;  %v372_v32 = vpop.f32.mrf.mxu3  ;;  %v288_v29 = vpop.f32.mrf.mxu0 }
  0xc2   :  { %v3361_v13 = vadd.f32 %v372_v32, %v3335_v26  ;;  %v3363_v30 = vadd.f32 %v288_v29, %v77_v27  ;;  %v317_v22 = vpop.f32.mrf.mxu1 }
  0xc3   :  { %4547 = vst [vmem:[#allocation40_spill] sm:$0xff] %v3358_v18  ;;  %v3365_v20 = vadd.f32 %v317_v22, %v78_v31 }
  0xc4   :  { %4548 = vst [vmem:[#allocation41_spill] sm:$0xff] %v3361_v13 }
  0xc5   :  { %4549 = vst [vmem:[#allocation42_spill] sm:$0xff] %v3363_v30 }
  0xc6   :  { %4550 = vst [vmem:[#allocation43_spill] sm:$0xff] %v3365_v20 }
  0xc8   :  { %v346_v23 = vpop.f32.mrf.mxu2 }
  0xc9   :  { %v3368_v11 = vadd.f32 %v346_v23, %v3333_v60  ;;  %v375_v17 = vpop.f32.mrf.mxu3  ;;  %v290_v16 = vpop.f32.mrf.mxu0 }
  0xca   :  { %v3371_v24 = vadd.f32 %v375_v17, %v3335_v26  ;;  %v3373_v25 = vadd.f32 %v290_v16, %v77_v27  ;;  %v319_v18 = vpop.f32.mrf.mxu1 }
  0xcb   :  { %4551 = vst [vmem:[#allocation44_spill] sm:$0xff] %v3368_v11  ;;  %v3375_v14 = vadd.f32 %v319_v18, %v78_v31 }
  0xcc   :  { %4552 = vst [vmem:[#allocation45_spill] sm:$0xff] %v3371_v24 }
  0xcd   :  { %4553 = vst [vmem:[#allocation46_spill] sm:$0xff] %v3373_v25 }
  0xce   :  { %4554 = vst [vmem:[#allocation47_spill] sm:$0xff] %v3375_v14 }
  0xd0   :  { %v348_v32 = vpop.f32.mrf.mxu2 }
  0xd1   :  { %v3378_v29 = vadd.f32 %v348_v32, %v3333_v60  ;;  %v377_v22 = vpop.f32.mrf.mxu3  ;;  %v293_v20 = vpop.f32.mrf.mxu0 }
  0xd2   :  { %v3381_v30 = vadd.f32 %v377_v22, %v3335_v26  ;;  %v3383_v23 = vadd.f32 %v293_v20, %v77_v27  ;;  %v322_v11 = vpop.f32.mrf.mxu1  ;;  %v279_v22 = vadd.f32 %v278_v21, %v77_v27  ;;  %v366_v21 = vadd.f32 %v3327_v19, %v3335_v26 }
  0xd3   :  { %4555 = vst [vmem:[#allocation48_spill] sm:$0xff] %v3378_v29  ;;  %v3385_v13 = vadd.f32 %v322_v11, %v78_v31 }
  0xd4   :  { %4556 = vst [vmem:[#allocation49_spill] sm:$0xff] %v3381_v30 }
  0xd5   :  { %4557 = vst [vmem:[#allocation50_spill] sm:$0xff] %v3383_v23  ;;  %v308_v23 = vadd.f32 %v307_v28, %v78_v31 }
  0xd6   :  { %4558 = vst [vmem:[#allocation51_spill] sm:$0xff] %v3385_v13 }
  0xd8   :  { %v351_v17 = vpop.f32.mrf.mxu2 }
  0xd9   :  { %v3388_v16 = vadd.f32 %v351_v17, %v3333_v60  ;;  %v380_v18 = vpop.f32.mrf.mxu3  ;;  %v295_v14 = vpop.f32.mrf.mxu0 }
  0xda   :  { %v3391_v25 = vadd.f32 %v380_v18, %v3335_v26  ;;  %v3393_v32 = vadd.f32 %v295_v14, %v77_v27  ;;  %v324_v29 = vpop.f32.mrf.mxu1 }
  0xdb   :  { %4559 = vst [vmem:[#allocation52_spill] sm:$0xff] %v3388_v16  ;;  %v3395_v24 = vadd.f32 %v324_v29, %v78_v31 }
  0xdc   :  { %4560 = vst [vmem:[#allocation53_spill] sm:$0xff] %v3391_v25 }
  0xdd   :  { %4561 = vst [vmem:[#allocation54_spill] sm:$0xff] %v3393_v32 }
  0xde   :  { %4562 = vst [vmem:[#allocation55_spill] sm:$0xff] %v3395_v24 }
  0xe0   :  { %v353_v20 = vpop.f32.mrf.mxu2 }
  0xe1   :  { %v3398_v11 = vadd.f32 %v353_v20, %v3333_v60  ;;  %v382_v13 = vpop.f32.mrf.mxu3  ;;  %v504_v30 = vpop.f32.mrf.mxu0 }
  0xe2   :  { %v3401_v17 = vadd.f32 %v382_v13, %v3335_v26  ;;  %v567_v16 = vadd.f32 %v504_v30, %v279_v22  ;;  %v524_v9 = vpop.f32.mrf.mxu1 }
  0xe3   :  { %4563 = vst [vmem:[#allocation56_spill] sm:$0xff] %v3398_v11  ;;  %v568_v18 = vadd.f32 %v524_v9, %v308_v23  ;;  %v337_v9 = vadd.f32 %v3325_v15, %v3333_v60 }
  0xe4   :  { %4564 = vst [vmem:[#allocation57_spill] sm:$0xff] %v3401_v17  ;;  %v2172_v25 = vmul.f32 -1.442695, %v567_v16 }
  0xe5   :  { %v2173_v14 = vmul.f32 -1.442695, %v568_v18 }
  0xe6   :  { %2356 = vpow2.f32 %v2172_v25 }
  0xe7   :  { %2358 = vpow2.f32 %v2173_v14 }
  0xe8   :  { %v544_v13 = vpop.f32.mrf.mxu2 }
  0xe9   :  { %v564_v27 = vpop.f32.mrf.mxu3  ;;  %v569_v23 = vadd.f32 %v544_v13, %v337_v9 }
  0xea   :  { %v570_v28 = vadd.f32 %v564_v27, %v366_v21 }
  0xec   :  { %v2357_v31 = vpop.eup %2356  ;;  %v2174_v29 = vmul.f32 -1.442695, %v570_v28 }
  0xed   :  { %v2359_v20 = vpop.eup %2358  ;;  %v574_v11 = vadd.f32 1.0, %v2357_v31 }
  0xee   :  { %v593_v24 = vadd.f32 1.0, %v2359_v20  ;;  %2360 = vpow2.f32 %v2174_v29 }
  0xef   :  { %2362 = vrcp.f32 %v574_v11  ;;  %v586_v21 = vand.u32 2147483648, %v574_v11  ;;  %v584_v31 = vand.u32 2147483647, %v574_v11  ;;  %vm580_vm2 = vweird.f32 %v574_v11 }
  0xf0   :  { %2364 = vrcp.f32 %v593_v24  ;;  %v605_v27 = vand.u32 2147483648, %v593_v24  ;;  %v603_v20 = vand.u32 2147483647, %v593_v24  ;;  %vm599_vm3 = vweird.f32 %v593_v24 }
  0xf1   :  { %v587_v13 = vor.u32 1.1754944e-38, %v586_v21  ;;  %vm585_vm5 = vcmp.eq.f32.partialorder %v584_v31, 8.507059e+37 }
  0xf2   :  { %vm604_vm7 = vcmp.eq.f32.partialorder %v603_v20, 8.507059e+37 }
  0xf4   :  { %v2361_v30 = vpop.eup %2360 }
  0xf5   :  { %v2363_v25 = vpop.eup %2362  ;;  %v613_v16 = vadd.f32 1.0, %v2361_v30  ;;  %v606_v30 = vor.u32 1.1754944e-38, %v605_v27 }
  0xf6   :  { %v2365_v22 = vpop.eup %2364  ;;  %v576_v19 = vmul.f32 %v2363_v25, %v574_v11  ;;  %vm581_vm0 = vweird.f32 %v2363_v25 }
  0xf7   :  { %v595_v26 = vmul.f32 %v2365_v22, %v593_v24  ;;  %2366 = vrcp.f32 %v613_v16  ;;  %vm600_vm1 = vweird.f32 %v2365_v22  ;;  %vm582_vm4 = vmor %vm580_vm2, %vm581_vm0  ;;  %v625_v21 = vand.u32 2147483648, %v613_v16 }
  0xf8   :  { %v577_v18 = vsub.f32 1.0, %v576_v19  ;;  %2368 = vtanh.f32 %v569_v23  ;;  %vm601_vm6 = vmor %vm599_vm3, %vm600_vm1  ;;  %vm619_vm9 = vweird.f32 %v613_v16 }
  0xf9   :  { %v596_v14 = vsub.f32 1.0, %v595_v26  ;;  %v626_v31 = vor.u32 1.1754944e-38, %v625_v21 }
  0xfa   :  { %v578_v28 = vmul.f32 %v2363_v25, %v577_v18 }
  0xfb   :  { %v597_v29 = vmul.f32 %v2365_v22, %v596_v14 }
  0xfc   :  { %v579_v15 = vadd.f32 %v2363_v25, %v578_v28 }
  0xfd   :  { %v2367_v60 = vpop.eup %2366  ;;  %v598_v9 = vadd.f32 %v2365_v22, %v597_v29 }
  0xfe   :  { %v583_v17 = vsel %vm582_vm4, %v2363_v25, %v579_v15  ;;  %v615_v19 = vmul.f32 %v2367_v60, %v613_v16  ;;  %v2369_v23 = vpop.eup %2368  ;;  %vm620_vm8 = vweird.f32 %v2367_v60  ;;  %v623_v25 = vand.u32 2147483647, %v613_v16 }
  0xff   :  { %v588_v26 = vsel %vm585_vm5, %v587_v13, %v583_v17  ;;  %v602_v18 = vsel %vm601_vm6, %v2365_v22, %v598_v9  ;;  %vm621_vm10 = vmor %vm619_vm9, %vm620_vm8 }
 0x100   :  { %v607_v32 = vsel %vm604_vm7, %v606_v30, %v602_v18  ;;  %v630_v14 = vmul.f32 %v2369_v23, %v588_v26  ;;  %v616_v7 = vsub.f32 1.0, %v615_v19  ;;  %vm624_vm11 = vcmp.eq.f32.partialorder %v623_v25, 8.507059e+37 }
 0x101   :  { %v629_v10 = vmul.f32 0.0, %v607_v32 }
 0x102   :  { %v617_v28 = vmul.f32 %v2367_v60, %v616_v7 }
 0x103   :  { %v3407_v11 = vadd.f32 %v630_v14, %v629_v10 }
 0x104   :  { %v618_v24 = vadd.f32 %v2367_v60, %v617_v28 }
 0x105   :  { %2370 = vtanh.f32 %v3407_v11 }
 0x106   :  { %v622_v27 = vsel %vm621_vm10, %v2367_v60, %v618_v24  ;;  %v4593_v60 = vld [vmem:[#allocation32_spill] sm:$0xff] }
 0x107   :  { %v627_v22 = vsel %vm624_vm11, %v626_v31, %v622_v27 }
 0x10b   :  { %v2371_v17 = vpop.eup %2370 }
 0x10c   :  { %v633_v29 = vmul.f32 %v2371_v17, %v627_v22 }
 0x10e   :  { %654 = vmatmul.f32.vlgmr.msra.gmra.mxu0 %v633_v29  ;;  %674 = vmatmul.f32.vlgmr.msra.gmra.mxu1 %v633_v29 }
 0x10f   :  { %694 = vmatmul.f32.vlgmr.msra.gmra.mxu2 %v633_v29  ;;  %714 = vmatmul.f32.vlgmr.msra.gmra.mxu3 %v633_v29 }
 0x110   :  { %940 = vmatpush.msra.mxu0 %v2804_v33  ;;  %960 = vmatpush.msra.mxu1 %v2809_v34  ;;  %v4565_v33 = vld [vmem:[#allocation7_spill] sm:$0xff]  ;;  %v4566_v34 = vld [vmem:[#allocation5_spill] sm:$0xff] }
 0x111   :  { %980 = vmatpush.msra.mxu2 %v2836_v39  ;;  %1000 = vmatpush.msra.mxu3 %v2826_v37  ;;  %v4569_v37 = vld [vmem:[#allocation10_spill] sm:$0xff]  ;;  %v4571_v39 = vld [vmem:[#allocation9_spill] sm:$0xff] }
 0x112   :  { %941 = vmatpush.msra.mxu0 %v2815_v35  ;;  %961 = vmatpush.msra.mxu1 %v2821_v36  ;;  %v4567_v35 = vld [vmem:[#allocation6_spill] sm:$0xff]  ;;  %v4568_v36 = vld [vmem:[#allocation12_spill] sm:$0xff] }
 0x113   :  { %981 = vmatpush.msra.mxu2 %v2859_v43  ;;  %1001 = vmatpush.msra.mxu3 %v2847_v41  ;;  %v4573_v41 = vld [vmem:[#allocation14_spill] sm:$0xff]  ;;  %v4575_v43 = vld [vmem:[#allocation13_spill] sm:$0xff] }
 0x114   :  { %942 = vmatpush.msra.mxu0 %v2831_v38  ;;  %962 = vmatpush.msra.mxu1 %v2842_v40  ;;  %v4570_v38 = vld [vmem:[#allocation8_spill] sm:$0xff] }
 0x115   :  { %982 = vmatpush.msra.mxu2 %v2883_v47  ;;  %1002 = vmatpush.msra.mxu3 %v2870_v45  ;;  %v4572_v40 = vld [vmem:[#allocation16_spill] sm:$0xff]  ;;  %v4577_v45 = vld [vmem:[#allocation18_spill] sm:$0xff]  ;;  %v4579_v47 = vld [vmem:[#allocation17_spill] sm:$0xff] }
 0x116   :  { %943 = vmatpush.msra.mxu0 %v2854_v42  ;;  %963 = vmatpush.msra.mxu1 %v2865_v44  ;;  %v4574_v42 = vld [vmem:[#allocation11_spill] sm:$0xff]  ;;  %v4576_v44 = vld [vmem:[#allocation20_spill] sm:$0xff] }
 0x117   :  { %983 = vmatpush.msra.mxu2 %v2907_v51  ;;  %1003 = vmatpush.msra.mxu3 %v2894_v49  ;;  %v4581_v49 = vld [vmem:[#allocation22_spill] sm:$0xff]  ;;  %v4583_v51 = vld [vmem:[#allocation21_spill] sm:$0xff] }
 0x118   :  { %944 = vmatpush.msra.mxu0 %v2878_v46  ;;  %964 = vmatpush.msra.mxu1 %v2889_v48  ;;  %v4578_v46 = vld [vmem:[#allocation15_spill] sm:$0xff] }
 0x119   :  { %984 = vmatpush.msra.mxu2 %v2931_v55  ;;  %1004 = vmatpush.msra.mxu3 %v2918_v53  ;;  %v4580_v48 = vld [vmem:[#allocation23_spill] sm:$0xff]  ;;  %v4587_v55 = vld [vmem:[#allocation25_spill] sm:$0xff] }
 0x11a   :  { %945 = vmatpush.msra.mxu0 %v2902_v50  ;;  %965 = vmatpush.msra.mxu1 %v2913_v52  ;;  %v4582_v50 = vld [vmem:[#allocation19_spill] sm:$0xff]  ;;  %v4584_v52 = vld [vmem:[#allocation26_spill] sm:$0xff] }
 0x11b   :  { %985 = vmatpush.msra.mxu2 %v2955_v59  ;;  %1005 = vmatpush.msra.mxu3 %v2942_v57  ;;  %v4585_v53 = vld [vmem:[#allocation27_spill] sm:$0xff]  ;;  %v4589_v57 = vld [vmem:[#allocation29_spill] sm:$0xff] }
 0x11c   :  { %946 = vmatpush.msra.mxu0 %v2926_v54  ;;  %966 = vmatpush.msra.mxu1 %v2937_v56  ;;  %v4586_v54 = vld [vmem:[#allocation24_spill] sm:$0xff] }
 0x11d   :  { %986 = vmatpush.msra.mxu2 %v2977_v63  ;;  %1006 = vmatpush.msra.mxu3 %v2969_v62  ;;  %v4588_v56 = vld [vmem:[#allocation28_spill] sm:$0xff]  ;;  %v4591_v63 = vld [vmem:[#allocation31_spill] sm:$0xff] }
 0x11e   :  { %947 = vmatpush.msra.mxu0 %v2950_v58  ;;  %967 = vmatpush.msra.mxu1 %v2964_v61  ;;  %v4590_v61 = vld [vmem:[#allocation30_spill] sm:$0xff] }
 0x11f   :  { %987 = vmatpush.msra.mxu2 %v3007_v4  ;;  %1007 = vmatpush.msra.mxu3 %v2996_v2  ;;  %v4592_v4 = vld [vmem:[#allocation33_spill] sm:$0xff] }
 0x120   :  { %948 = vmatpush.msra.mxu0 %v2986_v0  ;;  %968 = vmatpush.msra.mxu1 %v2991_v1 }
 0x121   :  { %988 = vmatpush.msra.mxu2 %v3030_v8  ;;  %1008 = vmatpush.msra.mxu3 %v3018_v6 }
 0x122   :  { %949 = vmatpush.msra.mxu0 %v3002_v3  ;;  %969 = vmatpush.msra.mxu1 %v3013_v5 }
 0x123   :  { %989 = vmatpush.msra.mxu2 %v3054_v12  ;;  %1009 = vmatpush.msra.mxu3 %v4565_v33 }
 0x124   :  { %950 = vmatpush.msra.mxu0 %v4566_v34  ;;  %970 = vmatpush.msra.mxu1 %v4567_v35 }
 0x125   :  { %990 = vmatpush.msra.mxu2 %v4568_v36  ;;  %1010 = vmatpush.msra.mxu3 %v4569_v37 }
 0x126   :  { %951 = vmatpush.msra.mxu0 %v4570_v38  ;;  %971 = vmatpush.msra.mxu1 %v4571_v39 }
 0x127   :  { %991 = vmatpush.msra.mxu2 %v4572_v40  ;;  %1011 = vmatpush.msra.mxu3 %v4573_v41 }
 0x128   :  { %952 = vmatpush.msra.mxu0 %v4574_v42  ;;  %972 = vmatpush.msra.mxu1 %v4575_v43 }
 0x129   :  { %992 = vmatpush.msra.mxu2 %v4576_v44  ;;  %1012 = vmatpush.msra.mxu3 %v4577_v45 }
 0x12a   :  { %953 = vmatpush.msra.mxu0 %v4578_v46  ;;  %973 = vmatpush.msra.mxu1 %v4579_v47 }
 0x12b   :  { %993 = vmatpush.msra.mxu2 %v4580_v48  ;;  %1013 = vmatpush.msra.mxu3 %v4581_v49 }
 0x12c   :  { %954 = vmatpush.msra.mxu0 %v4582_v50  ;;  %974 = vmatpush.msra.mxu1 %v4583_v51 }
 0x12d   :  { %994 = vmatpush.msra.mxu2 %v4584_v52  ;;  %1014 = vmatpush.msra.mxu3 %v4585_v53 }
 0x12e   :  { %955 = vmatpush.msra.mxu0 %v4586_v54  ;;  %975 = vmatpush.msra.mxu1 %v4587_v55 }
 0x12f   :  { %995 = vmatpush.msra.mxu2 %v4588_v56  ;;  %1015 = vmatpush.msra.mxu3 %v4589_v57 }
 0x18b   :  { %v655_v58 = vpop.f32.mrf.mxu0  ;;  %v675_v59 = vpop.f32.mrf.mxu1 }
 0x18c   :  { %v718_v62 = vadd.f32 %v655_v58, %v4590_v61  ;;  %v719_v0 = vadd.f32 %v675_v59, %v4591_v63 }
 0x18e   :  { %v2175_v1 = vmul.f32 -1.442695, %v718_v62  ;;  %v2176_v2 = vmul.f32 -1.442695, %v719_v0 }
 0x190   :  { %2372 = vpow2.f32 %v2175_v1  ;;  %v3491_v1 = vld [vmem:[%s4411_s2 + $0x1e8] sm:$0xff] }
 0x191   :  { %2374 = vpow2.f32 %v2176_v2  ;;  %v3497_v2 = vld [vmem:[%s4411_s2 + $0x1f0] sm:$0xff] }
 0x192   :  { %v715_v3 = vpop.f32.mrf.mxu3  ;;  %v695_v32 = vpop.f32.mrf.mxu2 }
 0x193   :  { %v721_v5 = vadd.f32 %v715_v3, %v4592_v4  ;;  %v720_v13 = vadd.f32 %v695_v32, %v4593_v60  ;;  %v3503_v3 = vld [vmem:[%s4411_s2 + $0x1f8] sm:$0xff]  ;;  %v3509_v4 = vld [vmem:[%s4411_s2 + $0x1c0] sm:$0xff] }
 0x194   :  { %v3551_v32 = vld [vmem:[%s4411_s2 + $0x1b8] sm:$0xff] }
 0x195   :  { %v2177_v6 = vmul.f32 -1.442695, %v721_v5  ;;  %v3515_v5 = vld [vmem:[%s4411_s2 + $0x1c8] sm:$0xff]  ;;  %v3575_v60 = vld [vmem:[%s4411_s2 + $0x198] sm:$0xff] }
 0x196   :  { %v2373_v7 = vpop.eup %2372 }
 0x197   :  { %v2375_v8 = vpop.eup %2374  ;;  %v725_v10 = vadd.f32 1.0, %v2373_v7  ;;  %2376 = vpow2.f32 %v2177_v6  ;;  %v3521_v6 = vld [vmem:[%s4411_s2 + $0x1d0] sm:$0xff]  ;;  %v3527_v7 = vld [vmem:[%s4411_s2 + $0x1d8] sm:$0xff] }
 0x198   :  { %v744_v12 = vadd.f32 1.0, %v2375_v8  ;;  %v3533_v8 = vld [vmem:[%s4411_s2 + $0x1a0] sm:$0xff] }
 0x199   :  { %2378 = vrcp.f32 %v725_v10  ;;  %v737_v18 = vand.u32 2147483648, %v725_v10  ;;  %v735_v24 = vand.u32 2147483647, %v725_v10  ;;  %vm731_vm14 = vweird.f32 %v725_v10 }
 0x19a   :  { %2380 = vrcp.f32 %v744_v12  ;;  %v756_v14 = vand.u32 2147483648, %v744_v12  ;;  %v754_v25 = vand.u32 2147483647, %v744_v12  ;;  %vm750_vm15 = vweird.f32 %v744_v12 }
 0x19b   :  { %v738_v17 = vor.u32 1.1754944e-38, %v737_v18  ;;  %vm736_vm2 = vcmp.eq.f32.partialorder %v735_v24, 8.507059e+37  ;;  %v3617_v18 = vld [vmem:[%s4411_s2 + $0x150] sm:$0xff]  ;;  %v3635_v24 = vld [vmem:[%s4411_s2 + $0x128] sm:$0xff] }
 0x19c   :  { %v757_v33 = vor.u32 1.1754944e-38, %v756_v14  ;;  %vm755_vm3 = vcmp.eq.f32.partialorder %v754_v25, 8.507059e+37  ;;  %v3623_v14 = vld [vmem:[%s4411_s2 + $0x158] sm:$0xff] }
 0x19d   :  { %v2377_v16 = vpop.eup %2376  ;;  %v3647_v25 = vld [vmem:[%s4411_s2 + $0x138] sm:$0xff] }
 0x19e   :  { %v764_v20 = vadd.f32 1.0, %v2377_v16  ;;  %v3557_v16 = vld [vmem:[%s4411_s2 + $0x180] sm:$0xff] }
 0x19f   :  { %v2379_v15 = vpop.eup %2378 }
 0x1a0   :  { %v2381_v9 = vpop.eup %2380  ;;  %v727_v30 = vmul.f32 %v2379_v15, %v725_v10  ;;  %2382 = vrcp.f32 %v764_v20  ;;  %vm732_vm12 = vweird.f32 %v2379_v15  ;;  %v776_v50 = vand.u32 2147483648, %v764_v20  ;;  %v3539_v10 = vld [vmem:[%s4411_s2 + $0x1a8] sm:$0xff] }
 0x1a1   :  { %v746_v19 = vmul.f32 %v2381_v9, %v744_v12  ;;  %2384 = vtanh.f32 %v720_v13  ;;  %vm751_vm13 = vweird.f32 %v2381_v9  ;;  %vm733_vm0 = vmor %vm731_vm14, %vm732_vm12  ;;  %vm770_vm5 = vweird.f32 %v764_v20  ;;  %v3545_v12 = vld [vmem:[%s4411_s2 + $0x1b0] sm:$0xff]  ;;  %v3581_v13 = vld [vmem:[%s4411_s2 + $0x160] sm:$0xff] }
 0x1a2   :  { %v728_v23 = vsub.f32 1.0, %v727_v30  ;;  %vm752_vm1 = vmor %vm750_vm15, %vm751_vm13  ;;  %v774_v58 = vand.u32 2147483647, %v764_v20  ;;  %v777_v61 = vor.u32 1.1754944e-38, %v776_v50  ;;  %v3593_v30 = vld [vmem:[%s4411_s2 + $0x170] sm:$0xff]  ;;  %v3749_v50 = vld [vmem:[%s4411_s2 + $0x80] sm:$0xff] }
 0x1a3   :  { %v747_v26 = vsub.f32 1.0, %v746_v19  ;;  %v3599_v19 = vld [vmem:[%s4411_s2 + $0x178] sm:$0xff]  ;;  %4601 = vst [vmem:[#allocation16_spill] sm:$0xff] %v3749_v50 }
 0x1a4   :  { %v729_v28 = vmul.f32 %v2379_v15, %v728_v23  ;;  %vm775_vm7 = vcmp.eq.f32.partialorder %v774_v58, 8.507059e+37  ;;  %v3605_v23 = vld [vmem:[%s4411_s2 + $0x140] sm:$0xff]  ;;  %v3755_v58 = vld [vmem:[%s4411_s2 + $0x88] sm:$0xff] }
 0x1a5   :  { %v748_v21 = vmul.f32 %v2381_v9, %v747_v26  ;;  %v3611_v26 = vld [vmem:[%s4411_s2 + $0x148] sm:$0xff]  ;;  %4602 = vst [vmem:[#allocation14_spill] sm:$0xff] %v3755_v58 }
 0x1a6   :  { %v2383_v27 = vpop.eup %2382  ;;  %v730_v31 = vadd.f32 %v2379_v15, %v729_v28  ;;  %v3629_v28 = vld [vmem:[%s4411_s2 + $0x120] sm:$0xff] }
 0x1a7   :  { %v749_v22 = vadd.f32 %v2381_v9, %v748_v21  ;;  %v766_v29 = vmul.f32 %v2383_v27, %v764_v20  ;;  %v2385_v35 = vpop.eup %2384  ;;  %vm771_vm4 = vweird.f32 %v2383_v27  ;;  %v3563_v20 = vld [vmem:[%s4411_s2 + $0x188] sm:$0xff]  ;;  %v3641_v21 = vld [vmem:[%s4411_s2 + $0x130] sm:$0xff] }
 0x1a8   :  { %v734_v34 = vsel %vm733_vm0, %v2379_v15, %v730_v31  ;;  %vm772_vm6 = vmor %vm770_vm5, %vm771_vm4  ;;  %v3569_v15 = vld [vmem:[%s4411_s2 + $0x190] sm:$0xff]  ;;  %v3659_v31 = vld [vmem:[%s4411_s2 + $0x108] sm:$0xff] }
 0x1a9   :  { %v739_v36 = vsel %vm736_vm2, %v738_v17, %v734_v34  ;;  %v753_v37 = vsel %vm752_vm1, %v2381_v9, %v749_v22  ;;  %v767_v38 = vsub.f32 1.0, %v766_v29  ;;  %v3587_v9 = vld [vmem:[%s4411_s2 + $0x168] sm:$0xff]  ;;  %v3665_v17 = vld [vmem:[%s4411_s2 + $0x110] sm:$0xff]  ;;  %v3671_v22 = vld [vmem:[%s4411_s2 + $0x118] sm:$0xff] }
 0x1aa   :  { %v758_v39 = vsel %vm755_vm3, %v757_v33, %v753_v37  ;;  %v781_v41 = vmul.f32 %v2385_v35, %v739_v36  ;;  %v3677_v29 = vld [vmem:[%s4411_s2 + $0xe0] sm:$0xff]  ;;  %v3683_v33 = vld [vmem:[%s4411_s2 + $0xe8] sm:$0xff]  ;;  %v3689_v34 = vld [vmem:[%s4411_s2 + $0xf0] sm:$0xff] }
 0x1ab   :  { %v780_v42 = vmul.f32 %v758_v39, %v3407_v11  ;;  %v768_v43 = vmul.f32 %v2383_v27, %v767_v38  ;;  %v3485_v11 = vld [vmem:[%s4411_s2 + $0x1e0] sm:$0xff]  ;;  %v3695_v35 = vld [vmem:[%s4411_s2 + $0xf8] sm:$0xff]  ;;  %v3707_v37 = vld [vmem:[%s4411_s2 + $0xc8] sm:$0xff] }
 0x1ac   :  { %v3701_v36 = vld [vmem:[%s4411_s2 + $0xc0] sm:$0xff]  ;;  %4594 = vst [vmem:[#allocation7_spill] sm:$0xff] %v3707_v37  ;;  %v3713_v38 = vld [vmem:[%s4411_s2 + $0xd0] sm:$0xff]  ;;  %v3719_v39 = vld [vmem:[%s4411_s2 + $0xd8] sm:$0xff] }
 0x1ad   :  { %v3479_v46 = vadd.f32 %v781_v41, %v780_v42  ;;  %v769_v47 = vadd.f32 %v2383_v27, %v768_v43  ;;  %4595 = vst [vmem:[#allocation5_spill] sm:$0xff] %v3713_v38  ;;  %v3725_v41 = vld [vmem:[%s4411_s2 + $0xa0] sm:$0xff]  ;;  %v3731_v42 = vld [vmem:[%s4411_s2 + $0xa8] sm:$0xff]  ;;  %v3737_v43 = vld [vmem:[%s4411_s2 + $0xb0] sm:$0xff] }
 0x1ae   :  { %4596 = vst [vmem:[#allocation6_spill] sm:$0xff] %v3719_v39 }
 0x1af   :  { %2386 = vtanh.f32 %v3479_v46  ;;  %v773_v59 = vsel %vm772_vm6, %v2383_v27, %v769_v47  ;;  %v3653_v27 = vld [vmem:[%s4411_s2 + $0x100] sm:$0xff]  ;;  %4597 = vst [vmem:[#allocation12_spill] sm:$0xff] %v3725_v41  ;;  %v3743_v47 = vld [vmem:[%s4411_s2 + $0xb8] sm:$0xff] }
 0x1b0   :  { %v778_v63 = vsel %vm775_vm7, %v777_v61, %v773_v59  ;;  %4598 = vst [vmem:[#allocation10_spill] sm:$0xff] %v3731_v42  ;;  %v3762_v59 = vld [vmem:[%s4411_s2 + $0x98] sm:$0xff]  ;;  %v3768_v61 = vld [vmem:[%s4411_s2 + $0x60] sm:$0xff] }
 0x1b1   :  { %4599 = vst [vmem:[#allocation8_spill] sm:$0xff] %v3737_v43 }
 0x1b2   :  { %4600 = vst [vmem:[#allocation9_spill] sm:$0xff] %v3743_v47 }
 0x1b3   :  { %4603 = vst [vmem:[#allocation11_spill] sm:$0xff] %v3762_v59 }
 0x1b4   :  { %4604 = vst [vmem:[#allocation13_spill] sm:$0xff] %v3768_v61 }
 0x1b5   :  { %v2387_v62 = vpop.eup %2386 }
 0x1b6   :  { %v784_v0 = vmul.f32 %v2387_v62, %v778_v63  ;;  %v3774_v62 = vld [vmem:[%s4411_s2 + $0x68] sm:$0xff] }
 0x1b7   :  { %4605 = vst [vmem:[#allocation20_spill] sm:$0xff] %v3774_v62  ;;  %v3788_v63 = vld [vmem:[%s4411_s2 + $0x48] sm:$0xff] }
 0x1b8   :  { %805 = vmatmul.f32.vlgmr.msrb.gmra.mxu0 %v784_v0  ;;  %825 = vmatmul.f32.vlgmr.msrb.gmra.mxu1 %v784_v0  ;;  %4607 = vst [vmem:[#allocation15_spill] sm:$0xff] %v3788_v63 }
 0x1b9   :  { %845 = vmatmul.f32.vlgmr.msrb.gmra.mxu2 %v784_v0  ;;  %865 = vmatmul.f32.vlgmr.msrb.gmra.mxu3 %v784_v0 }
 0x1ba   :  { %1091 = vmatpush.msrb.mxu0 %v3485_v11  ;;  %1111 = vmatpush.msrb.mxu1 %v3491_v1 }
 0x1bb   :  { %1131 = vmatpush.msrb.mxu2 %v3497_v2  ;;  %1151 = vmatpush.msrb.mxu3 %v3503_v3 }
 0x1bc   :  { %1092 = vmatpush.msrb.mxu0 %v3509_v4  ;;  %1112 = vmatpush.msrb.mxu1 %v3515_v5 }
 0x1bd   :  { %1132 = vmatpush.msrb.mxu2 %v3521_v6  ;;  %1152 = vmatpush.msrb.mxu3 %v3527_v7 }
 0x1be   :  { %1093 = vmatpush.msrb.mxu0 %v3533_v8  ;;  %1113 = vmatpush.msrb.mxu1 %v3539_v10 }
 0x1bf   :  { %1133 = vmatpush.msrb.mxu2 %v3545_v12  ;;  %1153 = vmatpush.msrb.mxu3 %v3551_v32 }
 0x1c0   :  { %1094 = vmatpush.msrb.mxu0 %v3557_v16  ;;  %1114 = vmatpush.msrb.mxu1 %v3563_v20 }
 0x1c1   :  { %1134 = vmatpush.msrb.mxu2 %v3569_v15  ;;  %1154 = vmatpush.msrb.mxu3 %v3575_v60 }
 0x1c2   :  { %1095 = vmatpush.msrb.mxu0 %v3581_v13  ;;  %1115 = vmatpush.msrb.mxu1 %v3587_v9 }
 0x1c3   :  { %1135 = vmatpush.msrb.mxu2 %v3593_v30  ;;  %1155 = vmatpush.msrb.mxu3 %v3599_v19 }
 0x1c4   :  { %1096 = vmatpush.msrb.mxu0 %v3605_v23  ;;  %1116 = vmatpush.msrb.mxu1 %v3611_v26 }
 0x1c5   :  { %1136 = vmatpush.msrb.mxu2 %v3617_v18  ;;  %1156 = vmatpush.msrb.mxu3 %v3623_v14 }
 0x1c6   :  { %1097 = vmatpush.msrb.mxu0 %v3629_v28  ;;  %1117 = vmatpush.msrb.mxu1 %v3635_v24 }
 0x1c7   :  { %1137 = vmatpush.msrb.mxu2 %v3641_v21  ;;  %1157 = vmatpush.msrb.mxu3 %v3647_v25 }
 0x1c8   :  { %1098 = vmatpush.msrb.mxu0 %v3653_v27  ;;  %1118 = vmatpush.msrb.mxu1 %v3659_v31 }
 0x1c9   :  { %1138 = vmatpush.msrb.mxu2 %v3665_v17  ;;  %1158 = vmatpush.msrb.mxu3 %v3671_v22 }
 0x1ca   :  { %1099 = vmatpush.msrb.mxu0 %v3677_v29  ;;  %1119 = vmatpush.msrb.mxu1 %v3683_v33 }
 0x1cb   :  { %1139 = vmatpush.msrb.mxu2 %v3689_v34  ;;  %1159 = vmatpush.msrb.mxu3 %v3695_v35 }
 0x1cc   :  { %1100 = vmatpush.msrb.mxu0 %v3701_v36  ;;  %1120 = vmatpush.msrb.mxu1 %v3707_v37 }
 0x1cd   :  { %1140 = vmatpush.msrb.mxu2 %v3713_v38  ;;  %1160 = vmatpush.msrb.mxu3 %v3719_v39 }
 0x1ce   :  { %1101 = vmatpush.msrb.mxu0 %v3725_v41  ;;  %1121 = vmatpush.msrb.mxu1 %v3731_v42 }
 0x1cf   :  { %1141 = vmatpush.msrb.mxu2 %v3737_v43  ;;  %1161 = vmatpush.msrb.mxu3 %v3743_v47 }
 0x1d0   :  { %1102 = vmatpush.msrb.mxu0 %v3749_v50  ;;  %1122 = vmatpush.msrb.mxu1 %v3755_v58 }
 0x1d1   :  { %1142 = vmatpush.msrb.mxu2 %v4572_v40  ;;  %1162 = vmatpush.msrb.mxu3 %v3762_v59  ;;  %v3782_v40 = vld [vmem:[%s4411_s2 + $0x40] sm:$0xff] }
 0x1d2   :  { %1103 = vmatpush.msrb.mxu0 %v3768_v61  ;;  %1123 = vmatpush.msrb.mxu1 %v3774_v62  ;;  %4606 = vst [vmem:[#allocation18_spill] sm:$0xff] %v3782_v40 }
 0x1d3   :  { %1143 = vmatpush.msrb.mxu2 %v4576_v44  ;;  %1163 = vmatpush.msrb.mxu3 %v4577_v45  ;;  %v3796_v44 = vld [vmem:[%s4411_s2 + $0x20] sm:$0xff] }
 0x1d4   :  { %1104 = vmatpush.msrb.mxu0 %v3782_v40  ;;  %1124 = vmatpush.msrb.mxu1 %v3788_v63  ;;  %4608 = vst [vmem:[#allocation17_spill] sm:$0xff] %v3796_v44  ;;  %v4610_v63 = vld [vmem:[#allocation35_spill] sm:$0xff] }
 0x1d5   :  { %1144 = vmatpush.msrb.mxu2 %v4580_v48  ;;  %1164 = vmatpush.msrb.mxu3 %v4581_v49  ;;  %v4609_v49 = vld [vmem:[#allocation34_spill] sm:$0xff] }
 0x1d6   :  { %1105 = vmatpush.msrb.mxu0 %v3796_v44  ;;  %1125 = vmatpush.msrb.mxu1 %v4583_v51 }
 0x1d7   :  { %1145 = vmatpush.msrb.mxu2 %v4584_v52  ;;  %1165 = vmatpush.msrb.mxu3 %v4585_v53  ;;  %v4611_v53 = vld [vmem:[#allocation37_spill] sm:$0xff] }
 0x1d8   :  { %1106 = vmatpush.msrb.mxu0 %v4586_v54  ;;  %1126 = vmatpush.msrb.mxu1 %v4587_v55 }
 0x1d9   :  { %1146 = vmatpush.msrb.mxu2 %v4588_v56  ;;  %1166 = vmatpush.msrb.mxu3 %v4589_v57 }
 0x235   :  { %v806_v45 = vpop.f32.mrf.mxu0  ;;  %v826_v48 = vpop.f32.mrf.mxu1 }
 0x236   :  { %v869_v0 = vadd.f32 %v806_v45, %v4609_v49  ;;  %v870_v44 = vadd.f32 %v826_v48, %v4610_v63  ;;  %v4612_v63 = vld [vmem:[#allocation36_spill] sm:$0xff] }
 0x238   :  { %v2178_v40 = vmul.f32 -1.442695, %v869_v0  ;;  %v2179_v51 = vmul.f32 -1.442695, %v870_v44 }
 0x23a   :  { %2388 = vpow2.f32 %v2178_v40 }
 0x23b   :  { %2390 = vpow2.f32 %v2179_v51 }
 0x23c   :  { %v866_v52 = vpop.f32.mrf.mxu3  ;;  %v846_v57 = vpop.f32.mrf.mxu2 }
 0x23d   :  { %v872_v62 = vadd.f32 %v866_v52, %v4611_v53  ;;  %v871_v48 = vadd.f32 %v846_v57, %v4612_v63 }
 0x23f   :  { %v2180_v54 = vmul.f32 -1.442695, %v872_v62 }
 0x240   :  { %v2389_v61 = vpop.eup %2388 }
 0x241   :  { %v2391_v55 = vpop.eup %2390  ;;  %v876_v59 = vadd.f32 1.0, %v2389_v61  ;;  %2392 = vpow2.f32 %v2180_v54 }
 0x242   :  { %v895_v56 = vadd.f32 1.0, %v2391_v55 }
 0x243   :  { %2394 = vrcp.f32 %v876_v59  ;;  %v888_v62 = vand.u32 2147483648, %v876_v59  ;;  %v886_v54 = vand.u32 2147483647, %v876_v59  ;;  %vm882_vm10 = vweird.f32 %v876_v59 }
 0x244   :  { %2396 = vrcp.f32 %v895_v56  ;;  %v907_v53 = vand.u32 2147483648, %v895_v56  ;;  %v905_v50 = vand.u32 2147483647, %v895_v56  ;;  %vm901_vm11 = vweird.f32 %v895_v56 }
 0x245   :  { %v889_v57 = vor.u32 1.1754944e-38, %v888_v62  ;;  %vm887_vm14 = vcmp.eq.f32.partialorder %v886_v54, 8.507059e+37 }
 0x246   :  { %vm906_vm15 = vcmp.eq.f32.partialorder %v905_v50, 8.507059e+37 }
 0x247   :  { %v2393_v58 = vpop.eup %2392 }
 0x248   :  { %v915_v45 = vadd.f32 1.0, %v2393_v58 }
 0x249   :  { %v2395_v49 = vpop.eup %2394 }
 0x24a   :  { %v2397_v44 = vpop.eup %2396  ;;  %v878_v40 = vmul.f32 %v2395_v49, %v876_v59  ;;  %2398 = vrcp.f32 %v915_v45  ;;  %vm883_vm8 = vweird.f32 %v2395_v49  ;;  %v927_v62 = vand.u32 2147483648, %v915_v45 }
 0x24b   :  { %v897_v0 = vmul.f32 %v2397_v44, %v895_v56  ;;  %2400 = vtanh.f32 %v871_v48  ;;  %vm902_vm9 = vweird.f32 %v2397_v44  ;;  %vm884_vm12 = vmor %vm882_vm10, %vm883_vm8  ;;  %vm921_vm1 = vweird.f32 %v915_v45 }
 0x24c   :  { %v879_v51 = vsub.f32 1.0, %v878_v40  ;;  %vm903_vm13 = vmor %vm901_vm11, %vm902_vm9  ;;  %v908_v40 = vor.u32 1.1754944e-38, %v907_v53  ;;  %v928_v54 = vor.u32 1.1754944e-38, %v927_v62  ;;  %v4631_v62 = vld [vmem:[#allocation17_spill] sm:$0xff] }
 0x24d   :  { %v898_v52 = vsub.f32 1.0, %v897_v0 }
 0x24e   :  { %v880_v61 = vmul.f32 %v2395_v49, %v879_v51 }
 0x24f   :  { %v899_v55 = vmul.f32 %v2397_v44, %v898_v52 }
 0x250   :  { %v2399_v47 = vpop.eup %2398  ;;  %v881_v58 = vadd.f32 %v2395_v49, %v880_v61 }
 0x251   :  { %v900_v63 = vadd.f32 %v2397_v44, %v899_v55  ;;  %v917_v43 = vmul.f32 %v2399_v47, %v915_v45  ;;  %v2401_v48 = vpop.eup %2400  ;;  %vm922_vm0 = vweird.f32 %v2399_v47  ;;  %v4620_v55 = vld [vmem:[#allocation14_spill] sm:$0xff] }
 0x252   :  { %v885_v0 = vsel %vm884_vm12, %v2395_v49, %v881_v58  ;;  %v925_v49 = vand.u32 2147483647, %v915_v45  ;;  %vm923_vm2 = vmor %vm921_vm1, %vm922_vm0  ;;  %v4619_v45 = vld [vmem:[#allocation16_spill] sm:$0xff]  ;;  %v3863_v58 = vld [vmem:[%s4411_s2 + $0x90] sm:$0xff] }
 0x253   :  { %v890_v42 = vsel %vm887_vm14, %v889_v57, %v885_v0  ;;  %v904_v51 = vsel %vm903_vm13, %v2397_v44, %v900_v63  ;;  %v918_v41 = vsub.f32 1.0, %v917_v43  ;;  %4621 = vst [vmem:[#allocation23_spill] sm:$0xff] %v3863_v58  ;;  %v4622_v57 = vld [vmem:[#allocation11_spill] sm:$0xff]  ;;  %v4623_v63 = vld [vmem:[#allocation13_spill] sm:$0xff] }
 0x254   :  { %v909_v52 = vsel %vm906_vm15, %v908_v40, %v904_v51  ;;  %v932_v39 = vmul.f32 %v2401_v48, %v890_v42  ;;  %vm926_vm3 = vcmp.eq.f32.partialorder %v925_v49, 8.507059e+37  ;;  %v4617_v42 = vld [vmem:[#allocation8_spill] sm:$0xff]  ;;  %v3872_v0 = vld [vmem:[%s4411_s2 + $0x70] sm:$0xff]  ;;  %v4627_v51 = vld [vmem:[#allocation18_spill] sm:$0xff] }
 0x255   :  { %v931_v38 = vmul.f32 %v909_v52, %v3479_v46  ;;  %v919_v61 = vmul.f32 %v2399_v47, %v918_v41  ;;  %v4613_v46 = vld [vmem:[#allocation5_spill] sm:$0xff]  ;;  %v4616_v41 = vld [vmem:[#allocation10_spill] sm:$0xff]  ;;  %v4624_v40 = vld [vmem:[#allocation20_spill] sm:$0xff]  ;;  %4625 = vst [vmem:[#allocation22_spill] sm:$0xff] %v3872_v0 }
 0x256   :  { %v3878_v48 = vld [vmem:[%s4411_s2 + $0x78] sm:$0xff]  ;;  %v4628_v52 = vld [vmem:[#allocation15_spill] sm:$0xff]  ;;  %v3899_v49 = vld [vmem:[%s4411_s2 + $0x28] sm:$0xff] }
 0x257   :  { %v3811_v59 = vadd.f32 %v932_v39, %v931_v38  ;;  %v920_v56 = vadd.f32 %v2399_v47, %v919_v61  ;;  %v4614_v38 = vld [vmem:[#allocation6_spill] sm:$0xff]  ;;  %v4615_v39 = vld [vmem:[#allocation12_spill] sm:$0xff]  ;;  %4626 = vst [vmem:[#allocation19_spill] sm:$0xff] %v3878_v48  ;;  %v3886_v61 = vld [vmem:[%s4411_s2 + $0x50] sm:$0xff] }
 0x258   :  { %4629 = vst [vmem:[#allocation21_spill] sm:$0xff] %v3886_v61 }
 0x259   :  { %2402 = vtanh.f32 %v3811_v59  ;;  %v924_v53 = vsel %vm923_vm2, %v2399_v47, %v920_v56  ;;  %v4618_v47 = vld [vmem:[#allocation9_spill] sm:$0xff]  ;;  %v3892_v56 = vld [vmem:[%s4411_s2 + $0x58] sm:$0xff]  ;;  %4632 = vst [vmem:[#allocation27_spill] sm:$0xff] %v3899_v49 }
 0x25a   :  { %v929_v43 = vsel %vm926_vm3, %v928_v54, %v924_v53  ;;  %4630 = vst [vmem:[#allocation26_spill] sm:$0xff] %v3892_v56  ;;  %v3905_v53 = vld [vmem:[%s4411_s2 + $0x30] sm:$0xff]  ;;  %v3911_v54 = vld [vmem:[%s4411_s2 + $0x38] sm:$0xff] }
 0x25b   :  { %4633 = vst [vmem:[#allocation24_spill] sm:$0xff] %v3905_v53 }
 0x25c   :  { %4634 = vst [vmem:[#allocation25_spill] sm:$0xff] %v3911_v54 }
 0x25f   :  { %v2403_v50 = vpop.eup %2402 }
 0x260   :  { %v935_v44 = vmul.f32 %v2403_v50, %v929_v43  ;;  %v3917_v50 = vld [vmem:[%s4411_s2] sm:$0xff]  ;;  %v3923_v43 = vld [vmem:[%s4411_s2 + $0x8] sm:$0xff] }
 0x261   :  { %4635 = vst [vmem:[#allocation28_spill] sm:$0xff] %v3917_v50 }
 0x262   :  { %956 = vmatmul.f32.vlgmr.msra.gmra.mxu0 %v935_v44  ;;  %976 = vmatmul.f32.vlgmr.msra.gmra.mxu1 %v935_v44  ;;  %4636 = vst [vmem:[#allocation29_spill] sm:$0xff] %v3923_v43 }
 0x263   :  { %996 = vmatmul.f32.vlgmr.msra.gmra.mxu2 %v935_v44  ;;  %1016 = vmatmul.f32.vlgmr.msra.gmra.mxu3 %v935_v44  ;;  %v3929_v44 = vld [vmem:[%s4411_s2 + $0x10] sm:$0xff] }
 0x264   :  { %1242 = vmatpush.msra.mxu0 %v3485_v11  ;;  %1262 = vmatpush.msra.mxu1 %v3491_v1  ;;  %4637 = vst [vmem:[#allocation30_spill] sm:$0xff] %v3929_v44 }
 0x265   :  { %1282 = vmatpush.msra.mxu2 %v3497_v2  ;;  %1302 = vmatpush.msra.mxu3 %v3503_v3 }
 0x266   :  { %1243 = vmatpush.msra.mxu0 %v3509_v4  ;;  %1263 = vmatpush.msra.mxu1 %v3515_v5 }
 0x267   :  { %1283 = vmatpush.msra.mxu2 %v3521_v6  ;;  %1303 = vmatpush.msra.mxu3 %v3527_v7 }
 0x268   :  { %1244 = vmatpush.msra.mxu0 %v3533_v8  ;;  %1264 = vmatpush.msra.mxu1 %v3539_v10 }
 0x269   :  { %1284 = vmatpush.msra.mxu2 %v3545_v12  ;;  %1304 = vmatpush.msra.mxu3 %v3551_v32 }
 0x26a   :  { %1245 = vmatpush.msra.mxu0 %v3557_v16  ;;  %1265 = vmatpush.msra.mxu1 %v3563_v20 }
 0x26b   :  { %1285 = vmatpush.msra.mxu2 %v3569_v15  ;;  %1305 = vmatpush.msra.mxu3 %v3575_v60 }
 0x26c   :  { %1246 = vmatpush.msra.mxu0 %v3581_v13  ;;  %1266 = vmatpush.msra.mxu1 %v3587_v9 }
 0x26d   :  { %1286 = vmatpush.msra.mxu2 %v3593_v30  ;;  %1306 = vmatpush.msra.mxu3 %v3599_v19 }
 0x26e   :  { %1247 = vmatpush.msra.mxu0 %v3605_v23  ;;  %1267 = vmatpush.msra.mxu1 %v3611_v26 }
 0x26f   :  { %1287 = vmatpush.msra.mxu2 %v3617_v18  ;;  %1307 = vmatpush.msra.mxu3 %v3623_v14 }
 0x270   :  { %1248 = vmatpush.msra.mxu0 %v3629_v28  ;;  %1268 = vmatpush.msra.mxu1 %v3635_v24 }
 0x271   :  { %1288 = vmatpush.msra.mxu2 %v3641_v21  ;;  %1308 = vmatpush.msra.mxu3 %v3647_v25 }
 0x272   :  { %1249 = vmatpush.msra.mxu0 %v3653_v27  ;;  %1269 = vmatpush.msra.mxu1 %v3659_v31 }
 0x273   :  { %1289 = vmatpush.msra.mxu2 %v3665_v17  ;;  %1309 = vmatpush.msra.mxu3 %v3671_v22 }
 0x274   :  { %1250 = vmatpush.msra.mxu0 %v3677_v29  ;;  %1270 = vmatpush.msra.mxu1 %v3683_v33 }
 0x275   :  { %1290 = vmatpush.msra.mxu2 %v3689_v34  ;;  %1310 = vmatpush.msra.mxu3 %v3695_v35 }
 0x276   :  { %1251 = vmatpush.msra.mxu0 %v3701_v36  ;;  %1271 = vmatpush.msra.mxu1 %v3707_v37 }
 0x277   :  { %1291 = vmatpush.msra.mxu2 %v4613_v46  ;;  %1311 = vmatpush.msra.mxu3 %v4614_v38 }
 0x278   :  { %1252 = vmatpush.msra.mxu0 %v4615_v39  ;;  %1272 = vmatpush.msra.mxu1 %v4616_v41 }
 0x279   :  { %1292 = vmatpush.msra.mxu2 %v4617_v42  ;;  %1312 = vmatpush.msra.mxu3 %v4618_v47 }
 0x27a   :  { %1253 = vmatpush.msra.mxu0 %v4619_v45  ;;  %1273 = vmatpush.msra.mxu1 %v4620_v55 }
 0x27b   :  { %1293 = vmatpush.msra.mxu2 %v3863_v58  ;;  %1313 = vmatpush.msra.mxu3 %v4622_v57 }
 0x27c   :  { %1254 = vmatpush.msra.mxu0 %v4623_v63  ;;  %1274 = vmatpush.msra.mxu1 %v4624_v40 }
 0x27d   :  { %1294 = vmatpush.msra.mxu2 %v3872_v0  ;;  %1314 = vmatpush.msra.mxu3 %v3878_v48  ;;  %v4641_v48 = vld [vmem:[#allocation41_spill] sm:$0xff] }
 0x27e   :  { %1255 = vmatpush.msra.mxu0 %v4627_v51  ;;  %1275 = vmatpush.msra.mxu1 %v4628_v52 }
 0x27f   :  { %1295 = vmatpush.msra.mxu2 %v3886_v61  ;;  %1315 = vmatpush.msra.mxu3 %v3892_v56  ;;  %v4640_v56 = vld [vmem:[#allocation39_spill] sm:$0xff] }
 0x280   :  { %1256 = vmatpush.msra.mxu0 %v4631_v62  ;;  %1276 = vmatpush.msra.mxu1 %v3899_v49  ;;  %v4639_v49 = vld [vmem:[#allocation38_spill] sm:$0xff] }
 0x281   :  { %1296 = vmatpush.msra.mxu2 %v3905_v53  ;;  %1316 = vmatpush.msra.mxu3 %v3911_v54  ;;  %v3935_v54 = vld [vmem:[%s4411_s2 + $0x18] sm:$0xff] }
 0x282   :  { %1257 = vmatpush.msra.mxu0 %v3917_v50  ;;  %1277 = vmatpush.msra.mxu1 %v3923_v43  ;;  %4638 = vst [vmem:[#allocation31_spill] sm:$0xff] %v3935_v54 }
 0x283   :  { %1297 = vmatpush.msra.mxu2 %v3929_v44  ;;  %1317 = vmatpush.msra.mxu3 %v3935_v54 }
 0x2df   :  { %v957_v50 = vpop.f32.mrf.mxu0  ;;  %v977_v53 = vpop.f32.mrf.mxu1 }
 0x2e0   :  { %v1020_v62 = vadd.f32 %v957_v50, %v4639_v49  ;;  %v1021_v43 = vadd.f32 %v977_v53, %v4640_v56  ;;  %v4642_v56 = vld [vmem:[#allocation40_spill] sm:$0xff] }
 0x2e2   :  { %v2181_v61 = vmul.f32 -1.442695, %v1020_v62  ;;  %v2182_v52 = vmul.f32 -1.442695, %v1021_v43 }
 0x2e4   :  { %2404 = vpow2.f32 %v2181_v61 }
 0x2e5   :  { %2406 = vpow2.f32 %v2182_v52 }
 0x2e6   :  { %v1017_v51 = vpop.f32.mrf.mxu3  ;;  %v997_v54 = vpop.f32.mrf.mxu2 }
 0x2e7   :  { %v1023_v44 = vadd.f32 %v1017_v51, %v4641_v48  ;;  %v1022_v62 = vadd.f32 %v997_v54, %v4642_v56 }
 0x2e9   :  { %v2183_v0 = vmul.f32 -1.442695, %v1023_v44 }
 0x2ea   :  { %v2405_v40 = vpop.eup %2404 }
 0x2eb   :  { %v2407_v63 = vpop.eup %2406  ;;  %v1027_v57 = vadd.f32 1.0, %v2405_v40  ;;  %2408 = vpow2.f32 %v2183_v0 }
 0x2ec   :  { %v1046_v58 = vadd.f32 1.0, %v2407_v63 }
 0x2ed   :  { %2410 = vrcp.f32 %v1027_v57  ;;  %v1039_v51 = vand.u32 2147483648, %v1027_v57  ;;  %v1037_v63 = vand.u32 2147483647, %v1027_v57  ;;  %vm1033_vm6 = vweird.f32 %v1027_v57 }
 0x2ee   :  { %2412 = vrcp.f32 %v1046_v58  ;;  %v1058_v44 = vand.u32 2147483648, %v1046_v58  ;;  %v1056_v45 = vand.u32 2147483647, %v1046_v58  ;;  %vm1052_vm7 = vweird.f32 %v1046_v58 }
 0x2ef   :  { %v1040_v54 = vor.u32 1.1754944e-38, %v1039_v51  ;;  %vm1038_vm10 = vcmp.eq.f32.partialorder %v1037_v63, 8.507059e+37 }
 0x2f0   :  { %vm1057_vm11 = vcmp.eq.f32.partialorder %v1056_v45, 8.507059e+37 }
 0x2f1   :  { %v2409_v55 = vpop.eup %2408 }
 0x2f2   :  { %v1066_v49 = vadd.f32 1.0, %v2409_v55 }
 0x2f3   :  { %v2411_v50 = vpop.eup %2410 }
 0x2f4   :  { %v2413_v53 = vpop.eup %2412  ;;  %v1029_v61 = vmul.f32 %v2411_v50, %v1027_v57  ;;  %2414 = vrcp.f32 %v1066_v49  ;;  %vm1034_vm4 = vweird.f32 %v2411_v50  ;;  %v1078_v51 = vand.u32 2147483648, %v1066_v49 }
 0x2f5   :  { %v1048_v52 = vmul.f32 %v2413_v53, %v1046_v58  ;;  %2416 = vtanh.f32 %v1022_v62  ;;  %vm1053_vm5 = vweird.f32 %v2413_v53  ;;  %vm1035_vm8 = vmor %vm1033_vm6, %vm1034_vm4  ;;  %vm1072_vm13 = vweird.f32 %v1066_v49 }
 0x2f6   :  { %v1030_v43 = vsub.f32 1.0, %v1029_v61  ;;  %vm1054_vm9 = vmor %vm1052_vm7, %vm1053_vm5  ;;  %v1059_v61 = vor.u32 1.1754944e-38, %v1058_v44  ;;  %v1079_v63 = vor.u32 1.1754944e-38, %v1078_v51  ;;  %v4661_v51 = vld [vmem:[#allocation17_spill] sm:$0xff] }
 0x2f7   :  { %v1049_v48 = vsub.f32 1.0, %v1048_v52 }
 0x2f8   :  { %v1031_v40 = vmul.f32 %v2411_v50, %v1030_v43 }
 0x2f9   :  { %v1050_v0 = vmul.f32 %v2413_v53, %v1049_v48 }
 0x2fa   :  { %v2415_v47 = vpop.eup %2414  ;;  %v1032_v55 = vadd.f32 %v2411_v50, %v1031_v40 }
 0x2fb   :  { %v1051_v56 = vadd.f32 %v2413_v53, %v1050_v0  ;;  %v1068_v42 = vmul.f32 %v2415_v47, %v1066_v49  ;;  %v2417_v62 = vpop.eup %2416  ;;  %vm1073_vm12 = vweird.f32 %v2415_v47  ;;  %v4650_v0 = vld [vmem:[#allocation14_spill] sm:$0xff] }
 0x2fc   :  { %v1036_v52 = vsel %vm1035_vm8, %v2411_v50, %v1032_v55  ;;  %v1076_v50 = vand.u32 2147483647, %v1066_v49  ;;  %vm1074_vm14 = vmor %vm1072_vm13, %vm1073_vm12  ;;  %v4649_v49 = vld [vmem:[#allocation16_spill] sm:$0xff]  ;;  %v4651_v55 = vld [vmem:[#allocation23_spill] sm:$0xff] }
 0x2fd   :  { %v1041_v41 = vsel %vm1038_vm10, %v1040_v54, %v1036_v52  ;;  %v1055_v43 = vsel %vm1054_vm9, %v2413_v53, %v1051_v56  ;;  %v1069_v39 = vsub.f32 1.0, %v1068_v42  ;;  %v4652_v54 = vld [vmem:[#allocation11_spill] sm:$0xff]  ;;  %v4653_v56 = vld [vmem:[#allocation13_spill] sm:$0xff]  ;;  %v4655_v52 = vld [vmem:[#allocation22_spill] sm:$0xff] }
 0x2fe   :  { %v1060_v48 = vsel %vm1057_vm11, %v1059_v61, %v1055_v43  ;;  %v1083_v38 = vmul.f32 %v2417_v62, %v1041_v41  ;;  %vm1077_vm15 = vcmp.eq.f32.partialorder %v1076_v50, 8.507059e+37  ;;  %v4647_v41 = vld [vmem:[#allocation8_spill] sm:$0xff]  ;;  %v4656_v62 = vld [vmem:[#allocation19_spill] sm:$0xff]  ;;  %v4657_v43 = vld [vmem:[#allocation18_spill] sm:$0xff] }
 0x2ff   :  { %v1082_v46 = vmul.f32 %v1060_v48, %v3811_v59  ;;  %v1070_v40 = vmul.f32 %v2415_v47, %v1069_v39  ;;  %v4643_v59 = vld [vmem:[#allocation5_spill] sm:$0xff]  ;;  %v4646_v39 = vld [vmem:[#allocation10_spill] sm:$0xff]  ;;  %v4654_v61 = vld [vmem:[#allocation20_spill] sm:$0xff] }
 0x300   :  { %v4658_v48 = vld [vmem:[#allocation15_spill] sm:$0xff] }
 0x301   :  { %v3943_v57 = vadd.f32 %v1083_v38, %v1082_v46  ;;  %v1071_v58 = vadd.f32 %v2415_v47, %v1070_v40  ;;  %v4644_v46 = vld [vmem:[#allocation6_spill] sm:$0xff]  ;;  %v4645_v38 = vld [vmem:[#allocation12_spill] sm:$0xff]  ;;  %v4659_v40 = vld [vmem:[#allocation21_spill] sm:$0xff] }
 0x302   :  { %v4662_v50 = vld [vmem:[#allocation27_spill] sm:$0xff] }
 0x303   :  { %2418 = vtanh.f32 %v3943_v57  ;;  %v1075_v44 = vsel %vm1074_vm14, %v2415_v47, %v1071_v58  ;;  %v4648_v47 = vld [vmem:[#allocation9_spill] sm:$0xff]  ;;  %v4660_v58 = vld [vmem:[#allocation26_spill] sm:$0xff] }
 0x304   :  { %v1080_v42 = vsel %vm1077_vm15, %v1079_v63, %v1075_v44  ;;  %v4663_v44 = vld [vmem:[#allocation24_spill] sm:$0xff]  ;;  %v4664_v63 = vld [vmem:[#allocation25_spill] sm:$0xff] }
 0x309   :  { %v2419_v45 = vpop.eup %2418 }
 0x30a   :  { %v1086_v53 = vmul.f32 %v2419_v45, %v1080_v42  ;;  %v4665_v45 = vld [vmem:[#allocation28_spill] sm:$0xff]  ;;  %v4666_v42 = vld [vmem:[#allocation29_spill] sm:$0xff] }
 0x30c   :  { %1107 = vmatmul.f32.vlgmr.msrb.gmra.mxu0 %v1086_v53  ;;  %1127 = vmatmul.f32.vlgmr.msrb.gmra.mxu1 %v1086_v53 }
 0x30d   :  { %1147 = vmatmul.f32.vlgmr.msrb.gmra.mxu2 %v1086_v53  ;;  %1167 = vmatmul.f32.vlgmr.msrb.gmra.mxu3 %v1086_v53  ;;  %v4667_v53 = vld [vmem:[#allocation30_spill] sm:$0xff] }
 0x30e   :  { %1393 = vmatpush.msrb.mxu0 %v3485_v11  ;;  %1413 = vmatpush.msrb.mxu1 %v3491_v1 }
 0x30f   :  { %1433 = vmatpush.msrb.mxu2 %v3497_v2  ;;  %1453 = vmatpush.msrb.mxu3 %v3503_v3 }
 0x310   :  { %1394 = vmatpush.msrb.mxu0 %v3509_v4  ;;  %1414 = vmatpush.msrb.mxu1 %v3515_v5 }
 0x311   :  { %1434 = vmatpush.msrb.mxu2 %v3521_v6  ;;  %1454 = vmatpush.msrb.mxu3 %v3527_v7 }
 0x312   :  { %1395 = vmatpush.msrb.mxu0 %v3533_v8  ;;  %1415 = vmatpush.msrb.mxu1 %v3539_v10 }
 0x313   :  { %1435 = vmatpush.msrb.mxu2 %v3545_v12  ;;  %1455 = vmatpush.msrb.mxu3 %v3551_v32 }
 0x314   :  { %1396 = vmatpush.msrb.mxu0 %v3557_v16  ;;  %1416 = vmatpush.msrb.mxu1 %v3563_v20 }
 0x315   :  { %1436 = vmatpush.msrb.mxu2 %v3569_v15  ;;  %1456 = vmatpush.msrb.mxu3 %v3575_v60 }
 0x316   :  { %1397 = vmatpush.msrb.mxu0 %v3581_v13  ;;  %1417 = vmatpush.msrb.mxu1 %v3587_v9 }
 0x317   :  { %1437 = vmatpush.msrb.mxu2 %v3593_v30  ;;  %1457 = vmatpush.msrb.mxu3 %v3599_v19 }
 0x318   :  { %1398 = vmatpush.msrb.mxu0 %v3605_v23  ;;  %1418 = vmatpush.msrb.mxu1 %v3611_v26 }
 0x319   :  { %1438 = vmatpush.msrb.mxu2 %v3617_v18  ;;  %1458 = vmatpush.msrb.mxu3 %v3623_v14 }
 0x31a   :  { %1399 = vmatpush.msrb.mxu0 %v3629_v28  ;;  %1419 = vmatpush.msrb.mxu1 %v3635_v24 }
 0x31b   :  { %1439 = vmatpush.msrb.mxu2 %v3641_v21  ;;  %1459 = vmatpush.msrb.mxu3 %v3647_v25 }
 0x31c   :  { %1400 = vmatpush.msrb.mxu0 %v3653_v27  ;;  %1420 = vmatpush.msrb.mxu1 %v3659_v31 }
 0x31d   :  { %1440 = vmatpush.msrb.mxu2 %v3665_v17  ;;  %1460 = vmatpush.msrb.mxu3 %v3671_v22 }
 0x31e   :  { %1401 = vmatpush.msrb.mxu0 %v3677_v29  ;;  %1421 = vmatpush.msrb.mxu1 %v3683_v33 }
 0x31f   :  { %1441 = vmatpush.msrb.mxu2 %v3689_v34  ;;  %1461 = vmatpush.msrb.mxu3 %v3695_v35 }
 0x320   :  { %1402 = vmatpush.msrb.mxu0 %v3701_v36  ;;  %1422 = vmatpush.msrb.mxu1 %v3707_v37 }
 0x321   :  { %1442 = vmatpush.msrb.mxu2 %v4643_v59  ;;  %1462 = vmatpush.msrb.mxu3 %v4644_v46 }
 0x322   :  { %1403 = vmatpush.msrb.mxu0 %v4645_v38  ;;  %1423 = vmatpush.msrb.mxu1 %v4646_v39 }
 0x323   :  { %1443 = vmatpush.msrb.mxu2 %v4647_v41  ;;  %1463 = vmatpush.msrb.mxu3 %v4648_v47 }
 0x324   :  { %1404 = vmatpush.msrb.mxu0 %v4649_v49  ;;  %1424 = vmatpush.msrb.mxu1 %v4650_v0 }
 0x325   :  { %1444 = vmatpush.msrb.mxu2 %v4651_v55  ;;  %1464 = vmatpush.msrb.mxu3 %v4652_v54 }
 0x326   :  { %1405 = vmatpush.msrb.mxu0 %v4653_v56  ;;  %1425 = vmatpush.msrb.mxu1 %v4654_v61  ;;  %v4670_v61 = vld [vmem:[#allocation43_spill] sm:$0xff] }
 0x327   :  { %1445 = vmatpush.msrb.mxu2 %v4655_v52  ;;  %1465 = vmatpush.msrb.mxu3 %v4656_v62  ;;  %v4669_v62 = vld [vmem:[#allocation42_spill] sm:$0xff] }
 0x328   :  { %1406 = vmatpush.msrb.mxu0 %v4657_v43  ;;  %1426 = vmatpush.msrb.mxu1 %v4658_v48  ;;  %v4668_v43 = vld [vmem:[#allocation31_spill] sm:$0xff] }
 0x329   :  { %1446 = vmatpush.msrb.mxu2 %v4659_v40  ;;  %1466 = vmatpush.msrb.mxu3 %v4660_v58 }
 0x32a   :  { %1407 = vmatpush.msrb.mxu0 %v4661_v51  ;;  %1427 = vmatpush.msrb.mxu1 %v4662_v50 }
 0x32b   :  { %1447 = vmatpush.msrb.mxu2 %v4663_v44  ;;  %1467 = vmatpush.msrb.mxu3 %v4664_v63  ;;  %v4671_v63 = vld [vmem:[#allocation45_spill] sm:$0xff] }
 0x32c   :  { %1408 = vmatpush.msrb.mxu0 %v4665_v45  ;;  %1428 = vmatpush.msrb.mxu1 %v4666_v42 }
 0x32d   :  { %1448 = vmatpush.msrb.mxu2 %v4667_v53  ;;  %1468 = vmatpush.msrb.mxu3 %v4668_v43 }
 0x389   :  { %v1108_v48 = vpop.f32.mrf.mxu0  ;;  %v1128_v40 = vpop.f32.mrf.mxu1 }
 0x38a   :  { %v1171_v58 = vadd.f32 %v1108_v48, %v4669_v62  ;;  %v1172_v51 = vadd.f32 %v1128_v40, %v4670_v61  ;;  %v4672_v61 = vld [vmem:[#allocation44_spill] sm:$0xff] }
 0x38c   :  { %v2184_v52 = vmul.f32 -1.442695, %v1171_v58  ;;  %v2185_v50 = vmul.f32 -1.442695, %v1172_v51 }
 0x38e   :  { %2420 = vpow2.f32 %v2184_v52 }
 0x38f   :  { %2422 = vpow2.f32 %v2185_v50 }
 0x390   :  { %v1168_v44 = vpop.f32.mrf.mxu3  ;;  %v1148_v43 = vpop.f32.mrf.mxu2 }
 0x391   :  { %v1174_v56 = vadd.f32 %v1168_v44, %v4671_v63  ;;  %v1173_v40 = vadd.f32 %v1148_v43, %v4672_v61 }
 0x393   :  { %v2186_v45 = vmul.f32 -1.442695, %v1174_v56 }
 0x394   :  { %v2421_v54 = vpop.eup %2420 }
 0x395   :  { %v2423_v42 = vpop.eup %2422  ;;  %v1178_v0 = vadd.f32 1.0, %v2421_v54  ;;  %2424 = vpow2.f32 %v2186_v45 }
 0x396   :  { %v1197_v53 = vadd.f32 1.0, %v2423_v42 }
 0x397   :  { %2426 = vrcp.f32 %v1178_v0  ;;  %v1190_v56 = vand.u32 2147483648, %v1178_v0  ;;  %v1188_v45 = vand.u32 2147483647, %v1178_v0  ;;  %vm1184_vm2 = vweird.f32 %v1178_v0 }
 0x398   :  { %2428 = vrcp.f32 %v1197_v53  ;;  %v1209_v63 = vand.u32 2147483648, %v1197_v53  ;;  %v1207_v49 = vand.u32 2147483647, %v1197_v53  ;;  %vm1203_vm3 = vweird.f32 %v1197_v53 }
 0x399   :  { %v1191_v43 = vor.u32 1.1754944e-38, %v1190_v56  ;;  %vm1189_vm6 = vcmp.eq.f32.partialorder %v1188_v45, 8.507059e+37 }
 0x39a   :  { %vm1208_vm7 = vcmp.eq.f32.partialorder %v1207_v49, 8.507059e+37 }
 0x39b   :  { %v2425_v55 = vpop.eup %2424 }
 0x39c   :  { %v1217_v62 = vadd.f32 1.0, %v2425_v55 }
 0x39d   :  { %v2427_v48 = vpop.eup %2426 }
 0x39e   :  { %v2429_v58 = vpop.eup %2428  ;;  %v1180_v52 = vmul.f32 %v2427_v48, %v1178_v0  ;;  %2430 = vrcp.f32 %v1217_v62  ;;  %vm1185_vm0 = vweird.f32 %v2427_v48  ;;  %v1229_v56 = vand.u32 2147483648, %v1217_v62 }
 0x39f   :  { %v1199_v51 = vmul.f32 %v2429_v58, %v1197_v53  ;;  %2432 = vtanh.f32 %v1173_v40  ;;  %vm1204_vm1 = vweird.f32 %v2429_v58  ;;  %vm1186_vm4 = vmor %vm1184_vm2, %vm1185_vm0  ;;  %vm1223_vm9 = vweird.f32 %v1217_v62 }
 0x3a0   :  { %v1181_v50 = vsub.f32 1.0, %v1180_v52  ;;  %vm1205_vm5 = vmor %vm1203_vm3, %vm1204_vm1  ;;  %v1210_v52 = vor.u32 1.1754944e-38, %v1209_v63  ;;  %v1230_v45 = vor.u32 1.1754944e-38, %v1229_v56 }
 0x3a1   :  { %v1200_v44 = vsub.f32 1.0, %v1199_v51 }
 0x3a2   :  { %v1182_v54 = vmul.f32 %v2427_v48, %v1181_v50 }
 0x3a3   :  { %v1201_v42 = vmul.f32 %v2429_v58, %v1200_v44 }
 0x3a4   :  { %v2431_v47 = vpop.eup %2430  ;;  %v1183_v55 = vadd.f32 %v2427_v48, %v1182_v54 }
 0x3a5   :  { %v1202_v61 = vadd.f32 %v2429_v58, %v1201_v42  ;;  %v1219_v39 = vmul.f32 %v2431_v47, %v1217_v62  ;;  %v2433_v40 = vpop.eup %2432  ;;  %vm1224_vm8 = vweird.f32 %v2431_v47 }
 0x3a6   :  { %v1187_v51 = vsel %vm1186_vm4, %v2427_v48, %v1183_v55  ;;  %v1227_v48 = vand.u32 2147483647, %v1217_v62  ;;  %vm1225_vm10 = vmor %vm1223_vm9, %vm1224_vm8  ;;  %v4702_v55 = vld [vmem:[#allocation48_spill] sm:$0xff] }
 0x3a7   :  { %v1192_v41 = vsel %vm1189_vm6, %v1191_v43, %v1187_v51  ;;  %v1206_v50 = vsel %vm1205_vm5, %v2429_v58, %v1202_v61  ;;  %v1220_v38 = vsub.f32 1.0, %v1219_v39 }
 0x3a8   :  { %v1211_v44 = vsel %vm1208_vm7, %v1210_v52, %v1206_v50  ;;  %v1234_v46 = vmul.f32 %v2433_v40, %v1192_v41  ;;  %vm1228_vm11 = vcmp.eq.f32.partialorder %v1227_v48, 8.507059e+37 }
 0x3a9   :  { %v1233_v37 = vmul.f32 %v1211_v44, %v3943_v57  ;;  %v1221_v54 = vmul.f32 %v2431_v47, %v1220_v38 }
 0x3ab   :  { %v4015_v0 = vadd.f32 %v1234_v46, %v1233_v37  ;;  %v1222_v53 = vadd.f32 %v2431_v47, %v1221_v54 }
 0x3ad   :  { %2434 = vtanh.f32 %v4015_v0  ;;  %v1226_v63 = vsel %vm1225_vm10, %v2431_v47, %v1222_v53 }
 0x3ae   :  { %v1231_v39 = vsel %vm1228_vm11, %v1230_v45, %v1226_v63 }
 0x3b3   :  { %v2435_v49 = vpop.eup %2434 }
 0x3b4   :  { %v1237_v58 = vmul.f32 %v2435_v49, %v1231_v39 }
 0x3b6   :  { %1258 = vmatmul.f32.vlgmr.msra.gmra.mxu0 %v1237_v58  ;;  %1278 = vmatmul.f32.vlgmr.msra.gmra.mxu1 %v1237_v58 }
 0x3b7   :  { %1298 = vmatmul.f32.vlgmr.msra.gmra.mxu2 %v1237_v58  ;;  %1318 = vmatmul.f32.vlgmr.msra.gmra.mxu3 %v1237_v58 }
 0x3b8   :  { %1544 = vmatpush.msra.mxu0 %v3485_v11  ;;  %1584 = vmatpush.msra.mxu2 %v3497_v2  ;;  %v4673_v11 = vld [vmem:[#allocation7_spill] sm:$0xff]  ;;  %v4675_v2 = vld [vmem:[#allocation12_spill] sm:$0xff] }
 0x3b9   :  { %1564 = vmatpush.msra.mxu1 %v3491_v1  ;;  %1604 = vmatpush.msra.mxu3 %v3503_v3  ;;  %v4674_v1 = vld [vmem:[#allocation6_spill] sm:$0xff]  ;;  %v4676_v3 = vld [vmem:[#allocation8_spill] sm:$0xff] }
 0x3ba   :  { %1545 = vmatpush.msra.mxu0 %v3509_v4  ;;  %1585 = vmatpush.msra.mxu2 %v3521_v6  ;;  %v4677_v4 = vld [vmem:[#allocation10_spill] sm:$0xff]  ;;  %v4679_v6 = vld [vmem:[#allocation16_spill] sm:$0xff] }
 0x3bb   :  { %1565 = vmatpush.msra.mxu1 %v3515_v5  ;;  %1605 = vmatpush.msra.mxu3 %v3527_v7  ;;  %v4678_v5 = vld [vmem:[#allocation9_spill] sm:$0xff]  ;;  %v4680_v7 = vld [vmem:[#allocation23_spill] sm:$0xff] }
 0x3bc   :  { %1546 = vmatpush.msra.mxu0 %v3533_v8  ;;  %1586 = vmatpush.msra.mxu2 %v3545_v12  ;;  %v4681_v8 = vld [vmem:[#allocation14_spill] sm:$0xff]  ;;  %v4683_v12 = vld [vmem:[#allocation13_spill] sm:$0xff] }
 0x3bd   :  { %1566 = vmatpush.msra.mxu1 %v3539_v10  ;;  %1606 = vmatpush.msra.mxu3 %v3551_v32  ;;  %v4682_v10 = vld [vmem:[#allocation11_spill] sm:$0xff]  ;;  %v4684_v32 = vld [vmem:[#allocation22_spill] sm:$0xff] }
 0x3be   :  { %1547 = vmatpush.msra.mxu0 %v3557_v16  ;;  %1587 = vmatpush.msra.mxu2 %v3569_v15  ;;  %v4685_v16 = vld [vmem:[#allocation20_spill] sm:$0xff]  ;;  %v4687_v15 = vld [vmem:[#allocation18_spill] sm:$0xff] }
 0x3bf   :  { %1567 = vmatpush.msra.mxu1 %v3563_v20  ;;  %1607 = vmatpush.msra.mxu3 %v3575_v60  ;;  %v4686_v20 = vld [vmem:[#allocation19_spill] sm:$0xff]  ;;  %v4688_v60 = vld [vmem:[#allocation21_spill] sm:$0xff] }
 0x3c0   :  { %1548 = vmatpush.msra.mxu0 %v3581_v13  ;;  %1588 = vmatpush.msra.mxu2 %v3593_v30  ;;  %v4689_v13 = vld [vmem:[#allocation15_spill] sm:$0xff]  ;;  %v4691_v30 = vld [vmem:[#allocation17_spill] sm:$0xff] }
 0x3c1   :  { %1568 = vmatpush.msra.mxu1 %v3587_v9  ;;  %1608 = vmatpush.msra.mxu3 %v3599_v19  ;;  %v4690_v9 = vld [vmem:[#allocation26_spill] sm:$0xff]  ;;  %v4692_v19 = vld [vmem:[#allocation24_spill] sm:$0xff] }
 0x3c2   :  { %1549 = vmatpush.msra.mxu0 %v3605_v23  ;;  %1589 = vmatpush.msra.mxu2 %v3617_v18  ;;  %v4693_v23 = vld [vmem:[#allocation27_spill] sm:$0xff]  ;;  %v4695_v18 = vld [vmem:[#allocation28_spill] sm:$0xff] }
 0x3c3   :  { %1569 = vmatpush.msra.mxu1 %v3611_v26  ;;  %1609 = vmatpush.msra.mxu3 %v3623_v14  ;;  %v4694_v26 = vld [vmem:[#allocation25_spill] sm:$0xff]  ;;  %v4696_v14 = vld [vmem:[#allocation30_spill] sm:$0xff] }
 0x3c4   :  { %1550 = vmatpush.msra.mxu0 %v3629_v28  ;;  %1590 = vmatpush.msra.mxu2 %v3641_v21  ;;  %v4697_v28 = vld [vmem:[#allocation29_spill] sm:$0xff] }
 0x3c5   :  { %1570 = vmatpush.msra.mxu1 %v3635_v24  ;;  %1610 = vmatpush.msra.mxu3 %v3647_v25  ;;  %v4698_v24 = vld [vmem:[#allocation31_spill] sm:$0xff] }
 0x3c6   :  { %1551 = vmatpush.msra.mxu0 %v3653_v27  ;;  %1591 = vmatpush.msra.mxu2 %v3665_v17  ;;  %v4699_v27 = vld [vmem:[#allocation46_spill] sm:$0xff]  ;;  %v4700_v17 = vld [vmem:[#allocation47_spill] sm:$0xff] }
 0x3c7   :  { %1571 = vmatpush.msra.mxu1 %v3659_v31  ;;  %1611 = vmatpush.msra.mxu3 %v3671_v22 }
 0x3c8   :  { %1552 = vmatpush.msra.mxu0 %v3677_v29  ;;  %1592 = vmatpush.msra.mxu2 %v3689_v34 }
 0x3c9   :  { %1572 = vmatpush.msra.mxu1 %v3683_v33  ;;  %1612 = vmatpush.msra.mxu3 %v3695_v35  ;;  %v4701_v35 = vld [vmem:[#allocation49_spill] sm:$0xff] }
 0x3ca   :  { %1553 = vmatpush.msra.mxu0 %v3701_v36  ;;  %1593 = vmatpush.msra.mxu2 %v4643_v59 }
 0x3cb   :  { %1573 = vmatpush.msra.mxu1 %v4673_v11  ;;  %1613 = vmatpush.msra.mxu3 %v4674_v1 }
 0x3cc   :  { %1554 = vmatpush.msra.mxu0 %v4675_v2  ;;  %1594 = vmatpush.msra.mxu2 %v4676_v3 }
 0x3cd   :  { %1574 = vmatpush.msra.mxu1 %v4677_v4  ;;  %1614 = vmatpush.msra.mxu3 %v4678_v5 }
 0x3ce   :  { %1555 = vmatpush.msra.mxu0 %v4679_v6  ;;  %1595 = vmatpush.msra.mxu2 %v4680_v7 }
 0x3cf   :  { %1575 = vmatpush.msra.mxu1 %v4681_v8  ;;  %1615 = vmatpush.msra.mxu3 %v4682_v10 }
 0x3d0   :  { %1556 = vmatpush.msra.mxu0 %v4683_v12  ;;  %1596 = vmatpush.msra.mxu2 %v4684_v32 }
 0x3d1   :  { %1576 = vmatpush.msra.mxu1 %v4685_v16  ;;  %1616 = vmatpush.msra.mxu3 %v4686_v20 }
 0x3d2   :  { %1557 = vmatpush.msra.mxu0 %v4687_v15  ;;  %1597 = vmatpush.msra.mxu2 %v4688_v60 }
 0x3d3   :  { %1577 = vmatpush.msra.mxu1 %v4689_v13  ;;  %1617 = vmatpush.msra.mxu3 %v4690_v9 }
 0x3d4   :  { %1558 = vmatpush.msra.mxu0 %v4691_v30  ;;  %1598 = vmatpush.msra.mxu2 %v4692_v19 }
 0x3d5   :  { %1578 = vmatpush.msra.mxu1 %v4693_v23  ;;  %1618 = vmatpush.msra.mxu3 %v4694_v26  ;;  %v2352_v23 = vld [vmem:[%s4413_s4 + $0xec] sm:$0xf0]  ;;  %v2351_v26 = vld [vmem:[%s4413_s4 + $0xec] sm:$0xf] }
 0x3d6   :  { %1559 = vmatpush.msra.mxu0 %v4695_v18  ;;  %1599 = vmatpush.msra.mxu2 %v4696_v14  ;;  %v2288_v14 = vld [vmem:[%s4413_s4 + $0xf8] sm:$0xf0] }
 0x3d7   :  { %1579 = vmatpush.msra.mxu1 %v4697_v28  ;;  %1619 = vmatpush.msra.mxu3 %v4698_v24  ;;  %v2291_v28 = vor.u32 %v2351_v26, %v2288_v14  ;;  %v2270_v24 = vld [vmem:[%s4413_s4 + $0xc0] sm:$0xf]  ;;  %v2216_v26 = vld [vmem:[%s4413_s4 + $0x38] sm:$0xf0]  ;;  %v2344_v14 = vld [vmem:[%s4413_s4 + $0x94] sm:$0xf0] }
 0x433   :  { %v1259_v21 = vpop.f32.mrf.mxu0  ;;  %v1279_v25 = vpop.f32.mrf.mxu1 }
 0x434   :  { %v1322_v31 = vadd.f32 %v1259_v21, %v4699_v27  ;;  %v1323_v22 = vadd.f32 %v1279_v25, %v4700_v17  ;;  %v2349_v21 = vld [vmem:[%s4413_s4 + $0xcc] sm:$0xf0]  ;;  %v2348_v25 = vld [vmem:[%s4413_s4 + $0xcc] sm:$0xf] }
 0x435   :  { %v2271_v27 = vor.u32 %v2349_v21, %v2270_v24  ;;  %v2198_v21 = vld [vmem:[%s4413_s4] sm:$0xf] }
 0x436   :  { %v2187_v29 = vmul.f32 -1.442695, %v1322_v31  ;;  %v2188_v33 = vmul.f32 -1.442695, %v1323_v22  ;;  %v2276_v31 = vld [vmem:[%s4413_s4 + $0xd8] sm:$0xf0] }
 0x437   :  { %v2279_v17 = vor.u32 %v2348_v25, %v2276_v31  ;;  %v2258_v22 = vld [vmem:[%s4413_s4 + $0xa0] sm:$0xf]  ;;  %v2331_v25 = vld [vmem:[%s4413_s4 + $0xc] sm:$0xf0] }
 0x438   :  { %2436 = vpow2.f32 %v2187_v29  ;;  %v2346_v29 = vld [vmem:[%s4413_s4 + $0xac] sm:$0xf0]  ;;  %v2199_v31 = vor.u32 %v2331_v25, %v2198_v21  ;;  %v1958_v21 = vld [vmem:[%s4414_s6 + $0x60] sm:$0xff] }
 0x439   :  { %2438 = vpow2.f32 %v2188_v33  ;;  %v2345_v33 = vld [vmem:[%s4413_s4 + $0xac] sm:$0xf]  ;;  %v1976_v25 = vld [vmem:[%s4414_s6 + $0xf0] sm:$0xff] }
 0x43a   :  { %v1319_v34 = vpop.f32.mrf.mxu3  ;;  %v1299_v41 = vpop.f32.mrf.mxu2 }
 0x43b   :  { %v1325_v36 = vadd.f32 %v1319_v34, %v4701_v35  ;;  %v1324_v43 = vadd.f32 %v1299_v41, %v4702_v55  ;;  %v2259_v34 = vor.u32 %v2346_v29, %v2258_v22  ;;  %v2264_v35 = vld [vmem:[%s4413_s4 + $0xb8] sm:$0xf0]  ;;  %v4703_v55 = vld [vmem:[#allocation50_spill] sm:$0xff] }
 0x43c   :  { %v2204_v22 = vld [vmem:[%s4413_s4 + $0x18] sm:$0xf0] }
 0x43d   :  { %v2189_v37 = vmul.f32 -1.442695, %v1325_v36  ;;  %v2267_v36 = vor.u32 %v2345_v33, %v2264_v35  ;;  %v2341_v35 = vld [vmem:[%s4413_s4 + $0x74] sm:$0xf0] }
 0x43e   :  { %v2437_v57 = vpop.eup %2436 }
 0x43f   :  { %v2439_v59 = vpop.eup %2438  ;;  %v1329_v46 = vadd.f32 1.0, %v2437_v57  ;;  %2440 = vpow2.f32 %v2189_v37  ;;  %v2246_v37 = vld [vmem:[%s4413_s4 + $0x80] sm:$0xf]  ;;  %v2343_v57 = vld [vmem:[%s4413_s4 + $0x8c] sm:$0xf0] }
 0x440   :  { %v1348_v38 = vadd.f32 1.0, %v2439_v59  ;;  %v2342_v59 = vld [vmem:[%s4413_s4 + $0x8c] sm:$0xf]  ;;  %v2247_v41 = vor.u32 %v2343_v57, %v2246_v37 }
 0x441   :  { %2442 = vrcp.f32 %v1329_v46  ;;  %v1341_v44 = vand.u32 2147483648, %v1329_v46  ;;  %v1339_v56 = vand.u32 2147483647, %v1329_v46  ;;  %vm1335_vm14 = vweird.f32 %v1329_v46 }
 0x442   :  { %2444 = vrcp.f32 %v1348_v38  ;;  %v1360_v54 = vand.u32 2147483648, %v1348_v38  ;;  %v1358_v63 = vand.u32 2147483647, %v1348_v38  ;;  %vm1354_vm15 = vweird.f32 %v1348_v38 }
 0x443   :  { %v1342_v39 = vor.u32 1.1754944e-38, %v1341_v44  ;;  %vm1340_vm2 = vcmp.eq.f32.partialorder %v1339_v56, 8.507059e+37  ;;  %v2339_v56 = vld [vmem:[%s4413_s4 + $0x6c] sm:$0xf] }
 0x444   :  { %v1361_v1 = vor.u32 1.1754944e-38, %v1360_v54  ;;  %vm1359_vm3 = vcmp.eq.f32.partialorder %v1358_v63, 8.507059e+37  ;;  %v2234_v54 = vld [vmem:[%s4413_s4 + $0x60] sm:$0xf] }
 0x445   :  { %v2441_v47 = vpop.eup %2440 }
 0x446   :  { %v1368_v62 = vadd.f32 1.0, %v2441_v47  ;;  %v2252_v47 = vld [vmem:[%s4413_s4 + $0x98] sm:$0xf0] }
 0x447   :  { %v2443_v42 = vpop.eup %2442 }
 0x448   :  { %v2445_v61 = vpop.eup %2444  ;;  %v1331_v52 = vmul.f32 %v2443_v42, %v1329_v46  ;;  %2446 = vrcp.f32 %v1368_v62  ;;  %vm1336_vm12 = vweird.f32 %v2443_v42  ;;  %v1380_v20 = vand.u32 2147483648, %v1368_v62 }
 0x449   :  { %v1350_v51 = vmul.f32 %v2445_v61, %v1348_v38  ;;  %2448 = vtanh.f32 %v1324_v43  ;;  %vm1355_vm13 = vweird.f32 %v2445_v61  ;;  %vm1337_vm0 = vmor %vm1335_vm14, %vm1336_vm12  ;;  %vm1374_vm5 = vweird.f32 %v1368_v62 }
 0x44a   :  { %v1332_v40 = vsub.f32 1.0, %v1331_v52  ;;  %vm1356_vm1 = vmor %vm1354_vm15, %vm1355_vm13  ;;  %v1378_v15 = vand.u32 2147483647, %v1368_v62  ;;  %v1381_v13 = vor.u32 1.1754944e-38, %v1380_v20 }
 0x44b   :  { %v1351_v50 = vsub.f32 1.0, %v1350_v51  ;;  %v2255_v51 = vor.u32 %v2342_v59, %v2252_v47  ;;  %v4706_v59 = vld [vmem:[#allocation52_spill] sm:$0xff]  ;;  %v2226_v47 = vld [vmem:[%s4413_s4 + $0x48] sm:$0xf] }
 0x44c   :  { %v1333_v53 = vmul.f32 %v2443_v42, %v1332_v40  ;;  %vm1379_vm7 = vcmp.eq.f32.partialorder %v1378_v15, 8.507059e+37 }
 0x44d   :  { %v1352_v48 = vmul.f32 %v2445_v61, %v1351_v50 }
 0x44e   :  { %v2447_v45 = vpop.eup %2446  ;;  %v1334_v49 = vadd.f32 %v2443_v42, %v1333_v53  ;;  %v2340_v53 = vld [vmem:[%s4413_s4 + $0x6c] sm:$0xf0] }
 0x44f   :  { %v1353_v58 = vadd.f32 %v2445_v61, %v1352_v48  ;;  %v1370_v11 = vmul.f32 %v2447_v45, %v1368_v62  ;;  %v2449_v3 = vpop.eup %2448  ;;  %vm1375_vm4 = vweird.f32 %v2447_v45  ;;  %v2286_v62 = vld [vmem:[%s4413_s4 + $0xe8] sm:$0xf]  ;;  %v2240_v48 = vld [vmem:[%s4413_s4 + $0x78] sm:$0xf0]  ;;  %v2235_v63 = vor.u32 %v2340_v53, %v2234_v54 }
 0x450   :  { %v1338_v2 = vsel %vm1337_vm0, %v2443_v42, %v1334_v49  ;;  %vm1376_vm6 = vmor %vm1374_vm5, %vm1375_vm4  ;;  %v2353_v42 = vld [vmem:[%s4413_s4 + $0xf4] sm:$0xf0]  ;;  %v2274_v49 = vld [vmem:[%s4413_s4 + $0xc8] sm:$0xf] }
 0x451   :  { %v1343_v4 = vsel %vm1340_vm2, %v1342_v39, %v1338_v2  ;;  %v1357_v5 = vsel %vm1356_vm1, %v2445_v61, %v1353_v58  ;;  %v1371_v6 = vsub.f32 1.0, %v1370_v11  ;;  %v4704_v61 = vld [vmem:[#allocation51_spill] sm:$0xff]  ;;  %v2287_v40 = vor.u32 %v2353_v42, %v2286_v62  ;;  %v2350_v39 = vld [vmem:[%s4413_s4 + $0xd4] sm:$0xf0]  ;;  %v2222_v58 = vld [vmem:[%s4413_s4 + $0x40] sm:$0xf] }
 0x452   :  { %v1362_v7 = vsel %vm1359_vm3, %v1361_v1, %v1357_v5  ;;  %v1385_v8 = vmul.f32 %v2449_v3, %v1343_v4  ;;  %v2275_v11 = vor.u32 %v2350_v39, %v2274_v49  ;;  %v2337_v1 = vld [vmem:[%s4413_s4 + $0x4c] sm:$0xf0]  ;;  %v2336_v2 = vld [vmem:[%s4413_s4 + $0x4c] sm:$0xf]  ;;  %v2228_v3 = vld [vmem:[%s4413_s4 + $0x58] sm:$0xf0] }
 0x453   :  { %v1384_v10 = vmul.f32 %v1362_v7, %v4015_v0  ;;  %v1372_v12 = vmul.f32 %v2447_v45, %v1371_v6  ;;  %v2282_v0 = vld [vmem:[%s4413_s4 + $0xe0] sm:$0xf]  ;;  %v2223_v5 = vor.u32 %v2337_v1, %v2222_v58  ;;  %v2231_v6 = vor.u32 %v2336_v2, %v2228_v3  ;;  %v2262_v7 = vld [vmem:[%s4413_s4 + $0xa8] sm:$0xf]  ;;  %v2338_v62 = vld [vmem:[%s4413_s4 + $0x54] sm:$0xf0] }
 0x454   :  { %v2283_v18 = vor.u32 %v2352_v23, %v2282_v0  ;;  %v2333_v23 = vld [vmem:[%s4413_s4 + $0x2c] sm:$0xf]  ;;  %v2202_v49 = vld [vmem:[%s4413_s4 + $0x8] sm:$0xf]  ;;  %v2332_v39 = vld [vmem:[%s4413_s4 + $0x14] sm:$0xf0] }
 0x455   :  { %v4087_v32 = vadd.f32 %v1385_v8, %v1384_v10  ;;  %v1373_v16 = vadd.f32 %v2447_v45, %v1372_v12  ;;  %v2347_v8 = vld [vmem:[%s4413_s4 + $0xb4] sm:$0xf0]  ;;  %v4705_v10 = vld [vmem:[#allocation53_spill] sm:$0xff] }
 0x457   :  { %2450 = vtanh.f32 %v4087_v32  ;;  %v1377_v60 = vsel %vm1376_vm6, %v2447_v45, %v1373_v16  ;;  %v2243_v45 = vor.u32 %v2339_v56, %v2240_v48  ;;  %v2263_v16 = vor.u32 %v2347_v8, %v2262_v7 }
 0x458   :  { %v1382_v30 = vsel %vm1379_vm7, %v1381_v13, %v1377_v60  ;;  %v2203_v8 = vor.u32 %v2332_v39, %v2202_v49 }
 0x45d   :  { %v2451_v9 = vpop.eup %2450 }
 0x45e   :  { %v1388_v19 = vmul.f32 %v2451_v9, %v1382_v30  ;;  %v2210_v9 = vld [vmem:[%s4413_s4 + $0x20] sm:$0xf]  ;;  %v2334_v30 = vld [vmem:[%s4413_s4 + $0x2c] sm:$0xf0] }
 0x45f   :  { %v2211_v0 = vor.u32 %v2334_v30, %v2210_v9 }
 0x460   :  { %1409 = vmatmul.f32.vlgmr.msrb.gmra.mxu0 %v1388_v19  ;;  %1429 = vmatmul.f32.vlgmr.msrb.gmra.mxu1 %v1388_v19 }
 0x461   :  { %1449 = vmatmul.f32.vlgmr.msrb.gmra.mxu2 %v1388_v19  ;;  %1469 = vmatmul.f32.vlgmr.msrb.gmra.mxu3 %v1388_v19 }
 0x462   :  { %1865 = vmatpush.bf16.msrb.mxu0 %v2283_v18  ;;  %1891 = vmatpush.bf16.msrb.mxu2 %v2291_v28  ;;  %v2250_v18 = vld [vmem:[%s4413_s4 + $0x88] sm:$0xf]  ;;  %v2219_v28 = vor.u32 %v2333_v23, %v2216_v26  ;;  %v1696_v26 = vld [vmem:[%s4410_s0 + $0x1c] sm:$0xf] }
 0x463   :  { %1878 = vmatpush.bf16.msrb.mxu1 %v2287_v40  ;;  %v2251_v24 = vor.u32 %v2344_v14, %v2250_v18  ;;  %v1961_v18 = vld [vmem:[%s4414_s6 + $0x78] sm:$0xff]  ;;  %v1960_v14 = vld [vmem:[%s4414_s6 + $0x70] sm:$0xff] }
 0x466   :  { %1866 = vmatpush.bf16.msrb.mxu0 %v2271_v27  ;;  %1892 = vmatpush.bf16.msrb.mxu2 %v2279_v17  ;;  %v2330_v17 = vld [vmem:[%s4413_s4 + $0xc] sm:$0xf] }
 0x467   :  { %1879 = vmatpush.bf16.msrb.mxu1 %v2275_v11  ;;  %v2207_v33 = vor.u32 %v2330_v17, %v2204_v22  ;;  %v1956_v17 = vld [vmem:[%s4414_s6 + $0x50] sm:$0xff]  ;;  %v1974_v22 = vld [vmem:[%s4414_s6 + $0xe0] sm:$0xff] }
 0x46a   :  { %1867 = vmatpush.bf16.msrb.mxu0 %v2259_v34  ;;  %1893 = vmatpush.bf16.msrb.mxu2 %v2267_v36  ;;  %v2238_v34 = vld [vmem:[%s4413_s4 + $0x68] sm:$0xf] }
 0x46b   :  { %1880 = vmatpush.bf16.msrb.mxu1 %v2263_v16  ;;  %v2239_v37 = vor.u32 %v2341_v35, %v2238_v34  ;;  %v1954_v34 = vld [vmem:[%s4414_s6 + $0x40] sm:$0xff]  ;;  %v1972_v35 = vld [vmem:[%s4414_s6 + $0xd0] sm:$0xff] }
 0x46e   :  { %1868 = vmatpush.bf16.msrb.mxu0 %v2247_v41  ;;  %1894 = vmatpush.bf16.msrb.mxu2 %v2255_v51 }
 0x46f   :  { %1881 = vmatpush.bf16.msrb.mxu1 %v2251_v24  ;;  %v1977_v24 = vld [vmem:[%s4414_s6 + $0xf8] sm:$0xff] }
 0x470   :  { %1978 = vmatpush.msrb.mxu3 %v1977_v24  ;;  %v4710_v24 = vld [vmem:[#allocation56_spill] sm:$0xff] }
 0x472   :  { %1869 = vmatpush.bf16.msrb.mxu0 %v2235_v63  ;;  %1895 = vmatpush.bf16.msrb.mxu2 %v2243_v45 }
 0x473   :  { %1882 = vmatpush.bf16.msrb.mxu1 %v2239_v37  ;;  %1979 = vmatpush.msrb.mxu3 %v1976_v25  ;;  %v1971_v37 = vld [vmem:[%s4414_s6 + $0xc8] sm:$0xff] }
 0x476   :  { %1870 = vmatpush.bf16.msrb.mxu0 %v2223_v5  ;;  %1896 = vmatpush.bf16.msrb.mxu2 %v2231_v6 }
 0x47a   :  { %1871 = vmatpush.bf16.msrb.mxu0 %v2211_v0  ;;  %1897 = vmatpush.bf16.msrb.mxu2 %v2219_v28  ;;  %v1959_v28 = vld [vmem:[%s4414_s6 + $0x68] sm:$0xff] }
 0x47e   :  { %1872 = vmatpush.bf16.msrb.mxu0 %v2199_v31  ;;  %1898 = vmatpush.bf16.msrb.mxu2 %v2207_v33  ;;  %v1975_v31 = vld [vmem:[%s4414_s6 + $0xe8] sm:$0xff]  ;;  %v1973_v33 = vld [vmem:[%s4414_s6 + $0xd8] sm:$0xff] }
 0x47f   :  { %1980 = vmatpush.msrb.mxu3 %v1975_v31 }
 0x481   :  { %1981 = vmatpush.msrb.mxu3 %v1974_v22 }
 0x483   :  { %1982 = vmatpush.msrb.mxu3 %v1973_v33 }
 0x485   :  { %1983 = vmatpush.msrb.mxu3 %v1972_v35 }
 0x487   :  { %1984 = vmatpush.msrb.mxu3 %v1971_v37 }
 0x4dd   :  { %v1410_v46 = vpop.f32.mrf.mxu0  ;;  %v1430_v38 = vpop.f32.mrf.mxu1 }
 0x4de   :  { %v1473_v43 = vadd.f32 %v1410_v46, %v4703_v55  ;;  %v1474_v52 = vadd.f32 %v1430_v38, %v4704_v61  ;;  %v2214_v61 = vld [vmem:[%s4413_s4 + $0x28] sm:$0xf] }
 0x4e0   :  { %v2190_v50 = vmul.f32 -1.442695, %v1473_v43  ;;  %v2191_v44 = vmul.f32 -1.442695, %v1474_v52  ;;  %v2227_v43 = vor.u32 %v2338_v62, %v2226_v47  ;;  %v2335_v52 = vld [vmem:[%s4413_s4 + $0x34] sm:$0xf0] }
 0x4e1   :  { %v2215_v48 = vor.u32 %v2335_v52, %v2214_v61  ;;  %v4708_v47 = vld [vmem:[#allocation55_spill] sm:$0xff] }
 0x4e2   :  { %2452 = vpow2.f32 %v2190_v50  ;;  %1883 = vmatpush.bf16.msrb.mxu1 %v2227_v43  ;;  %v4328_v43 = vld [vmem:[%s4415_s5] sm:$0xf] }
 0x4e3   :  { %2454 = vpow2.f32 %v2191_v44 }
 0x4e4   :  { %v1470_v4 = vpop.f32.mrf.mxu3  ;;  %v1450_v27 = vpop.f32.mrf.mxu2 }
 0x4e5   :  { %v1476_v12 = vadd.f32 %v1470_v4, %v4705_v10  ;;  %v1475_v46 = vadd.f32 %v1450_v27, %v4706_v59  ;;  %v1957_v27 = vld [vmem:[%s4414_s6 + $0x58] sm:$0xff] }
 0x4e6   :  { %1884 = vmatpush.bf16.msrb.mxu1 %v2215_v48  ;;  %v1967_v48 = vld [vmem:[%s4414_s6 + $0xa8] sm:$0xff] }
 0x4e7   :  { %v2192_v20 = vmul.f32 -1.442695, %v1476_v12 }
 0x4e8   :  { %v2453_v15 = vpop.eup %2452 }
 0x4e9   :  { %v2455_v60 = vpop.eup %2454  ;;  %v4183_v13 = vadd.f32 1.0, %v2453_v15  ;;  %2456 = vpow2.f32 %v2192_v20 }
 0x4ea   :  { %v4191_v19 = vadd.f32 1.0, %v2455_v60  ;;  %1885 = vmatpush.bf16.msrb.mxu1 %v2203_v8 }
 0x4eb   :  { %2458 = vrcp.f32 %v4183_v13  ;;  %v1490_v40 = vand.u32 2147483647, %v4183_v13  ;;  %v1492_v50 = vand.u32 2147483648, %v4183_v13  ;;  %vm1486_vm10 = vweird.f32 %v4183_v13 }
 0x4ec   :  { %2460 = vrcp.f32 %v4191_v19  ;;  %v1511_v44 = vand.u32 2147483648, %v4191_v19  ;;  %v1509_v53 = vand.u32 2147483647, %v4191_v19  ;;  %vm1505_vm11 = vweird.f32 %v4191_v19 }
 0x4ed   :  { %v1493_v58 = vor.u32 1.1754944e-38, %v1492_v50  ;;  %vm1491_vm14 = vcmp.eq.f32.partialorder %v1490_v40, 8.507059e+37  ;;  %v1950_v40 = vld [vmem:[%s4414_s6 + $0x20] sm:$0xff]  ;;  %v1731_v50 = vperm.slane %v4328_v43, 0 }
 0x4ee   :  { %v1512_v2 = vor.u32 1.1754944e-38, %v1511_v44  ;;  %vm1510_vm15 = vcmp.eq.f32.partialorder %v1509_v53, 8.507059e+37  ;;  %v1968_v44 = vld [vmem:[%s4414_s6 + $0xb0] sm:$0xff] }
 0x4ef   :  { %v2457_v29 = vpop.eup %2456 }
 0x4f0   :  { %v4225_v36 = vadd.f32 1.0, %v2457_v29  ;;  %v1955_v29 = vld [vmem:[%s4414_s6 + $0x48] sm:$0xff] }
 0x4f1   :  { %v2459_v57 = vpop.eup %2458 }
 0x4f2   :  { %v2461_v38 = vpop.eup %2460  ;;  %v1482_v41 = vmul.f32 %v2459_v57, %v4183_v13  ;;  %2462 = vrcp.f32 %v4225_v36  ;;  %vm1487_vm8 = vweird.f32 %v2459_v57  ;;  %v1531_v13 = vand.u32 2147483648, %v4225_v36 }
 0x4f3   :  { %v1501_v42 = vmul.f32 %v2461_v38, %v4191_v19  ;;  %2464 = vtanh.f32 %v1475_v46  ;;  %vm1506_vm9 = vweird.f32 %v2461_v38  ;;  %vm1488_vm12 = vmor %vm1486_vm10, %vm1487_vm8  ;;  %vm1525_vm1 = vweird.f32 %v4225_v36 }
 0x4f4   :  { %v1483_v55 = vsub.f32 1.0, %v1482_v41  ;;  %vm1507_vm13 = vmor %vm1505_vm11, %vm1506_vm9  ;;  %v1529_v9 = vand.u32 2147483647, %v4225_v36  ;;  %v1532_v19 = vor.u32 1.1754944e-38, %v1531_v13 }
 0x4f5   :  { %v1502_v51 = vsub.f32 1.0, %v1501_v42  ;;  %v1970_v42 = vld [vmem:[%s4414_s6 + $0xc0] sm:$0xff] }
 0x4f6   :  { %v1484_v54 = vmul.f32 %v2459_v57, %v1483_v55  ;;  %vm1530_vm3 = vcmp.eq.f32.partialorder %v1529_v9, 8.507059e+37  ;;  %v1951_v55 = vld [vmem:[%s4414_s6 + $0x28] sm:$0xff]  ;;  %1985 = vmatpush.msrb.mxu3 %v1970_v42  ;;  %v1962_v9 = vld [vmem:[%s4414_s6 + $0x80] sm:$0xff] }
 0x4f7   :  { %v1503_v56 = vmul.f32 %v2461_v38, %v1502_v51  ;;  %v1969_v51 = vld [vmem:[%s4414_s6 + $0xb8] sm:$0xff] }
 0x4f8   :  { %v2463_v63 = vpop.eup %2462  ;;  %v1485_v45 = vadd.f32 %v2459_v57, %v1484_v54  ;;  %1986 = vmatpush.msrb.mxu3 %v1969_v51  ;;  %v1949_v54 = vld [vmem:[%s4414_s6 + $0x18] sm:$0xff] }
 0x4f9   :  { %v1504_v11 = vadd.f32 %v2461_v38, %v1503_v56  ;;  %v1521_v1 = vmul.f32 %v2463_v63, %v4225_v36  ;;  %v2465_v4 = vpop.eup %2464  ;;  %vm1526_vm0 = vweird.f32 %v2463_v63  ;;  %v1953_v36 = vld [vmem:[%s4414_s6 + $0x38] sm:$0xff] }
 0x4fa   :  { %v1489_v3 = vsel %vm1488_vm12, %v2459_v57, %v1485_v45  ;;  %vm1527_vm2 = vmor %vm1525_vm1, %vm1526_vm0  ;;  %v1952_v57 = vld [vmem:[%s4414_s6 + $0x30] sm:$0xff]  ;;  %1987 = vmatpush.msrb.mxu3 %v1968_v44  ;;  %v4709_v45 = vld [vmem:[#allocation57_spill] sm:$0xff] }
 0x4fb   :  { %v1494_v5 = vsel %vm1491_vm14, %v1493_v58, %v1489_v3  ;;  %v1508_v6 = vsel %vm1507_vm13, %v2461_v38, %v1504_v11  ;;  %v1522_v7 = vsub.f32 1.0, %v1521_v1  ;;  %v4707_v38 = vld [vmem:[#allocation54_spill] sm:$0xff]  ;;  %v1966_v1 = vld [vmem:[%s4414_s6 + $0xa0] sm:$0xff]  ;;  %v1965_v3 = vld [vmem:[%s4414_s6 + $0x98] sm:$0xff] }
 0x4fc   :  { %v1513_v10 = vsel %vm1510_vm15, %v1512_v2, %v1508_v6  ;;  %v1536_v12 = vmul.f32 %v2465_v4, %v1494_v5  ;;  %1988 = vmatpush.msrb.mxu3 %v1967_v48  ;;  %v1947_v2 = vld [vmem:[%s4414_s6 + $0x8] sm:$0xff]  ;;  %v1946_v5 = vld [vmem:[%s4414_s6] sm:$0xff] }
 0x4fd   :  { %v1535_v16 = vmul.f32 %v1513_v10, %v4087_v32  ;;  %v1523_v20 = vmul.f32 %v2463_v63, %v1522_v7 }
 0x4fe   :  { %1989 = vmatpush.msrb.mxu3 %v1966_v1 }
 0x4ff   :  { %v4257_v15 = vadd.f32 %v1536_v12, %v1535_v16  ;;  %v1524_v60 = vadd.f32 %v2463_v63, %v1523_v20  ;;  %v1733_v12 = vperm.slane %v4328_v43, 3  ;;  %v1964_v20 = vld [vmem:[%s4414_s6 + $0x90] sm:$0xff] }
 0x500   :  { %1990 = vmatpush.msrb.mxu3 %v1965_v3 }
 0x501   :  { %2466 = vtanh.f32 %v4257_v15  ;;  %v1528_v30 = vsel %vm1527_vm2, %v2463_v63, %v1524_v60  ;;  %v1948_v63 = vld [vmem:[%s4414_s6 + $0x10] sm:$0xff]  ;;  %v1963_v60 = vld [vmem:[%s4414_s6 + $0x88] sm:$0xff] }
 0x502   :  { %v1533_v32 = vsel %vm1530_vm3, %v1532_v19, %v1528_v30  ;;  %1991 = vmatpush.msrb.mxu3 %v1964_v20 }
 0x504   :  { %1992 = vmatpush.msrb.mxu3 %v1963_v60 }
 0x506   :  { %1993 = vmatpush.msrb.mxu3 %v1962_v9 }
 0x507   :  { %v2467_v0 = vpop.eup %2466 }
 0x508   :  { %v1539_v23 = vmul.f32 %v2467_v0, %v1533_v32 }
 0x50a   :  { %1560 = vmatmul.f32.vlgmr.msra.gmra.mxu0 %v1539_v23  ;;  %1580 = vmatmul.f32.vlgmr.msra.gmra.mxu1 %v1539_v23 }
 0x50b   :  { %1600 = vmatmul.f32.vlgmr.msra.gmra.mxu2 %v1539_v23  ;;  %1620 = vmatmul.f32.vlgmr.msra.gmra.mxu3 %v1539_v23 }
 0x50c   :  { %1998 = vmatpush.msra.mxu0 %v1961_v18 }
 0x50e   :  { %1999 = vmatpush.msra.mxu0 %v1960_v14 }
 0x510   :  { %2000 = vmatpush.msra.mxu0 %v1959_v28 }
 0x512   :  { %1873 = vmatmul.bf16.vlgmr.msrb.gmra.mxu0 %v1696_v26  ;;  %1886 = vmatmul.bf16.vlgmr.msrb.gmra.mxu1 %v1696_v26 }
 0x513   :  { %1899 = vmatmul.bf16.vlgmr.msrb.gmra.mxu2 %v1696_v26  ;;  %2001 = vmatpush.msra.mxu0 %v1958_v21  ;;  %v1732_v26 = vperm.slane %v4328_v43, 2 }
 0x515   :  { %2002 = vmatpush.msra.mxu0 %v1957_v27 }
 0x517   :  { %2003 = vmatpush.msra.mxu0 %v1956_v17 }
 0x519   :  { %2004 = vmatpush.msra.mxu0 %v1955_v29 }
 0x51b   :  { %2005 = vmatpush.msra.mxu0 %v1954_v34 }
 0x51d   :  { %2006 = vmatpush.msra.mxu0 %v1953_v36 }
 0x51f   :  { %2007 = vmatpush.msra.mxu0 %v1952_v57 }
 0x521   :  { %2008 = vmatpush.msra.mxu0 %v1951_v55 }
 0x523   :  { %2009 = vmatpush.msra.mxu0 %v1950_v40 }
 0x525   :  { %2010 = vmatpush.msra.mxu0 %v1949_v54 }
 0x527   :  { %2011 = vmatpush.msra.mxu0 %v1948_v63 }
 0x529   :  { %2012 = vmatpush.msra.mxu0 %v1947_v2 }
 0x52b   :  { %2013 = vmatpush.msra.mxu0 %v1946_v5 }
 0x587   :  { %v1561_v59 = vpop.f32.mrf.mxu0  ;;  %v1581_v46 = vpop.f32.mrf.mxu1 }
 0x588   :  { %v1624_v41 = vadd.f32 %v1561_v59, %v4707_v38  ;;  %v1625_v62 = vadd.f32 %v1581_v46, %v4708_v47 }
 0x58a   :  { %v2193_v61 = vmul.f32 -1.442695, %v1624_v41  ;;  %v2194_v52 = vmul.f32 -1.442695, %v1625_v62 }
 0x58c   :  { %2468 = vpow2.f32 %v2193_v61 }
 0x58d   :  { %2470 = vpow2.f32 %v2194_v52 }
 0x58e   :  { %v1601_v53 = vpop.f32.mrf.mxu2  ;;  %v1621_v56 = vpop.f32.mrf.mxu3 }
 0x58f   :  { %v1627_v49 = vadd.f32 %v1621_v56, %v4709_v45  ;;  %v1874_v39 = vpop.f32.mrf.mxu0  ;;  %v1887_v58 = vpop.f32.mrf.mxu1  ;;  %v1626_v21 = vadd.f32 %v1601_v53, %v4710_v24 }
 0x590   :  { %v1875_v11 = vadd.f32 %v1874_v39, %v1731_v50  ;;  %v1888_v22 = vadd.f32 %v1887_v58, %v1732_v26 }
 0x591   :  { %v2195_v4 = vmul.f32 -1.442695, %v1627_v49 }
 0x592   :  { %v2469_v6 = vpop.eup %2468  ;;  %v2292_v7 = vmul.f32 -1.442695, %v1875_v11 }
 0x593   :  { %v2471_v8 = vpop.eup %2470  ;;  %v1631_v10 = vadd.f32 1.0, %v2469_v6  ;;  %2472 = vpow2.f32 %v2195_v4 }
 0x594   :  { %v4363_v16 = vadd.f32 1.0, %v2471_v8  ;;  %2474 = vpow2.f32 %v2292_v7 }
 0x595   :  { %2476 = vrcp.f32 %v1631_v10  ;;  %v1641_v35 = vand.u32 2147483647, %v1631_v10  ;;  %v1643_v36 = vand.u32 2147483648, %v1631_v10  ;;  %vm1637_vm7 = vweird.f32 %v1631_v10 }
 0x596   :  { %2478 = vrcp.f32 %v4363_v16  ;;  %v1900_v13 = vpop.f32.mrf.mxu2  ;;  %v1662_v37 = vand.u32 2147483648, %v4363_v16  ;;  %v1660_v38 = vand.u32 2147483647, %v4363_v16  ;;  %vm1656_vm6 = vweird.f32 %v4363_v16 }
 0x597   :  { %v1901_v30 = vadd.f32 %v1900_v13, %v1733_v12  ;;  %v1876_v19 = vpop.f32.mrf.mxu0  ;;  %v1889_v0 = vpop.f32.mrf.mxu1  ;;  %vm1642_vm9 = vcmp.eq.f32.partialorder %v1641_v35, 8.507059e+37  ;;  %v1644_v55 = vor.u32 1.1754944e-38, %v1643_v36 }
 0x598   :  { %v1663_v52 = vor.u32 1.1754944e-38, %v1662_v37  ;;  %vm1661_vm11 = vcmp.eq.f32.partialorder %v1660_v38, 8.507059e+37 }
 0x599   :  { %v2473_v32 = vpop.eup %2472  ;;  %v2293_v23 = vmul.f32 -1.442695, %v1901_v30 }
 0x59a   :  { %v2475_v18 = vpop.eup %2474  ;;  %v4376_v14 = vadd.f32 1.0, %v2473_v32 }
 0x59b   :  { %v2477_v28 = vpop.eup %2476  ;;  %v4379_v25 = vadd.f32 1.0, %v2475_v18  ;;  %2480 = vpow2.f32 %v2293_v23 }
 0x59c   :  { %v2479_v27 = vpop.eup %2478  ;;  %v1633_v31 = vmul.f32 %v2477_v28, %v1631_v10  ;;  %2482 = vrcp.f32 %v4376_v14  ;;  %vm1638_vm4 = vweird.f32 %v2477_v28  ;;  %vm1676_vm1 = vweird.f32 %v4376_v14 }
 0x59d   :  { %v1652_v17 = vmul.f32 %v2479_v27, %v4363_v16  ;;  %2484 = vrcp.f32 %v4379_v25  ;;  %vm1657_vm5 = vweird.f32 %v2479_v27  ;;  %vm1639_vm8 = vmor %vm1637_vm7, %vm1638_vm4  ;;  %v1919_v39 = vand.u32 2147483648, %v4379_v25 }
 0x59e   :  { %v1634_v29 = vsub.f32 1.0, %v1633_v31  ;;  %v1902_v33 = vpop.f32.mrf.mxu2  ;;  %2486 = vtanh.f32 %v1626_v21  ;;  %vm1658_vm10 = vmor %vm1656_vm6, %vm1657_vm5  ;;  %v1917_v1 = vand.u32 2147483647, %v4379_v25  ;;  %vm1913_vm13 = vweird.f32 %v4379_v25 }
 0x59f   :  { %v1653_v34 = vsub.f32 1.0, %v1652_v17  ;;  %2488 = vtanh.f32 %v1888_v22  ;;  %v1920_v7 = vor.u32 1.1754944e-38, %v1919_v39  ;;  %v1680_v10 = vand.u32 2147483647, %v4376_v14 }
 0x5a0   :  { %v1635_v57 = vmul.f32 %v2477_v28, %v1634_v29  ;;  %vm1918_vm0 = vcmp.eq.f32.partialorder %v1917_v1, 8.507059e+37 }
 0x5a1   :  { %v2481_v59 = vpop.eup %2480  ;;  %v1654_v46 = vmul.f32 %v2479_v27, %v1653_v34  ;;  %vm1681_vm4 = vcmp.eq.f32.partialorder %v1680_v10, 8.507059e+37 }
 0x5a2   :  { %v2483_v41 = vpop.eup %2482  ;;  %v1636_v47 = vadd.f32 %v2477_v28, %v1635_v57  ;;  %v4387_v62 = vadd.f32 1.0, %v2481_v59 }
 0x5a3   :  { %v2485_v42 = vpop.eup %2484  ;;  %v1655_v43 = vadd.f32 %v2479_v27, %v1654_v46  ;;  %v1672_v61 = vmul.f32 %v2483_v41, %v4376_v14  ;;  %vm1677_vm14 = vweird.f32 %v2483_v41 }
 0x5a4   :  { %v1640_v51 = vsel %vm1639_vm8, %v2477_v28, %v1636_v47  ;;  %v1909_v40 = vmul.f32 %v2485_v42, %v4379_v25  ;;  %2490 = vrcp.f32 %v4387_v62  ;;  %v2487_v50 = vpop.eup %2486  ;;  %vm1914_vm12 = vweird.f32 %v2485_v42  ;;  %vm1678_vm2 = vmor %vm1676_vm1, %vm1677_vm14  ;;  %v2355_v25 = vld [vmem:[%s4416_s7] ss:$0 sm:$0xff] }
 0x5a5   :  { %v1645_v44 = vsel %vm1642_vm9, %v1644_v55, %v1640_v51  ;;  %v1659_v54 = vsel %vm1658_vm10, %v2479_v27, %v1655_v43  ;;  %v1673_v53 = vsub.f32 1.0, %v1672_v61  ;;  %v2489_v45 = vpop.eup %2488  ;;  %vm1915_vm15 = vmor %vm1913_vm13, %vm1914_vm12  ;;  %v1939_v30 = vand.u32 2147483648, %v4387_v62 }
 0x5a6   :  { %v1664_v56 = vsel %vm1661_vm11, %v1663_v52, %v1659_v54  ;;  %v1687_v48 = vmul.f32 %v2487_v50, %v1645_v44  ;;  %v1910_v63 = vsub.f32 1.0, %v1909_v40  ;;  %vm1933_vm5 = vweird.f32 %v4387_v62 }
 0x5a7   :  { %v1686_v49 = vmul.f32 %v1664_v56, %v4257_v15  ;;  %v1674_v58 = vmul.f32 %v2483_v41, %v1673_v53  ;;  %v1682_v15 = vand.u32 2147483648, %v4376_v14  ;;  %v1937_v23 = vand.u32 2147483647, %v4387_v62 }
 0x5a8   :  { %v1911_v11 = vmul.f32 %v2485_v42, %v1910_v63  ;;  %v1940_v14 = vor.u32 1.1754944e-38, %v1939_v30 }
 0x5a9   :  { %v1688_v2 = vadd.f32 %v1687_v48, %v1686_v49  ;;  %v1675_v5 = vadd.f32 %v2483_v41, %v1674_v58  ;;  %v1683_v13 = vor.u32 1.1754944e-38, %v1682_v15  ;;  %vm1938_vm7 = vcmp.eq.f32.partialorder %v1937_v23, 8.507059e+37 }
 0x5aa   :  { %v2491_v3 = vpop.eup %2490  ;;  %v1912_v4 = vadd.f32 %v2485_v42, %v1911_v11 }
 0x5ab   :  { %2492 = vtanh.f32 %v1688_v2  ;;  %v1929_v6 = vmul.f32 %v2491_v3, %v4387_v62  ;;  %v1679_v60 = vsel %vm1678_vm2, %v2483_v41, %v1675_v5  ;;  %vm1934_vm3 = vweird.f32 %v2491_v3 }
 0x5ac   :  { %v1916_v8 = vsel %vm1915_vm15, %v2485_v42, %v1912_v4  ;;  %v1684_v0 = vsel %vm1681_vm4, %v1683_v13, %v1679_v60  ;;  %vm1935_vm6 = vmor %vm1933_vm5, %vm1934_vm3 }
 0x5ad   :  { %v1930_v12 = vsub.f32 1.0, %v1929_v6  ;;  %v1921_v16 = vsel %vm1918_vm0, %v1920_v7, %v1916_v8 }
 0x5ae   :  { %v1943_v20 = vmul.f32 %v2489_v45, %v1921_v16 }
 0x5af   :  { %v1931_v9 = vmul.f32 %v2491_v3, %v1930_v12 }
 0x5b0   :  { %2494 = vtanh.f32 %v1943_v20 }
 0x5b1   :  { %v2493_v19 = vpop.eup %2492  ;;  %v1932_v32 = vadd.f32 %v2491_v3, %v1931_v9 }
 0x5b2   :  { %v1690_v26 = vmul.f32 %v2493_v19, %v1684_v0 }
 0x5b3   :  { %v1936_v18 = vsel %vm1935_vm6, %v2491_v3, %v1932_v32 }
 0x5b4   :  { %2014 = vmatmul.f32.vlgmr.msra.gmra.mxu0 %v1690_v26  ;;  %v1941_v24 = vsel %vm1938_vm7, %v1940_v14, %v1936_v18 }
 0x5b6   :  { %v2495_v28 = vpop.eup %2494 }
 0x5b7   :  { %v1945_v21 = vmul.f32 %v2495_v28, %v1941_v24 }
 0x5b9   :  { %1994 = vmatmul.f32.vlgmr.msrb.gmra.mxu3 %v1945_v21 }
 0x631   :  { %v2015_v27 = vpop.f32.mrf.mxu0 }
 0x63c   :  { %v1995_v31 = vpop.f32.mrf.mxu3 }
 0x63d   :  { %v2016_v17 = vadd.f32 %v2015_v27, %v1995_v31 }
 0x63f   :  { %v2022_v22 = vadd.f32 %v2355_v25, %v2016_v17 }
 0x641   :  { %2023 = vst [vmem:[%s4417_s8] sm:$0xff] %v2022_v22 }

</bundles_post_ra>
